<compile_context>
chip_gen: v5e
topology: v5e:2x2
jax: 0.10.0
libtpu: 0.0.40
codegen_flags: <defaults>
</compile_context>

<pallas_src>
import math
import functools

import jax
import jax.numpy as jnp
from jax.experimental import pallas as pl
from jax.experimental.pallas import tpu as pltpu


_INV_SQRT2 = 1.0 / math.sqrt(2.0)


def _round_up(x, m):
    return ((x + m - 1) // m) * m


# ---------------- stage 1: support = x @ W (tiled over rows) ----------------
def _proj_kernel(x_ref, w_ref, s_ref):
    s_ref[...] = jnp.dot(
        x_ref[...], w_ref[...], preferred_element_type=jnp.float32
    ).astype(s_ref.dtype)


# -------- stage 2: out = gelu(adj @ support + b), tiled (row, k) ------------
def _agg_kernel(adj_ref, s_ref, b_ref, out_ref, acc_ref):
    k = pl.program_id(1)

    @pl.when(k == 0)
    def _():
        acc_ref[...] = jnp.zeros_like(acc_ref)

    # Inner loop is pure MXU + DMA: accumulate adj_tile @ support_tile in f32.
    acc_ref[...] += jnp.dot(
        adj_ref[...], s_ref[...], preferred_element_type=jnp.float32
    )

    # Epilogue (bias + exact GELU) only on the last k step, single store.
    @pl.when(k == pl.num_programs(1) - 1)
    def _():
        out = acc_ref[...] + b_ref[...]
        out = 0.5 * out * (1.0 + jax.lax.erf(out * _INV_SQRT2))
        out_ref[...] = out.astype(out_ref.dtype)


@functools.partial(jax.jit, static_argnames=("tm", "tk"))
def gcn_forward(x, adj, w, b, *, tm=256, tk=512):
    # tm must divide tk (so both divide the padded node count).
    N, F = x.shape
    H = w.shape[1]

    # Lane-dense / tile-aligned padding (zeros are exact no-ops for the math).
    Fp = _round_up(F, 128)
    Hp = _round_up(H, 128)
    Np = _round_up(N, tk)

    xp = jnp.pad(x, ((0, Np - N), (0, Fp - F)))
    adjp = jnp.pad(adj, ((0, Np - N), (0, Np - N)))
    wp = jnp.pad(w, ((0, Fp - F), (0, Hp - H)))
    bp = jnp.pad(b.reshape(1, H), ((0, 0), (0, Hp - H)))

    # NOTE(v6e): adj/support could be cast to bf16 here (f32 accumulate) to halve
    # HBM traffic; kept f32 for bit-tight validation against the reference.

    # ---- stage 1: support = x @ W (hoisted out of the aggregation loop) ----
    support = pl.pallas_call(
        _proj_kernel,
        out_shape=jax.ShapeDtypeStruct((Np, Hp), jnp.float32),
        grid_spec=pltpu.PrefetchScalarGridSpec(
            num_scalar_prefetch=0,
            grid=(Np // tm,),
            in_specs=[
                pl.BlockSpec((tm, Fp), lambda i: (i, 0)),   # x row tile
                pl.BlockSpec((Fp, Hp), lambda i: (0, 0)),   # W (resident)
            ],
            out_specs=pl.BlockSpec((tm, Hp), lambda i: (i, 0)),
        ),
        compiler_params=pltpu.CompilerParams(
            dimension_semantics=("parallel",),
            vmem_limit_bytes=48 << 20,
        ),
    )(xp, wp)

    # ---- stage 2: out = gelu(adj @ support + b) ----
    outp = pl.pallas_call(
        _agg_kernel,
        out_shape=jax.ShapeDtypeStruct((Np, Hp), jnp.float32),
        grid_spec=pltpu.PrefetchScalarGridSpec(
            num_scalar_prefetch=0,
            grid=(Np // tm, Np // tk),
            in_specs=[
                pl.BlockSpec((tm, tk), lambda i, k: (i, k)),  # adj tile
                pl.BlockSpec((tk, Hp), lambda i, k: (k, 0)),  # support tile
                pl.BlockSpec((1, Hp), lambda i, k: (0, 0)),   # bias (resident)
            ],
            out_specs=pl.BlockSpec((tm, Hp), lambda i, k: (i, 0)),
            scratch_shapes=[pltpu.VMEM((tm, Hp), jnp.float32)],
        ),
        compiler_params=pltpu.CompilerParams(
            dimension_semantics=("parallel", "arbitrary"),
            vmem_limit_bytes=48 << 20,
        ),
    )(adjp, support, bp)

    return outp[:N, :H]


def _reference(x, adj, w, b):
    support = x @ w
    out = adj @ support + b
    return 0.5 * out * (1.0 + jax.lax.erf(out / jnp.sqrt(2.0)))


if __name__ == "__main__":
    key = jax.random.PRNGKey(0)
    k_x, k_adj, k_w, k_b = jax.random.split(key, 4)

    # Small, module-consistent shapes: N nodes, nfeat input features, nhid hidden.
    # (N and nfeat deliberately NOT multiples of the tile sizes to exercise the
    #  padding path.)
    N, nfeat, nhid = 384, 48, 16

    x = jax.random.normal(k_x, (N, nfeat), dtype=jnp.float32)

    # Symmetric, row-normalized adjacency (typical GCN preprocessing).
    a = jax.random.uniform(k_adj, (N, N), dtype=jnp.float32)
    a = (a > 0.9).astype(jnp.float32)
    a = jnp.minimum(a + a.T + jnp.eye(N, dtype=jnp.float32), 1.0)
    deg = jnp.sum(a, axis=1, keepdims=True)
    adj = a / deg

    # pygcn-style uniform init: U(-stdv, stdv) with stdv = 1/sqrt(nhid).
    stdv = 1.0 / math.sqrt(nhid)
    w = jax.random.uniform(k_w, (nfeat, nhid), dtype=jnp.float32,
                           minval=-stdv, maxval=stdv)
    b = jax.random.uniform(k_b, (nhid,), dtype=jnp.float32,
                           minval=-stdv, maxval=stdv)

    out = gcn_forward(x, adj, w, b)
    jax.block_until_ready(out)

    ref = _reference(x, adj, w, b)
    assert out.shape == (N, nhid)
    assert jnp.allclose(out, ref, atol=1e-4, rtol=1e-4), "mismatch vs reference"

    print("KERNEL_OK")
</pallas_src>

<mosaic_0001>
module attributes {stable_mosaic.version = 11 : i64} {
  func.func @_proj_kernel(%arg0: i32, %arg1: memref<256x128xf32, #tpu.memory_space<vmem>>, %arg2: memref<128x128xf32, #tpu.memory_space<vmem>>, %arg3: memref<256x128xf32, #tpu.memory_space<vmem>>) attributes {dimension_semantics = [#tpu.dimension_semantics<parallel>], iteration_bounds = array<i64: 2>, scalar_prefetch = 0 : i64, scratch_operands = 0 : i64, tpu.core_type = #tpu.core_type<tc>, window_params = [{transform_indices = @transform_0, window_bounds = array<i64: 256, 128>}, {pipeline_mode = #tpu.pipeline_mode<synchronous>, transform_indices = @transform_1, window_bounds = array<i64: 128, 128>}, {transform_indices = @transform_2, window_bounds = array<i64: 256, 128>}]} {
    %c0 = arith.constant 0 : index
    %c0_0 = arith.constant 0 : index
    %0 = vector.load %arg1[%c0, %c0_0] : memref<256x128xf32, #tpu.memory_space<vmem>>, vector<256x128xf32>
    %c0_1 = arith.constant 0 : index
    %c0_2 = arith.constant 0 : index
    %1 = vector.load %arg2[%c0_1, %c0_2] : memref<128x128xf32, #tpu.memory_space<vmem>>, vector<128x128xf32>
    %cst = arith.constant dense<0.000000e+00> : vector<256x128xf32>
    %2 = tpu.matmul %0, %1, %cst {dimension_numbers = #tpu.dot_dimension_numbers<[1], [0], [0], [1], [0, 0, 1, 1], [], []>} : vector<256x128xf32>, vector<128x128xf32>, vector<256x128xf32> -> vector<256x128xf32>
    %c0_3 = arith.constant 0 : index
    %c0_4 = arith.constant 0 : index
    %3 = vector.load %arg3[%c0_3, %c0_4] : memref<256x128xf32, #tpu.memory_space<vmem>>, vector<256x128xf32>
    tpu.vector_store %arg3[%c0_3, %c0_4], %2 {strides = array<i32>} : memref<256x128xf32, #tpu.memory_space<vmem>>, vector<256x128xf32>,
    return
  }
  func.func @transform_0(%arg0: i32) -> (i32, i32) {
    %c0_i32 = arith.constant 0 : i32
    %c0_i32_0 = arith.constant 0 : i32
    return %arg0, %c0_i32 : i32, i32
  }
  func.func @transform_1(%arg0: i32) -> (i32, i32) {
    %c0_i32 = arith.constant 0 : i32
    %c0_i32_0 = arith.constant 0 : i32
    %c0_i32_1 = arith.constant 0 : i32
    return %c0_i32, %c0_i32_0 : i32, i32
  }
  func.func @transform_2(%arg0: i32) -> (i32, i32) {
    %c0_i32 = arith.constant 0 : i32
    %c0_i32_0 = arith.constant 0 : i32
    return %arg0, %c0_i32 : i32, i32
  }
}

module attributes {stable_mosaic.version = 11 : i64} {
  func.func @_agg_kernel(%arg0: i32, %arg1: i32, %arg2: memref<256x512xf32, #tpu.memory_space<vmem>>, %arg3: memref<512x128xf32, #tpu.memory_space<vmem>>, %arg4: memref<1x128xf32, #tpu.memory_space<vmem>>, %arg5: memref<256x128xf32, #tpu.memory_space<vmem>>, %arg6: memref<256x128xf32, #tpu.memory_space<vmem>>) attributes {dimension_semantics = [#tpu.dimension_semantics<parallel>, #tpu.dimension_semantics<arbitrary>], iteration_bounds = array<i64: 2, 1>, scalar_prefetch = 0 : i64, scratch_operands = 1 : i64, tpu.core_type = #tpu.core_type<tc>, window_params = [{transform_indices = @transform_0, window_bounds = array<i64: 256, 512>}, {transform_indices = @transform_1, window_bounds = array<i64: 512, 128>}, {pipeline_mode = #tpu.pipeline_mode<synchronous>, transform_indices = @transform_2, window_bounds = array<i64: 1, 128>}, {transform_indices = @transform_3, window_bounds = array<i64: 256, 128>}]} {
    %c0_i32 = arith.constant 0 : i32
    %0 = arith.cmpi eq, %arg1, %c0_i32 : i32
    %1 = arith.extui %0 : i1 to i32
    %c0_i32_0 = arith.constant 0 : i32
    %2 = arith.cmpi ne, %1, %c0_i32_0 : i32
    scf.if %2 {
      %cst_10 = arith.constant 0.000000e+00 : f32
      %12 = vector.broadcast %cst_10 : f32 to vector<256x128xf32>
      %c0_11 = arith.constant 0 : index
      %c0_12 = arith.constant 0 : index
      %13 = vector.load %arg6[%c0_11, %c0_12] : memref<256x128xf32, #tpu.memory_space<vmem>>, vector<256x128xf32>
      tpu.vector_store %arg6[%c0_11, %c0_12], %12 {strides = array<i32>} : memref<256x128xf32, #tpu.memory_space<vmem>>, vector<256x128xf32>,
    } else {
    }
    %c0 = arith.constant 0 : index
    %c0_1 = arith.constant 0 : index
    %3 = vector.load %arg6[%c0, %c0_1] : memref<256x128xf32, #tpu.memory_space<vmem>>, vector<256x128xf32>
    %c0_2 = arith.constant 0 : index
    %c0_3 = arith.constant 0 : index
    %4 = vector.load %arg2[%c0_2, %c0_3] : memref<256x512xf32, #tpu.memory_space<vmem>>, vector<256x512xf32>
    %c0_4 = arith.constant 0 : index
    %c0_5 = arith.constant 0 : index
    %5 = vector.load %arg3[%c0_4, %c0_5] : memref<512x128xf32, #tpu.memory_space<vmem>>, vector<512x128xf32>
    %cst = arith.constant dense<0.000000e+00> : vector<256x128xf32>
    %6 = tpu.matmul %4, %5, %cst {dimension_numbers = #tpu.dot_dimension_numbers<[1], [0], [0], [1], [0, 0, 1, 1], [], []>} : vector<256x512xf32>, vector<512x128xf32>, vector<256x128xf32> -> vector<256x128xf32>
    %7 = arith.addf %3, %6 : vector<256x128xf32>
    %c0_6 = arith.constant 0 : index
    %c0_7 = arith.constant 0 : index
    %8 = vector.load %arg6[%c0_6, %c0_7] : memref<256x128xf32, #tpu.memory_space<vmem>>, vector<256x128xf32>
    tpu.vector_store %arg6[%c0_6, %c0_7], %7 {strides = array<i32>} : memref<256x128xf32, #tpu.memory_space<vmem>>, vector<256x128xf32>,
    %c0_i32_8 = arith.constant 0 : i32
    %9 = arith.cmpi eq, %arg1, %c0_i32_8 : i32
    %10 = arith.extui %9 : i1 to i32
    %c0_i32_9 = arith.constant 0 : i32
    %11 = arith.cmpi ne, %10, %c0_i32_9 : i32
    scf.if %11 {
      %c0_10 = arith.constant 0 : index
      %c0_11 = arith.constant 0 : index
      %12 = vector.load %arg6[%c0_10, %c0_11] : memref<256x128xf32, #tpu.memory_space<vmem>>, vector<256x128xf32>
      %c0_12 = arith.constant 0 : index
      %c0_13 = arith.constant 0 : index
      %13 = vector.load %arg4[%c0_12, %c0_13] : memref<1x128xf32, #tpu.memory_space<vmem>>, vector<1x128xf32>
      %14 = vector.broadcast %13 : vector<1x128xf32> to vector<256x128xf32>
      %15 = arith.addf %12, %14 : vector<256x128xf32>
      %cst_14 = arith.constant 5.000000e-01 : f32
      %16 = vector.broadcast %cst_14 : f32 to vector<256x128xf32>
      %17 = arith.mulf %16, %15 : vector<256x128xf32>
      %cst_15 = arith.constant 0.707106769 : f32
      %18 = vector.broadcast %cst_15 : f32 to vector<256x128xf32>
      %19 = arith.mulf %15, %18 : vector<256x128xf32>
      %20 = math.erf %19 : vector<256x128xf32>
      %cst_16 = arith.constant 1.000000e+00 : f32
      %21 = vector.broadcast %cst_16 : f32 to vector<256x128xf32>
      %22 = arith.addf %21, %20 : vector<256x128xf32>
      %23 = arith.mulf %17, %22 : vector<256x128xf32>
      %c0_17 = arith.constant 0 : index
      %c0_18 = arith.constant 0 : index
      %24 = vector.load %arg5[%c0_17, %c0_18] : memref<256x128xf32, #tpu.memory_space<vmem>>, vector<256x128xf32>
      tpu.vector_store %arg5[%c0_17, %c0_18], %23 {strides = array<i32>} : memref<256x128xf32, #tpu.memory_space<vmem>>, vector<256x128xf32>,
    } else {
    }
    return
  }
  func.func @transform_0(%arg0: i32, %arg1: i32) -> (i32, i32) {
    %c0_i32 = arith.constant 0 : i32
    return %arg0, %arg1 : i32, i32
  }
  func.func @transform_1(%arg0: i32, %arg1: i32) -> (i32, i32) {
    %c0_i32 = arith.constant 0 : i32
    %c0_i32_0 = arith.constant 0 : i32
    return %arg1, %c0_i32 : i32, i32
  }
  func.func @transform_2(%arg0: i32, %arg1: i32) -> (i32, i32) {
    %c0_i32 = arith.constant 0 : i32
    %c0_i32_0 = arith.constant 0 : i32
    %c0_i32_1 = arith.constant 0 : i32
    return %c0_i32, %c0_i32_0 : i32, i32
  }
  func.func @transform_3(%arg0: i32, %arg1: i32) -> (i32, i32) {
    %c0_i32 = arith.constant 0 : i32
    %c0_i32_0 = arith.constant 0 : i32
    return %arg0, %c0_i32 : i32, i32
  }
}

</mosaic_0001>

<bundles_post_ra>
// kernel: gcn_forward.2
= control target key start
LH: loop header
LB: loop body
LE: loop exit
PB: predicated region body
PF: predicated region fallthrough
CT: control target
= control target key end

     0   :  { %s486_s9 = smov 0   ;;  %s628_s0 = inlined_call_operand.vmem [shape: f32[512,128], index: 0, kind: input, shape index: {}]   ;;  %s629_s1 = inlined_call_operand.vmem [shape: f32[128,128], index: 1, kind: input, shape index: {}]   ;;  %s630_s2 = inlined_call_operand.vmem [shape: f32[512,128], index: 2, kind: output, shape index: {}]  }
   0x1 LB: > { %s396_s10 = sadd.s32 4294967295, %s469_s9   ;;  %p400_p0 = scmp.ge.s32.totalorder %s469_s9, 1  ;;  %s469_s9 = sphi %s486_s9, %s12_s9  }
   0x2   : > { %p113_p1 = scmp.lt.s32.totalorder %s469_s9, 3 }
   0x4   : > { %p114_p2 = pnand %p400_p0, %p113_p1 }
   0x5   : > { %s401_s27 = sshll.u32 (!%p114_p2), %s396_s10, 5 }
   0x6   : > { %117 = sbr.rel (%p114_p2) target bundleno = 233 (0xe9), region = 28  ;;  %p136_p3 = scmp.lt.s32.totalorder (!%p114_p2), %s401_s27, 63 }
   0xb   : > { %v194_v0 = vld [vmem:[%s629_s1 + $0x78] sm:$0xff]  ;;  %v193_v1 = vld [vmem:[%s629_s1 + $0x70] sm:$0xff]  ;;  %v192_v2 = vld [vmem:[%s629_s1 + $0x68] sm:$0xff]  ;;  %s632_s27 = smov (!%p136_p3, %s401_s27), 63 }
   0xc   : > { %408 = vmatpush.msra.mxu2 %v194_v0  ;;  %409 = vmatpush.msra.mxu3 %v194_v0  ;;  %v191_v3 = vld [vmem:[%s629_s1 + $0x60] sm:$0xff]  ;;  %v190_v4 = vld [vmem:[%s629_s1 + $0x58] sm:$0xff]  ;;  %v189_v5 = vld [vmem:[%s629_s1 + $0x50] sm:$0xff]  ;;  %s402_s11 = sshll.u32 %s632_s27, 3 }
   0xd   : > { %195 = vmatpush.msra.mxu0 %v194_v0  ;;  %407 = vmatpush.msra.mxu1 %v194_v0  ;;  %v188_v6 = vld [vmem:[%s629_s1 + $0x48] sm:$0xff]  ;;  %v187_v7 = vld [vmem:[%s629_s1 + $0x40] sm:$0xff]  ;;  %v186_v8 = vld [vmem:[%s629_s1 + $0x38] sm:$0xff]  ;;  %s549_s18 = scalar_lea.vmem %s628_s0, %s402_s11  ;;  %s591_s23 = scalar_lea.vmem %s630_s2, %s402_s11 }
   0xe   : > { %411 = vmatpush.msra.mxu2 %v193_v1  ;;  %412 = vmatpush.msra.mxu3 %v193_v1  ;;  %v185_v9 = vld [vmem:[%s629_s1 + $0x30] sm:$0xff]  ;;  %v184_v10 = vld [vmem:[%s629_s1 + $0x28] sm:$0xff]  ;;  %v183_v11 = vld [vmem:[%s629_s1 + $0x20] sm:$0xff] }
   0xf   : > { %196 = vmatpush.msra.mxu0 %v193_v1  ;;  %410 = vmatpush.msra.mxu1 %v193_v1  ;;  %v182_v12 = vld [vmem:[%s629_s1 + $0x18] sm:$0xff]  ;;  %v181_v13 = vld [vmem:[%s629_s1 + $0x10] sm:$0xff]  ;;  %v180_v14 = vld [vmem:[%s629_s1 + $0x8] sm:$0xff] }
  0x10   : > { %414 = vmatpush.msra.mxu2 %v192_v2  ;;  %415 = vmatpush.msra.mxu3 %v192_v2  ;;  %v179_v15 = vld [vmem:[%s629_s1] sm:$0xff]  ;;  %v164_v20 = vld [vmem:[%s549_s18 + $0x88] sm:$0xff]  ;;  %v165_v24 = vld [vmem:[%s549_s18 + $0x90] sm:$0xff] }
  0x11   : > { %197 = vmatpush.msra.mxu0 %v192_v2  ;;  %413 = vmatpush.msra.mxu1 %v192_v2  ;;  %v163_v16 = vld [vmem:[%s549_s18 + $0x80] sm:$0xff]  ;;  %v172_v21 = vld [vmem:[%s549_s18 + $0xc8] sm:$0xff]  ;;  %v173_v25 = vld [vmem:[%s549_s18 + $0xd0] sm:$0xff] }
  0x12   : > { %417 = vmatpush.msra.mxu2 %v191_v3  ;;  %418 = vmatpush.msra.mxu3 %v191_v3  ;;  %v171_v17 = vld [vmem:[%s549_s18 + $0xc0] sm:$0xff]  ;;  %v148_v22 = vld [vmem:[%s549_s18 + $0x8] sm:$0xff]  ;;  %v149_v26 = vld [vmem:[%s549_s18 + $0x10] sm:$0xff] }
  0x13   : > { %198 = vmatpush.msra.mxu0 %v191_v3  ;;  %416 = vmatpush.msra.mxu1 %v191_v3  ;;  %v147_v18 = vld [vmem:[%s549_s18] sm:$0xff]  ;;  %v156_v23 = vld [vmem:[%s549_s18 + $0x48] sm:$0xff]  ;;  %v157_v27 = vld [vmem:[%s549_s18 + $0x50] sm:$0xff] }
  0x14   : > { %420 = vmatpush.msra.mxu2 %v190_v4  ;;  %421 = vmatpush.msra.mxu3 %v190_v4  ;;  %v155_v19 = vld [vmem:[%s549_s18 + $0x40] sm:$0xff]  ;;  %v166_v28 = vld [vmem:[%s549_s18 + $0x98] sm:$0xff]  ;;  %v168_v36 = vld [vmem:[%s549_s18 + $0xa8] sm:$0xff] }
  0x15   : > { %199 = vmatpush.msra.mxu0 %v190_v4  ;;  %419 = vmatpush.msra.mxu1 %v190_v4  ;;  %v174_v29 = vld [vmem:[%s549_s18 + $0xd8] sm:$0xff]  ;;  %v167_v32 = vld [vmem:[%s549_s18 + $0xa0] sm:$0xff]  ;;  %v176_v37 = vld [vmem:[%s549_s18 + $0xe8] sm:$0xff] }
  0x16   : > { %423 = vmatpush.msra.mxu2 %v189_v5  ;;  %424 = vmatpush.msra.mxu3 %v189_v5  ;;  %v150_v30 = vld [vmem:[%s549_s18 + $0x18] sm:$0xff]  ;;  %v175_v33 = vld [vmem:[%s549_s18 + $0xe0] sm:$0xff]  ;;  %v152_v38 = vld [vmem:[%s549_s18 + $0x28] sm:$0xff] }
  0x17   : > { %200 = vmatpush.msra.mxu0 %v189_v5  ;;  %422 = vmatpush.msra.mxu1 %v189_v5  ;;  %v158_v31 = vld [vmem:[%s549_s18 + $0x58] sm:$0xff]  ;;  %v151_v34 = vld [vmem:[%s549_s18 + $0x20] sm:$0xff]  ;;  %v160_v39 = vld [vmem:[%s549_s18 + $0x68] sm:$0xff] }
  0x18   : > { %426 = vmatpush.msra.mxu2 %v188_v6  ;;  %427 = vmatpush.msra.mxu3 %v188_v6  ;;  %v159_v35 = vld [vmem:[%s549_s18 + $0x60] sm:$0xff]  ;;  %v169_v40 = vld [vmem:[%s549_s18 + $0xb0] sm:$0xff]  ;;  %v170_v44 = vld [vmem:[%s549_s18 + $0xb8] sm:$0xff] }
  0x19   : > { %201 = vmatpush.msra.mxu0 %v188_v6  ;;  %425 = vmatpush.msra.mxu1 %v188_v6  ;;  %v177_v41 = vld [vmem:[%s549_s18 + $0xf0] sm:$0xff]  ;;  %v178_v45 = vld [vmem:[%s549_s18 + $0xf8] sm:$0xff] }
  0x1a   : > { %429 = vmatpush.msra.mxu2 %v187_v7  ;;  %430 = vmatpush.msra.mxu3 %v187_v7  ;;  %v153_v42 = vld [vmem:[%s549_s18 + $0x30] sm:$0xff]  ;;  %v154_v46 = vld [vmem:[%s549_s18 + $0x38] sm:$0xff] }
  0x1b   : > { %202 = vmatpush.msra.mxu0 %v187_v7  ;;  %428 = vmatpush.msra.mxu1 %v187_v7  ;;  %v161_v43 = vld [vmem:[%s549_s18 + $0x70] sm:$0xff]  ;;  %v162_v47 = vld [vmem:[%s549_s18 + $0x78] sm:$0xff] }
  0x1c   : > { %432 = vmatpush.msra.mxu2 %v186_v8  ;;  %433 = vmatpush.msra.mxu3 %v186_v8 }
  0x1d   : > { %203 = vmatpush.msra.mxu0 %v186_v8  ;;  %431 = vmatpush.msra.mxu1 %v186_v8 }
  0x1e   : > { %435 = vmatpush.msra.mxu2 %v185_v9  ;;  %436 = vmatpush.msra.mxu3 %v185_v9 }
  0x1f   : > { %204 = vmatpush.msra.mxu0 %v185_v9  ;;  %434 = vmatpush.msra.mxu1 %v185_v9 }
  0x20   : > { %438 = vmatpush.msra.mxu2 %v184_v10  ;;  %439 = vmatpush.msra.mxu3 %v184_v10 }
  0x21   : > { %205 = vmatpush.msra.mxu0 %v184_v10  ;;  %437 = vmatpush.msra.mxu1 %v184_v10 }
  0x22   : > { %441 = vmatpush.msra.mxu2 %v183_v11  ;;  %442 = vmatpush.msra.mxu3 %v183_v11 }
  0x23   : > { %206 = vmatpush.msra.mxu0 %v183_v11  ;;  %440 = vmatpush.msra.mxu1 %v183_v11 }
  0x24   : > { %444 = vmatpush.msra.mxu2 %v182_v12  ;;  %445 = vmatpush.msra.mxu3 %v182_v12 }
  0x25   : > { %207 = vmatpush.msra.mxu0 %v182_v12  ;;  %443 = vmatpush.msra.mxu1 %v182_v12 }
  0x26   : > { %447 = vmatpush.msra.mxu2 %v181_v13  ;;  %448 = vmatpush.msra.mxu3 %v181_v13 }
  0x27   : > { %208 = vmatpush.msra.mxu0 %v181_v13  ;;  %446 = vmatpush.msra.mxu1 %v181_v13 }
  0x28   : > { %450 = vmatpush.msra.mxu2 %v180_v14  ;;  %451 = vmatpush.msra.mxu3 %v180_v14 }
  0x29   : > { %209 = vmatpush.msra.mxu0 %v180_v14  ;;  %449 = vmatpush.msra.mxu1 %v180_v14 }
  0x2a   : > { %453 = vmatpush.msra.mxu2 %v179_v15  ;;  %454 = vmatpush.msra.mxu3 %v179_v15 }
  0x2b   : > { %259 = vmatmul.f32.vlgmr.msra.gmra.mxu2 %v163_v16  ;;  %283 = vmatmul.f32.vlgmr.msra.gmra.mxu3 %v171_v17 }
  0x2c   : > { %210 = vmatpush.msra.mxu0 %v179_v15  ;;  %452 = vmatpush.msra.mxu1 %v179_v15 }
  0x2d   : > { %211 = vmatmul.f32.vlgmr.msra.gmra.mxu0 %v147_v18  ;;  %235 = vmatmul.f32.vlgmr.msra.gmra.mxu1 %v155_v19 }
  0x33   : > { %262 = vmatmul.f32.gmra.mxu2 %v164_v20  ;;  %286 = vmatmul.f32.gmra.mxu3 %v172_v21 }
  0x35   : > { %214 = vmatmul.f32.gmra.mxu0 %v148_v22  ;;  %238 = vmatmul.f32.gmra.mxu1 %v156_v23 }
  0x3b   : > { %265 = vmatmul.f32.gmra.mxu2 %v165_v24  ;;  %289 = vmatmul.f32.gmra.mxu3 %v173_v25 }
  0x3d   : > { %217 = vmatmul.f32.gmra.mxu0 %v149_v26  ;;  %241 = vmatmul.f32.gmra.mxu1 %v157_v27 }
  0x43   : > { %268 = vmatmul.f32.gmra.mxu2 %v166_v28  ;;  %292 = vmatmul.f32.gmra.mxu3 %v174_v29 }
  0x45   : > { %220 = vmatmul.f32.gmra.mxu0 %v150_v30  ;;  %244 = vmatmul.f32.gmra.mxu1 %v158_v31 }
  0x4b   : > { %271 = vmatmul.f32.gmra.mxu2 %v167_v32  ;;  %295 = vmatmul.f32.gmra.mxu3 %v175_v33 }
  0x4d   : > { %223 = vmatmul.f32.gmra.mxu0 %v151_v34  ;;  %247 = vmatmul.f32.gmra.mxu1 %v159_v35 }
  0x53   : > { %274 = vmatmul.f32.gmra.mxu2 %v168_v36  ;;  %298 = vmatmul.f32.gmra.mxu3 %v176_v37 }
  0x55   : > { %226 = vmatmul.f32.gmra.mxu0 %v152_v38  ;;  %250 = vmatmul.f32.gmra.mxu1 %v160_v39 }
  0x5b   : > { %277 = vmatmul.f32.gmra.mxu2 %v169_v40  ;;  %301 = vmatmul.f32.gmra.mxu3 %v177_v41 }
  0x5d   : > { %229 = vmatmul.f32.gmra.mxu0 %v153_v42  ;;  %253 = vmatmul.f32.gmra.mxu1 %v161_v43 }
  0x63   : > { %280 = vmatmul.f32.gmra.mxu2 %v170_v44  ;;  %304 = vmatmul.f32.gmra.mxu3 %v178_v45 }
  0x65   : > { %232 = vmatmul.f32.gmra.mxu0 %v154_v46  ;;  %256 = vmatmul.f32.gmra.mxu1 %v162_v47 }
  0xaa   : > { %v212_v48 = vpop.f32.mrf.mxu0  ;;  %v236_v49 = vpop.f32.mrf.mxu1 }
  0xab   : > { %308 = vst [vmem:[%s591_s23] sm:$0xff] %v212_v48 }
  0xac   : > { %316 = vst [vmem:[%s591_s23 + $0x40] sm:$0xff] %v236_v49 }
  0xae   : > { %v260_v50 = vpop.f32.mrf.mxu2  ;;  %v284_v51 = vpop.f32.mrf.mxu3 }
  0xaf   : > { %324 = vst [vmem:[%s591_s23 + $0x80] sm:$0xff] %v260_v50 }
  0xb0   : > { %332 = vst [vmem:[%s591_s23 + $0xc0] sm:$0xff] %v284_v51 }
  0xb2   : > { %v215_v52 = vpop.f32.mrf.mxu0  ;;  %v239_v53 = vpop.f32.mrf.mxu1 }
  0xb3   : > { %309 = vst [vmem:[%s591_s23 + $0x8] sm:$0xff] %v215_v52 }
  0xb4   : > { %317 = vst [vmem:[%s591_s23 + $0x48] sm:$0xff] %v239_v53 }
  0xb6   : > { %v263_v54 = vpop.f32.mrf.mxu2  ;;  %v287_v55 = vpop.f32.mrf.mxu3 }
  0xb7   : > { %325 = vst [vmem:[%s591_s23 + $0x88] sm:$0xff] %v263_v54 }
  0xb8   : > { %333 = vst [vmem:[%s591_s23 + $0xc8] sm:$0xff] %v287_v55 }
  0xba   : > { %v218_v56 = vpop.f32.mrf.mxu0  ;;  %v242_v57 = vpop.f32.mrf.mxu1 }
  0xbb   : > { %310 = vst [vmem:[%s591_s23 + $0x10] sm:$0xff] %v218_v56 }
  0xbc   : > { %318 = vst [vmem:[%s591_s23 + $0x50] sm:$0xff] %v242_v57 }
  0xbe   : > { %v266_v58 = vpop.f32.mrf.mxu2  ;;  %v290_v59 = vpop.f32.mrf.mxu3 }
  0xbf   : > { %326 = vst [vmem:[%s591_s23 + $0x90] sm:$0xff] %v266_v58 }
  0xc0   : > { %334 = vst [vmem:[%s591_s23 + $0xd0] sm:$0xff] %v290_v59 }
  0xc2   : > { %v221_v60 = vpop.f32.mrf.mxu0  ;;  %v245_v61 = vpop.f32.mrf.mxu1 }
  0xc3   : > { %311 = vst [vmem:[%s591_s23 + $0x18] sm:$0xff] %v221_v60 }
  0xc4   : > { %319 = vst [vmem:[%s591_s23 + $0x58] sm:$0xff] %v245_v61 }
  0xc6   : > { %v269_v62 = vpop.f32.mrf.mxu2  ;;  %v293_v63 = vpop.f32.mrf.mxu3 }
  0xc7   : > { %327 = vst [vmem:[%s591_s23 + $0x98] sm:$0xff] %v269_v62 }
  0xc8   : > { %335 = vst [vmem:[%s591_s23 + $0xd8] sm:$0xff] %v293_v63 }
  0xca   : > { %v224_v0 = vpop.f32.mrf.mxu0  ;;  %v248_v1 = vpop.f32.mrf.mxu1 }
  0xcb   : > { %312 = vst [vmem:[%s591_s23 + $0x20] sm:$0xff] %v224_v0 }
  0xcc   : > { %320 = vst [vmem:[%s591_s23 + $0x60] sm:$0xff] %v248_v1 }
  0xce   : > { %v272_v2 = vpop.f32.mrf.mxu2  ;;  %v296_v3 = vpop.f32.mrf.mxu3 }
  0xcf   : > { %328 = vst [vmem:[%s591_s23 + $0xa0] sm:$0xff] %v272_v2 }
  0xd0   : > { %336 = vst [vmem:[%s591_s23 + $0xe0] sm:$0xff] %v296_v3 }
  0xd2   : > { %v227_v4 = vpop.f32.mrf.mxu0  ;;  %v251_v5 = vpop.f32.mrf.mxu1 }
  0xd3   : > { %313 = vst [vmem:[%s591_s23 + $0x28] sm:$0xff] %v227_v4 }
  0xd4   : > { %321 = vst [vmem:[%s591_s23 + $0x68] sm:$0xff] %v251_v5 }
  0xd6   : > { %v275_v6 = vpop.f32.mrf.mxu2  ;;  %v299_v7 = vpop.f32.mrf.mxu3 }
  0xd7   : > { %329 = vst [vmem:[%s591_s23 + $0xa8] sm:$0xff] %v275_v6 }
  0xd8   : > { %337 = vst [vmem:[%s591_s23 + $0xe8] sm:$0xff] %v299_v7 }
  0xda   : > { %v230_v8 = vpop.f32.mrf.mxu0  ;;  %v254_v9 = vpop.f32.mrf.mxu1 }
  0xdb   : > { %314 = vst [vmem:[%s591_s23 + $0x30] sm:$0xff] %v230_v8 }
  0xdc   : > { %322 = vst [vmem:[%s591_s23 + $0x70] sm:$0xff] %v254_v9 }
  0xde   : > { %v278_v10 = vpop.f32.mrf.mxu2  ;;  %v302_v11 = vpop.f32.mrf.mxu3 }
  0xdf   : > { %330 = vst [vmem:[%s591_s23 + $0xb0] sm:$0xff] %v278_v10 }
  0xe0   : > { %338 = vst [vmem:[%s591_s23 + $0xf0] sm:$0xff] %v302_v11 }
  0xe2   : > { %v233_v12 = vpop.f32.mrf.mxu0  ;;  %v257_v13 = vpop.f32.mrf.mxu1 }
  0xe3   : > { %315 = vst [vmem:[%s591_s23 + $0x38] sm:$0xff] %v233_v12 }
  0xe4   : > { %323 = vst [vmem:[%s591_s23 + $0x78] sm:$0xff] %v257_v13 }
  0xe6   : > { %v281_v14 = vpop.f32.mrf.mxu2  ;;  %v305_v15 = vpop.f32.mrf.mxu3 }
  0xe7   : > { %331 = vst [vmem:[%s591_s23 + $0xb8] sm:$0xff] %v281_v14 }
  0xe8   : > { %339 = vst [vmem:[%s591_s23 + $0xf8] sm:$0xff] %v305_v15 }
  0xe9 PF: > { %s12_s9 = sadd.s32 1, %s469_s9  }
  0xea   : > { %p9_p4 = scmp.ge.s32.totalorder %s12_s9, 4  }
  0xec   :  { %11 = sbr.rel (!%p9_p4) target bundleno = 1 (0x1), region = 58 }

// kernel: gcn_forward.3
= control target key start
LH: loop header
LB: loop body
LE: loop exit
PB: predicated region body
PF: predicated region fallthrough
CT: control target
= control target key end

     0   :  { %s2782_s12 = smov 0   ;;  %s2784_s13 = smov 0   ;;  %s4360_s0 = inlined_call_operand.vmem [shape: f32[512,512], index: 0, kind: input, shape index: {}]   ;;  %s4361_s1 = inlined_call_operand.vmem [shape: f32[512,128], index: 1, kind: input, shape index: {}]   ;;  %s4362_s2 = inlined_call_operand.vmem [shape: f32[1,128], index: 2, kind: input, shape index: {}]   ;;  %s4363_s3 = inlined_call_operand.vmem [shape: f32[512,128], index: 3, kind: output, shape index: {}]  }
   0x1   :  { %s2786_s14 = smov 0  }
   0x2 LB: > { %s25_s15 = sadd.s32 1, %s2756_s13  ;;  %p2605_p0 = scmp.ge.s32.totalorder %s2760_s14, 1  ;;  %s2760_s14 = sphi %s2786_s14, %s13_s14   ;;  %s2756_s13 = sphi %s2784_s13, %s4404_s13   ;;  %s2752_s12 = sphi %s2782_s12, %s4403_s12  }
   0x3   : > { %p27_p1 = scmp.ge.s32.totalorder %s25_s15, 2  ;;  %p169_p2 = scmp.lt.s32.totalorder %s2760_s14, 3 }
   0x5   : > { %s4406_s15 = smov (%p27_p1, %s25_s15), 0  ;;  %p170_p3 = pnand %p2605_p0, %p169_p2 }
   0x6   : > { %s2606_s30 = sshll.u32 (!%p170_p3), %s2752_s12, 5 }
   0x7   : > { %173 = sbr.rel (%p170_p3) target bundleno = 581 (0x245), region = 32  ;;  %p2913_p4 = scmp.lt.s32.totalorder (!%p170_p3), %s2606_s30, 63 }
   0xc   : > { %v470_v0 = vld [vmem:[%s4361_s1 + $0x178] sm:$0xff]  ;;  %v469_v1 = vld [vmem:[%s4361_s1 + $0x170] sm:$0xff]  ;;  %v468_v5 = vld [vmem:[%s4361_s1 + $0x168] sm:$0xff]  ;;  %s4408_s30 = smov (!%p2913_p4, %s2606_s30), 63 }
   0xd   : > { %v486_v2 = vld [vmem:[%s4361_s1 + $0x1f8] sm:$0xff]  ;;  %713 = vmatpush.msra.mxu2 %v470_v0  ;;  %v485_v6 = vld [vmem:[%s4361_s1 + $0x1f0] sm:$0xff]  ;;  %v484_v9 = vld [vmem:[%s4361_s1 + $0x1e8] sm:$0xff]  ;;  %s2645_s4 = sshll.u32 %s4408_s30, 5  ;;  %s2610_s11 = sshll.u32 %s4408_s30, 3 }
   0xe   : > { %826 = vmatpush.msra.mxu3 %v486_v2  ;;  %v438_v3 = vld [vmem:[%s4361_s1 + $0x78] sm:$0xff]  ;;  %v437_v7 = vld [vmem:[%s4361_s1 + $0x70] sm:$0xff]  ;;  %v436_v10 = vld [vmem:[%s4361_s1 + $0x68] sm:$0xff]  ;;  %s2993_s22 = scalar_lea.vmem %s4360_s0, %s2645_s4  ;;  %s3255_s17 = scalar_lea.vmem %s4363_s3, %s2610_s11 }
   0xf   : > { %v454_v4 = vld [vmem:[%s4361_s1 + $0xf8] sm:$0xff]  ;;  %487 = vmatpush.msra.mxu0 %v438_v3  ;;  %v453_v8 = vld [vmem:[%s4361_s1 + $0xf0] sm:$0xff]  ;;  %714 = vmatpush.msra.mxu2 %v469_v1  ;;  %v467_v11 = vld [vmem:[%s4361_s1 + $0x160] sm:$0xff] }
  0x10   : > { %600 = vmatpush.msra.mxu1 %v454_v4  ;;  %827 = vmatpush.msra.mxu3 %v485_v6  ;;  %v452_v12 = vld [vmem:[%s4361_s1 + $0xe8] sm:$0xff]  ;;  %v483_v13 = vld [vmem:[%s4361_s1 + $0x1e0] sm:$0xff]  ;;  %v466_v16 = vld [vmem:[%s4361_s1 + $0x158] sm:$0xff] }
  0x11   : > { %488 = vmatpush.msra.mxu0 %v437_v7  ;;  %715 = vmatpush.msra.mxu2 %v468_v5  ;;  %v435_v14 = vld [vmem:[%s4361_s1 + $0x60] sm:$0xff]  ;;  %v482_v17 = vld [vmem:[%s4361_s1 + $0x1d8] sm:$0xff]  ;;  %v465_v20 = vld [vmem:[%s4361_s1 + $0x150] sm:$0xff] }
  0x12   : > { %601 = vmatpush.msra.mxu1 %v453_v8  ;;  %828 = vmatpush.msra.mxu3 %v484_v9  ;;  %v451_v15 = vld [vmem:[%s4361_s1 + $0xe0] sm:$0xff]  ;;  %v434_v18 = vld [vmem:[%s4361_s1 + $0x58] sm:$0xff]  ;;  %v481_v21 = vld [vmem:[%s4361_s1 + $0x1d0] sm:$0xff] }
  0x13   : > { %489 = vmatpush.msra.mxu0 %v436_v10  ;;  %716 = vmatpush.msra.mxu2 %v467_v11  ;;  %v450_v19 = vld [vmem:[%s4361_s1 + $0xd8] sm:$0xff]  ;;  %v433_v22 = vld [vmem:[%s4361_s1 + $0x50] sm:$0xff]  ;;  %v464_v24 = vld [vmem:[%s4361_s1 + $0x148] sm:$0xff] }
  0x14   : > { %602 = vmatpush.msra.mxu1 %v452_v12  ;;  %829 = vmatpush.msra.mxu3 %v483_v13  ;;  %v449_v23 = vld [vmem:[%s4361_s1 + $0xd0] sm:$0xff]  ;;  %v480_v25 = vld [vmem:[%s4361_s1 + $0x1c8] sm:$0xff]  ;;  %v463_v28 = vld [vmem:[%s4361_s1 + $0x140] sm:$0xff] }
  0x15   : > { %490 = vmatpush.msra.mxu0 %v435_v14  ;;  %717 = vmatpush.msra.mxu2 %v466_v16  ;;  %v432_v26 = vld [vmem:[%s4361_s1 + $0x48] sm:$0xff]  ;;  %v479_v29 = vld [vmem:[%s4361_s1 + $0x1c0] sm:$0xff]  ;;  %v462_v32 = vld [vmem:[%s4361_s1 + $0x138] sm:$0xff] }
  0x16   : > { %603 = vmatpush.msra.mxu1 %v451_v15  ;;  %830 = vmatpush.msra.mxu3 %v482_v17  ;;  %v448_v27 = vld [vmem:[%s4361_s1 + $0xc8] sm:$0xff]  ;;  %v431_v30 = vld [vmem:[%s4361_s1 + $0x40] sm:$0xff]  ;;  %v478_v33 = vld [vmem:[%s4361_s1 + $0x1b8] sm:$0xff] }
  0x17   : > { %491 = vmatpush.msra.mxu0 %v434_v18  ;;  %718 = vmatpush.msra.mxu2 %v465_v20  ;;  %v447_v31 = vld [vmem:[%s4361_s1 + $0xc0] sm:$0xff]  ;;  %v430_v34 = vld [vmem:[%s4361_s1 + $0x38] sm:$0xff]  ;;  %v461_v36 = vld [vmem:[%s4361_s1 + $0x130] sm:$0xff] }
  0x18   : > { %604 = vmatpush.msra.mxu1 %v450_v19  ;;  %831 = vmatpush.msra.mxu3 %v481_v21  ;;  %v446_v35 = vld [vmem:[%s4361_s1 + $0xb8] sm:$0xff]  ;;  %v477_v37 = vld [vmem:[%s4361_s1 + $0x1b0] sm:$0xff]  ;;  %v460_v40 = vld [vmem:[%s4361_s1 + $0x128] sm:$0xff] }
  0x19   : > { %492 = vmatpush.msra.mxu0 %v433_v22  ;;  %719 = vmatpush.msra.mxu2 %v464_v24  ;;  %v429_v38 = vld [vmem:[%s4361_s1 + $0x30] sm:$0xff]  ;;  %v476_v41 = vld [vmem:[%s4361_s1 + $0x1a8] sm:$0xff]  ;;  %v459_v44 = vld [vmem:[%s4361_s1 + $0x120] sm:$0xff] }
  0x1a   : > { %605 = vmatpush.msra.mxu1 %v449_v23  ;;  %832 = vmatpush.msra.mxu3 %v480_v25  ;;  %v445_v39 = vld [vmem:[%s4361_s1 + $0xb0] sm:$0xff]  ;;  %v428_v42 = vld [vmem:[%s4361_s1 + $0x28] sm:$0xff]  ;;  %v475_v45 = vld [vmem:[%s4361_s1 + $0x1a0] sm:$0xff] }
  0x1b   : > { %493 = vmatpush.msra.mxu0 %v432_v26  ;;  %720 = vmatpush.msra.mxu2 %v463_v28  ;;  %v444_v43 = vld [vmem:[%s4361_s1 + $0xa8] sm:$0xff]  ;;  %v427_v46 = vld [vmem:[%s4361_s1 + $0x20] sm:$0xff]  ;;  %v458_v48 = vld [vmem:[%s4361_s1 + $0x118] sm:$0xff] }
  0x1c   : > { %606 = vmatpush.msra.mxu1 %v448_v27  ;;  %833 = vmatpush.msra.mxu3 %v479_v29  ;;  %v443_v47 = vld [vmem:[%s4361_s1 + $0xa0] sm:$0xff]  ;;  %v474_v49 = vld [vmem:[%s4361_s1 + $0x198] sm:$0xff]  ;;  %v457_v52 = vld [vmem:[%s4361_s1 + $0x110] sm:$0xff] }
  0x1d   : > { %494 = vmatpush.msra.mxu0 %v431_v30  ;;  %721 = vmatpush.msra.mxu2 %v462_v32  ;;  %v426_v50 = vld [vmem:[%s4361_s1 + $0x18] sm:$0xff]  ;;  %v473_v53 = vld [vmem:[%s4361_s1 + $0x190] sm:$0xff]  ;;  %v456_v56 = vld [vmem:[%s4361_s1 + $0x108] sm:$0xff] }
  0x1e   : > { %607 = vmatpush.msra.mxu1 %v447_v31  ;;  %834 = vmatpush.msra.mxu3 %v478_v33  ;;  %v442_v51 = vld [vmem:[%s4361_s1 + $0x98] sm:$0xff]  ;;  %v425_v54 = vld [vmem:[%s4361_s1 + $0x10] sm:$0xff]  ;;  %v472_v57 = vld [vmem:[%s4361_s1 + $0x188] sm:$0xff] }
  0x1f   : > { %495 = vmatpush.msra.mxu0 %v430_v34  ;;  %722 = vmatpush.msra.mxu2 %v461_v36  ;;  %v441_v55 = vld [vmem:[%s4361_s1 + $0x90] sm:$0xff]  ;;  %v424_v58 = vld [vmem:[%s4361_s1 + $0x8] sm:$0xff]  ;;  %v455_v60 = vld [vmem:[%s4361_s1 + $0x100] sm:$0xff] }
  0x20   : > { %608 = vmatpush.msra.mxu1 %v446_v35  ;;  %835 = vmatpush.msra.mxu3 %v477_v37  ;;  %v440_v59 = vld [vmem:[%s4361_s1 + $0x88] sm:$0xff]  ;;  %v471_v61 = vld [vmem:[%s4361_s1 + $0x180] sm:$0xff]  ;;  %v297_v62 = vld [vmem:[%s2993_s22 + $0x10] sm:$0xff] }
  0x21   : > { %496 = vmatpush.msra.mxu0 %v429_v38  ;;  %723 = vmatpush.msra.mxu2 %v460_v40  ;;  %v298_v63 = vld [vmem:[%s2993_s22 + $0x18] sm:$0xff]  ;;  %v423_v0 = vld [vmem:[%s4361_s1] sm:$0xff]  ;;  %v296_v3 = vld [vmem:[%s2993_s22 + $0x8] sm:$0xff] }
  0x22   : > { %609 = vmatpush.msra.mxu1 %v445_v39  ;;  %836 = vmatpush.msra.mxu3 %v476_v41  ;;  %v439_v1 = vld [vmem:[%s4361_s1 + $0x80] sm:$0xff]  ;;  %v301_v4 = vld [vmem:[%s2993_s22 + $0x30] sm:$0xff]  ;;  %v302_v5 = vld [vmem:[%s2993_s22 + $0x38] sm:$0xff] }
  0x23   : > { %497 = vmatpush.msra.mxu0 %v428_v42  ;;  %724 = vmatpush.msra.mxu2 %v459_v44  ;;  %v295_v2 = vld [vmem:[%s2993_s22] sm:$0xff]  ;;  %v300_v7 = vld [vmem:[%s2993_s22 + $0x28] sm:$0xff]  ;;  %v305_v8 = vld [vmem:[%s2993_s22 + $0x50] sm:$0xff] }
  0x24   : > { %610 = vmatpush.msra.mxu1 %v444_v43  ;;  %837 = vmatpush.msra.mxu3 %v475_v45  ;;  %v299_v6 = vld [vmem:[%s2993_s22 + $0x20] sm:$0xff]  ;;  %v306_v9 = vld [vmem:[%s2993_s22 + $0x58] sm:$0xff]  ;;  %v304_v11 = vld [vmem:[%s2993_s22 + $0x48] sm:$0xff] }
  0x25   : > { %498 = vmatpush.msra.mxu0 %v427_v46  ;;  %725 = vmatpush.msra.mxu2 %v458_v48  ;;  %v303_v10 = vld [vmem:[%s2993_s22 + $0x40] sm:$0xff]  ;;  %v309_v12 = vld [vmem:[%s2993_s22 + $0x70] sm:$0xff]  ;;  %v310_v13 = vld [vmem:[%s2993_s22 + $0x78] sm:$0xff] }
  0x26   : > { %611 = vmatpush.msra.mxu1 %v443_v47  ;;  %838 = vmatpush.msra.mxu3 %v474_v49  ;;  %v307_v14 = vld [vmem:[%s2993_s22 + $0x60] sm:$0xff]  ;;  %v308_v15 = vld [vmem:[%s2993_s22 + $0x68] sm:$0xff]  ;;  %v313_v16 = vld [vmem:[%s2993_s22 + $0x90] sm:$0xff] }
  0x27   : > { %499 = vmatpush.msra.mxu0 %v426_v50  ;;  %726 = vmatpush.msra.mxu2 %v457_v52  ;;  %v314_v17 = vld [vmem:[%s2993_s22 + $0x98] sm:$0xff]  ;;  %v311_v18 = vld [vmem:[%s2993_s22 + $0x80] sm:$0xff]  ;;  %v312_v19 = vld [vmem:[%s2993_s22 + $0x88] sm:$0xff] }
  0x28   : > { %612 = vmatpush.msra.mxu1 %v442_v51  ;;  %839 = vmatpush.msra.mxu3 %v473_v53  ;;  %v317_v20 = vld [vmem:[%s2993_s22 + $0xb0] sm:$0xff]  ;;  %v318_v21 = vld [vmem:[%s2993_s22 + $0xb8] sm:$0xff]  ;;  %v315_v22 = vld [vmem:[%s2993_s22 + $0xa0] sm:$0xff] }
  0x29   : > { %500 = vmatpush.msra.mxu0 %v425_v54  ;;  %727 = vmatpush.msra.mxu2 %v456_v56  ;;  %v316_v23 = vld [vmem:[%s2993_s22 + $0xa8] sm:$0xff]  ;;  %v321_v24 = vld [vmem:[%s2993_s22 + $0xd0] sm:$0xff]  ;;  %v322_v25 = vld [vmem:[%s2993_s22 + $0xd8] sm:$0xff] }
  0x2a   : > { %613 = vmatpush.msra.mxu1 %v441_v55  ;;  %840 = vmatpush.msra.mxu3 %v472_v57  ;;  %v319_v26 = vld [vmem:[%s2993_s22 + $0xc0] sm:$0xff]  ;;  %v320_v27 = vld [vmem:[%s2993_s22 + $0xc8] sm:$0xff]  ;;  %v325_v28 = vld [vmem:[%s2993_s22 + $0xf0] sm:$0xff] }
  0x2b   : > { %501 = vmatpush.msra.mxu0 %v424_v58  ;;  %728 = vmatpush.msra.mxu2 %v455_v60  ;;  %v326_v29 = vld [vmem:[%s2993_s22 + $0xf8] sm:$0xff]  ;;  %v323_v30 = vld [vmem:[%s2993_s22 + $0xe0] sm:$0xff]  ;;  %v324_v31 = vld [vmem:[%s2993_s22 + $0xe8] sm:$0xff] }
  0x2c   : > { %614 = vmatpush.msra.mxu1 %v440_v59  ;;  %841 = vmatpush.msra.mxu3 %v471_v61  ;;  %v329_v32 = vld [vmem:[%s2993_s22 + $0x110] sm:$0xff]  ;;  %v330_v33 = vld [vmem:[%s2993_s22 + $0x118] sm:$0xff]  ;;  %v327_v34 = vld [vmem:[%s2993_s22 + $0x100] sm:$0xff] }
  0x2d   : > { %729 = vmatmul.f32.vlgmr.msra.gmra.mxu2 %v297_v62  ;;  %842 = vmatmul.f32.vlgmr.msra.gmra.mxu3 %v298_v63  ;;  %v328_v35 = vld [vmem:[%s2993_s22 + $0x108] sm:$0xff]  ;;  %v333_v36 = vld [vmem:[%s2993_s22 + $0x130] sm:$0xff]  ;;  %v334_v37 = vld [vmem:[%s2993_s22 + $0x138] sm:$0xff] }
  0x2e   : > { %502 = vmatpush.msra.mxu0 %v423_v0  ;;  %615 = vmatpush.msra.mxu1 %v439_v1  ;;  %v331_v38 = vld [vmem:[%s2993_s22 + $0x120] sm:$0xff]  ;;  %v332_v39 = vld [vmem:[%s2993_s22 + $0x128] sm:$0xff]  ;;  %v337_v40 = vld [vmem:[%s2993_s22 + $0x150] sm:$0xff] }
  0x2f   : > { %503 = vmatmul.f32.vlgmr.msra.gmra.mxu0 %v295_v2  ;;  %616 = vmatmul.f32.vlgmr.msra.gmra.mxu1 %v296_v3  ;;  %v338_v41 = vld [vmem:[%s2993_s22 + $0x158] sm:$0xff]  ;;  %v335_v42 = vld [vmem:[%s2993_s22 + $0x140] sm:$0xff]  ;;  %v336_v43 = vld [vmem:[%s2993_s22 + $0x148] sm:$0xff] }
  0x30   : > { %v341_v44 = vld [vmem:[%s2993_s22 + $0x170] sm:$0xff]  ;;  %v342_v45 = vld [vmem:[%s2993_s22 + $0x178] sm:$0xff]  ;;  %v339_v46 = vld [vmem:[%s2993_s22 + $0x160] sm:$0xff] }
  0x31   : > { %v340_v47 = vld [vmem:[%s2993_s22 + $0x168] sm:$0xff]  ;;  %v345_v48 = vld [vmem:[%s2993_s22 + $0x190] sm:$0xff]  ;;  %v346_v49 = vld [vmem:[%s2993_s22 + $0x198] sm:$0xff] }
  0x32   : > { %v343_v50 = vld [vmem:[%s2993_s22 + $0x180] sm:$0xff]  ;;  %v344_v51 = vld [vmem:[%s2993_s22 + $0x188] sm:$0xff]  ;;  %v349_v52 = vld [vmem:[%s2993_s22 + $0x1b0] sm:$0xff] }
  0x33   : > { %v350_v53 = vld [vmem:[%s2993_s22 + $0x1b8] sm:$0xff]  ;;  %v347_v54 = vld [vmem:[%s2993_s22 + $0x1a0] sm:$0xff]  ;;  %v348_v55 = vld [vmem:[%s2993_s22 + $0x1a8] sm:$0xff] }
  0x34   : > { %v353_v56 = vld [vmem:[%s2993_s22 + $0x1d0] sm:$0xff]  ;;  %v354_v57 = vld [vmem:[%s2993_s22 + $0x1d8] sm:$0xff]  ;;  %v351_v58 = vld [vmem:[%s2993_s22 + $0x1c0] sm:$0xff] }
  0x35   : > { %732 = vmatmul.f32.gmra.mxu2 %v301_v4  ;;  %845 = vmatmul.f32.gmra.mxu3 %v302_v5  ;;  %v352_v59 = vld [vmem:[%s2993_s22 + $0x1c8] sm:$0xff]  ;;  %v357_v60 = vld [vmem:[%s2993_s22 + $0x1f0] sm:$0xff]  ;;  %v358_v61 = vld [vmem:[%s2993_s22 + $0x1f8] sm:$0xff] }
  0x36   : > { %v355_v62 = vld [vmem:[%s2993_s22 + $0x1e0] sm:$0xff]  ;;  %v356_v63 = vld [vmem:[%s2993_s22 + $0x1e8] sm:$0xff]  ;;  %v361_v0 = vld [vmem:[%s2993_s22 + $0x210] sm:$0xff] }
  0x37   : > { %506 = vmatmul.f32.gmra.mxu0 %v299_v6  ;;  %619 = vmatmul.f32.gmra.mxu1 %v300_v7  ;;  %v362_v1 = vld [vmem:[%s2993_s22 + $0x218] sm:$0xff]  ;;  %v359_v4 = vld [vmem:[%s2993_s22 + $0x200] sm:$0xff]  ;;  %v360_v5 = vld [vmem:[%s2993_s22 + $0x208] sm:$0xff] }
  0x3d   : > { %735 = vmatmul.f32.gmra.mxu2 %v305_v8  ;;  %848 = vmatmul.f32.gmra.mxu3 %v306_v9 }
  0x3f   : > { %509 = vmatmul.f32.gmra.mxu0 %v303_v10  ;;  %622 = vmatmul.f32.gmra.mxu1 %v304_v11  ;;  %v3084_v10 = vld [vmem:[%s4362_s2] ss:$0 sm:$0xff]  ;;  %v365_v11 = vld [vmem:[%s2993_s22 + $0x230] sm:$0xff] }
  0x45   : > { %738 = vmatmul.f32.gmra.mxu2 %v309_v12  ;;  %851 = vmatmul.f32.gmra.mxu3 %v310_v13  ;;  %v366_v12 = vld [vmem:[%s2993_s22 + $0x238] sm:$0xff] }
  0x47   : > { %512 = vmatmul.f32.gmra.mxu0 %v307_v14  ;;  %625 = vmatmul.f32.gmra.mxu1 %v308_v15 }
  0x4d   : > { %741 = vmatmul.f32.gmra.mxu2 %v313_v16  ;;  %854 = vmatmul.f32.gmra.mxu3 %v314_v17  ;;  %v363_v16 = vld [vmem:[%s2993_s22 + $0x220] sm:$0xff]  ;;  %v364_v17 = vld [vmem:[%s2993_s22 + $0x228] sm:$0xff] }
  0x4f   : > { %515 = vmatmul.f32.gmra.mxu0 %v311_v18  ;;  %628 = vmatmul.f32.gmra.mxu1 %v312_v19 }
  0x55   : > { %744 = vmatmul.f32.gmra.mxu2 %v317_v20  ;;  %857 = vmatmul.f32.gmra.mxu3 %v318_v21 }
  0x57   : > { %518 = vmatmul.f32.gmra.mxu0 %v315_v22  ;;  %631 = vmatmul.f32.gmra.mxu1 %v316_v23 }
  0x5d   : > { %747 = vmatmul.f32.gmra.mxu2 %v321_v24  ;;  %860 = vmatmul.f32.gmra.mxu3 %v322_v25  ;;  %v369_v25 = vld [vmem:[%s2993_s22 + $0x250] sm:$0xff] }
  0x5f   : > { %521 = vmatmul.f32.gmra.mxu0 %v319_v26  ;;  %634 = vmatmul.f32.gmra.mxu1 %v320_v27  ;;  %v370_v26 = vld [vmem:[%s2993_s22 + $0x258] sm:$0xff] }
  0x65   : > { %750 = vmatmul.f32.gmra.mxu2 %v325_v28  ;;  %863 = vmatmul.f32.gmra.mxu3 %v326_v29 }
  0x67   : > { %524 = vmatmul.f32.gmra.mxu0 %v323_v30  ;;  %637 = vmatmul.f32.gmra.mxu1 %v324_v31  ;;  %v367_v31 = vld [vmem:[%s2993_s22 + $0x240] sm:$0xff] }
  0x6d   : > { %753 = vmatmul.f32.gmra.mxu2 %v329_v32  ;;  %866 = vmatmul.f32.gmra.mxu3 %v330_v33  ;;  %v368_v32 = vld [vmem:[%s2993_s22 + $0x248] sm:$0xff] }
  0x6f   : > { %527 = vmatmul.f32.gmra.mxu0 %v327_v34  ;;  %640 = vmatmul.f32.gmra.mxu1 %v328_v35 }
  0x75   : > { %756 = vmatmul.f32.gmra.mxu2 %v333_v36  ;;  %869 = vmatmul.f32.gmra.mxu3 %v334_v37 }
  0x77   : > { %530 = vmatmul.f32.gmra.mxu0 %v331_v38  ;;  %643 = vmatmul.f32.gmra.mxu1 %v332_v39 }
  0x7d   : > { %759 = vmatmul.f32.gmra.mxu2 %v337_v40  ;;  %872 = vmatmul.f32.gmra.mxu3 %v338_v41 }
  0x7f   : > { %533 = vmatmul.f32.gmra.mxu0 %v335_v42  ;;  %646 = vmatmul.f32.gmra.mxu1 %v336_v43 }
  0x85   : > { %762 = vmatmul.f32.gmra.mxu2 %v341_v44  ;;  %875 = vmatmul.f32.gmra.mxu3 %v342_v45 }
  0x87   : > { %536 = vmatmul.f32.gmra.mxu0 %v339_v46  ;;  %649 = vmatmul.f32.gmra.mxu1 %v340_v47  ;;  %v373_v46 = vld [vmem:[%s2993_s22 + $0x270] sm:$0xff] }
  0x8d   : > { %765 = vmatmul.f32.gmra.mxu2 %v345_v48  ;;  %878 = vmatmul.f32.gmra.mxu3 %v346_v49 }
  0x8f   : > { %539 = vmatmul.f32.gmra.mxu0 %v343_v50  ;;  %652 = vmatmul.f32.gmra.mxu1 %v344_v51  ;;  %v374_v50 = vld [vmem:[%s2993_s22 + $0x278] sm:$0xff] }
  0x95   : > { %768 = vmatmul.f32.gmra.mxu2 %v349_v52  ;;  %881 = vmatmul.f32.gmra.mxu3 %v350_v53 }
  0x97   : > { %542 = vmatmul.f32.gmra.mxu0 %v347_v54  ;;  %655 = vmatmul.f32.gmra.mxu1 %v348_v55  ;;  %v371_v54 = vld [vmem:[%s2993_s22 + $0x260] sm:$0xff]  ;;  %v372_v55 = vld [vmem:[%s2993_s22 + $0x268] sm:$0xff] }
  0x9d   : > { %771 = vmatmul.f32.gmra.mxu2 %v353_v56  ;;  %884 = vmatmul.f32.gmra.mxu3 %v354_v57 }
  0x9f   : > { %545 = vmatmul.f32.gmra.mxu0 %v351_v58  ;;  %658 = vmatmul.f32.gmra.mxu1 %v352_v59 }
  0xa5   : > { %774 = vmatmul.f32.gmra.mxu2 %v357_v60  ;;  %887 = vmatmul.f32.gmra.mxu3 %v358_v61 }
  0xa7   : > { %548 = vmatmul.f32.gmra.mxu0 %v355_v62  ;;  %661 = vmatmul.f32.gmra.mxu1 %v356_v63 }
  0xac   : > { %v504_v2 = vpop.f32.mrf.mxu0  ;;  %v617_v3 = vpop.f32.mrf.mxu1 }
  0xad   : > { %777 = vmatmul.f32.gmra.mxu2 %v361_v0  ;;  %v618_v6 = vadd.f32 %v617_v3, %v504_v2  ;;  %890 = vmatmul.f32.gmra.mxu3 %v362_v1 }
  0xaf   : > { %551 = vmatmul.f32.gmra.mxu0 %v359_v4  ;;  %664 = vmatmul.f32.gmra.mxu1 %v360_v5 }
  0xb0   : > { %v730_v7 = vpop.f32.mrf.mxu2  ;;  %v843_v8 = vpop.f32.mrf.mxu3 }
  0xb1   : > { %v731_v9 = vadd.f32 %v730_v7, %v618_v6 }
  0xb3   : > { %v844_v13 = vadd.f32 %v843_v8, %v731_v9 }
  0xb4   : > { %v507_v14 = vpop.f32.mrf.mxu0  ;;  %v620_v15 = vpop.f32.mrf.mxu1 }
  0xb5   : > { %v3091_v18 = vadd.f32 %v3084_v10, %v844_v13  ;;  %780 = vmatmul.f32.gmra.mxu2 %v365_v11  ;;  %v621_v19 = vadd.f32 %v620_v15, %v507_v14  ;;  %893 = vmatmul.f32.gmra.mxu3 %v366_v12  ;;  %v377_v12 = vld [vmem:[%s2993_s22 + $0x290] sm:$0xff] }
  0xb7   : > { %v3094_v20 = vmul.f32 0.70710677, %v3091_v18  ;;  %554 = vmatmul.f32.gmra.mxu0 %v363_v16  ;;  %667 = vmatmul.f32.gmra.mxu1 %v364_v17  ;;  %v378_v16 = vld [vmem:[%s2993_s22 + $0x298] sm:$0xff]  ;;  %v375_v17 = vld [vmem:[%s2993_s22 + $0x280] sm:$0xff] }
  0xb8   : > { %v733_v21 = vpop.f32.mrf.mxu2  ;;  %v846_v22 = vpop.f32.mrf.mxu3 }
  0xb9   : > { %v1138_v23 = vmul.f32 %v3094_v20, %v3094_v20  ;;  %v734_v24 = vadd.f32 %v733_v21, %v621_v19 }
  0xbb   : > { %v3100_v27 = vmin.f32 %v1138_v23, 16.0  ;;  %v847_v28 = vadd.f32 %v846_v22, %v734_v24 }
  0xbc   : > { %v510_v29 = vpop.f32.mrf.mxu0  ;;  %v623_v30 = vpop.f32.mrf.mxu1 }
  0xbd   : > { %v1140_v33 = vmul.f32 2.1237322e-06, %v3100_v27  ;;  %v1151_v34 = vmul.f32 3.8918573e-05, %v3100_v27  ;;  %v3107_v35 = vadd.f32 %v3084_v10, %v847_v28  ;;  %783 = vmatmul.f32.gmra.mxu2 %v369_v25  ;;  %v624_v36 = vadd.f32 %v623_v30, %v510_v29  ;;  %896 = vmatmul.f32.gmra.mxu3 %v370_v26  ;;  %v376_v25 = vld [vmem:[%s2993_s22 + $0x288] sm:$0xff] }
  0xbf   : > { %v1141_v37 = vadd.f32 0.00028619796, %v1140_v33  ;;  %v1152_v38 = vadd.f32 0.001143296, %v1151_v34  ;;  %557 = vmatmul.f32.gmra.mxu0 %v367_v31  ;;  %670 = vmatmul.f32.gmra.mxu1 %v368_v32  ;;  %v3110_v39 = vmul.f32 0.70710677, %v3107_v35 }
  0xc0   : > { %v736_v40 = vpop.f32.mrf.mxu2  ;;  %v849_v41 = vpop.f32.mrf.mxu3 }
  0xc1   : > { %v1142_v42 = vmul.f32 %v1141_v37, %v3100_v27  ;;  %v1153_v43 = vmul.f32 %v1152_v38, %v3100_v27  ;;  %v737_v44 = vadd.f32 %v736_v40, %v624_v36  ;;  %v1178_v45 = vmul.f32 %v3110_v39, %v3110_v39 }
  0xc3   : > { %v1143_v47 = vadd.f32 0.0036580483, %v1142_v42  ;;  %v1154_v48 = vadd.f32 0.014752088, %v1153_v43  ;;  %v850_v49 = vadd.f32 %v849_v41, %v737_v44  ;;  %v3118_v51 = vmin.f32 %v1178_v45, 16.0 }
  0xc4   : > { %v513_v52 = vpop.f32.mrf.mxu0  ;;  %v626_v53 = vpop.f32.mrf.mxu1 }
  0xc5   : > { %v1144_v56 = vmul.f32 %v1143_v47, %v3100_v27  ;;  %v1155_v57 = vmul.f32 %v1154_v48, %v3100_v27  ;;  %v3125_v58 = vadd.f32 %v3084_v10, %v850_v49  ;;  %786 = vmatmul.f32.gmra.mxu2 %v373_v46  ;;  %v627_v59 = vadd.f32 %v626_v53, %v513_v52  ;;  %v381_v46 = vld [vmem:[%s2993_s22 + $0x2b0] sm:$0xff] }
  0xc6   : > { %v1180_v60 = vmul.f32 2.1237322e-06, %v3118_v51  ;;  %v1191_v61 = vmul.f32 3.8918573e-05, %v3118_v51  ;;  %899 = vmatmul.f32.gmra.mxu3 %v374_v50  ;;  %v3164_v47 = vmul.f32 0.5, %v3091_v18  ;;  %v382_v50 = vld [vmem:[%s2993_s22 + $0x2b8] sm:$0xff] }
  0xc7   : > { %v1145_v62 = vadd.f32 0.05243302, %v1144_v56  ;;  %v1156_v63 = vadd.f32 0.112945676, %v1155_v57  ;;  %560 = vmatmul.f32.gmra.mxu0 %v371_v54  ;;  %673 = vmatmul.f32.gmra.mxu1 %v372_v55  ;;  %v3130_v2 = vmul.f32 0.70710677, %v3125_v58 }
  0xc8   : > { %v1181_v0 = vadd.f32 0.00028619796, %v1180_v60  ;;  %v1192_v1 = vadd.f32 0.001143296, %v1191_v61  ;;  %v739_v3 = vpop.f32.mrf.mxu2  ;;  %v852_v4 = vpop.f32.mrf.mxu3  ;;  %v379_v55 = vld [vmem:[%s2993_s22 + $0x2a0] sm:$0xff]  ;;  %v380_v56 = vld [vmem:[%s2993_s22 + $0x2a8] sm:$0xff] }
  0xc9   : > { %v1146_v5 = vmul.f32 %v1145_v62, %v3100_v27  ;;  %v1157_v6 = vmul.f32 %v1156_v63, %v3100_v27  ;;  %v740_v7 = vadd.f32 %v739_v3, %v627_v59  ;;  %v1218_v11 = vmul.f32 %v3130_v2, %v3130_v2 }
  0xca   : > { %v1182_v8 = vmul.f32 %v1181_v0, %v3118_v51  ;;  %v1193_v9 = vmul.f32 %v1192_v1, %v3118_v51  ;;  %v3172_v57 = vmul.f32 0.5, %v3107_v35 }
  0xcb   : > { %v1147_v13 = vadd.f32 0.18741608, %v1146_v5  ;;  %v1158_v14 = vadd.f32 0.4994258, %v1157_v6  ;;  %v853_v15 = vadd.f32 %v852_v4, %v740_v7  ;;  %v3141_v22 = vmin.f32 %v1218_v11, 16.0 }
  0xcc   : > { %v1183_v19 = vadd.f32 0.0036580483, %v1182_v8  ;;  %v1194_v21 = vadd.f32 0.014752088, %v1193_v9  ;;  %v516_v23 = vpop.f32.mrf.mxu0  ;;  %v629_v24 = vpop.f32.mrf.mxu1 }
  0xcd   : > { %v1159_v26 = vmul.f32 %v1158_v14, %v3100_v27  ;;  %v3146_v28 = vadd.f32 %v3084_v10, %v853_v15  ;;  %789 = vmatmul.f32.gmra.mxu2 %v377_v12  ;;  %v1148_v29 = vmul.f32 %v1147_v13, %v3100_v27  ;;  %v1220_v32 = vmul.f32 2.1237322e-06, %v3141_v22 }
  0xce   : > { %v1184_v30 = vmul.f32 %v1183_v19, %v3118_v51  ;;  %v1195_v31 = vmul.f32 %v1194_v21, %v3118_v51  ;;  %902 = vmatmul.f32.gmra.mxu3 %v378_v16  ;;  %v1231_v34 = vmul.f32 3.8918573e-05, %v3141_v22  ;;  %v630_v40 = vadd.f32 %v629_v24, %v516_v23  ;;  %v385_v19 = vld [vmem:[%s2993_s22 + $0x2d0] sm:$0xff] }
  0xcf   : > { %v3152_v33 = vadd.f32 1.0, %v1159_v26  ;;  %v3156_v36 = vmul.f32 0.70710677, %v3146_v28  ;;  %563 = vmatmul.f32.gmra.mxu0 %v375_v17  ;;  %676 = vmatmul.f32.gmra.mxu1 %v376_v25  ;;  %v1221_v38 = vadd.f32 0.00028619796, %v1220_v32  ;;  %v386_v26 = vld [vmem:[%s2993_s22 + $0x2d8] sm:$0xff] }
  0xd0   : > { %v1185_v37 = vadd.f32 0.05243302, %v1184_v30  ;;  %v1196_v27 = vadd.f32 0.112945676, %v1195_v31  ;;  %v742_v41 = vpop.f32.mrf.mxu2  ;;  %v1149_v42 = vadd.f32 1.1283791, %v1148_v29  ;;  %v855_v18 = vpop.f32.mrf.mxu3 }
  0xd1   : > { %2671 = vrcp.f32 %v3152_v33  ;;  %v1222_v45 = vmul.f32 %v1221_v38, %v3141_v22  ;;  %v1232_v48 = vadd.f32 0.001143296, %v1231_v34  ;;  %v1258_v49 = vmul.f32 %v3156_v36, %v3156_v36  ;;  %v383_v34 = vld [vmem:[%s2993_s22 + $0x2c0] sm:$0xff] }
  0xd2   : > { %v1186_v43 = vmul.f32 %v1185_v37, %v3118_v51  ;;  %v1197_v44 = vmul.f32 %v1196_v27, %v3118_v51  ;;  %v743_v54 = vadd.f32 %v742_v41, %v630_v40  ;;  %v3178_v62 = vmul.f32 %v1149_v42, %v3094_v20  ;;  %v384_v37 = vld [vmem:[%s2993_s22 + $0x2c8] sm:$0xff] }
  0xd3   : > { %v1223_v59 = vadd.f32 0.0036580483, %v1222_v45  ;;  %v1233_v60 = vmul.f32 %v1232_v48, %v3141_v22  ;;  %v3175_v61 = vmin.f32 %v1258_v49, 16.0  ;;  %v1170_v63 = vand.u32 2147483647, %v3152_v33 }
  0xd4   : > { %v1187_v52 = vadd.f32 0.18741608, %v1186_v43  ;;  %v1198_v53 = vadd.f32 0.4994258, %v1197_v44  ;;  %v519_v3 = vpop.f32.mrf.mxu0  ;;  %v632_v4 = vpop.f32.mrf.mxu1  ;;  %v1172_v9 = vand.u32 2147483648, %v3152_v33  ;;  %vm1166_vm0 = vweird.f32 %v3152_v33 }
  0xd5   : > { %792 = vmatmul.f32.gmra.mxu2 %v381_v46  ;;  %v1224_v5 = vmul.f32 %v1223_v59, %v3141_v22  ;;  %v1234_v6 = vadd.f32 0.014752088, %v1233_v60  ;;  %v1260_v7 = vmul.f32 2.1237322e-06, %v3175_v61  ;;  %v1271_v8 = vmul.f32 3.8918573e-05, %v3175_v61 }
  0xd6   : > { %v1188_v0 = vmul.f32 %v1187_v52, %v3118_v51  ;;  %v1199_v1 = vmul.f32 %v1198_v53, %v3118_v51  ;;  %905 = vmatmul.f32.gmra.mxu3 %v382_v50  ;;  %v856_v51 = vadd.f32 %v855_v18, %v743_v54  ;;  %v633_v24 = vadd.f32 %v632_v4, %v519_v3 }
  0xd7   : > { %v2672_v35 = vpop.eup %2671  ;;  %566 = vmatmul.f32.gmra.mxu0 %v379_v55  ;;  %679 = vmatmul.f32.gmra.mxu1 %v380_v56  ;;  %v1225_v12 = vadd.f32 0.05243302, %v1224_v5  ;;  %v1235_v13 = vmul.f32 %v1234_v6, %v3141_v22  ;;  %v1261_v14 = vadd.f32 0.00028619796, %v1260_v7  ;;  %v1272_v15 = vadd.f32 0.001143296, %v1271_v8 }
  0xd8   : > { %v1162_v20 = vmul.f32 %v2672_v35, %v3152_v33  ;;  %v3188_v11 = vadd.f32 1.0, %v1199_v1  ;;  %v1189_v17 = vadd.f32 1.1283791, %v1188_v0  ;;  %vm1167_vm1 = vweird.f32 %v2672_v35  ;;  %v745_v25 = vpop.f32.mrf.mxu2  ;;  %v858_v52 = vpop.f32.mrf.mxu3  ;;  %v389_v5 = vld [vmem:[%s2993_s22 + $0x2f0] sm:$0xff] }
  0xd9   : > { %v1226_v21 = vmul.f32 %v1225_v12, %v3141_v22  ;;  %v1236_v23 = vadd.f32 0.112945676, %v1235_v13  ;;  %v1262_v30 = vmul.f32 %v1261_v14, %v3175_v61  ;;  %v1273_v31 = vmul.f32 %v1272_v15, %v3175_v61  ;;  %vm3214_vm3 = vmor %vm1166_vm0, %vm1167_vm1  ;;  %v387_v14 = vld [vmem:[%s2993_s22 + $0x2e0] sm:$0xff] }
  0xda   : > { %v1163_v16 = vsub.f32 1.0, %v1162_v20  ;;  %2673 = vrcp.f32 %v3188_v11  ;;  %v3199_v32 = vadd.f32 %v3084_v10, %v856_v51  ;;  %vm3203_vm2 = vcmp.eq.f32.partialorder %v1170_v63, 8.507059e+37 }
  0xdb   : > { %v1173_v38 = vor.u32 1.1754944e-38, %v1172_v9  ;;  %v1227_v40 = vadd.f32 0.18741608, %v1226_v21  ;;  %v1237_v41 = vmul.f32 %v1236_v23, %v3141_v22  ;;  %v3209_v43 = vmul.f32 %v1189_v17, %v3110_v39  ;;  %v390_v9 = vld [vmem:[%s2993_s22 + $0x2f8] sm:$0xff] }
  0xdc   : > { %v1164_v29 = vmul.f32 %v2672_v35, %v1163_v16  ;;  %v1263_v44 = vadd.f32 0.0036580483, %v1262_v30  ;;  %v1274_v45 = vadd.f32 0.014752088, %v1273_v31  ;;  %vm1206_vm4 = vweird.f32 %v3188_v11  ;;  %v522_v56 = vpop.f32.mrf.mxu0  ;;  %v635_v59 = vpop.f32.mrf.mxu1 }
  0xdd   : > { %795 = vmatmul.f32.gmra.mxu2 %v385_v19  ;;  %v1238_v48 = vadd.f32 0.4994258, %v1237_v41  ;;  %v3220_v49 = vmul.f32 0.70710677, %v3199_v32  ;;  %v746_v50 = vadd.f32 %v745_v25, %v633_v24  ;;  %v1210_v33 = vand.u32 2147483647, %v3188_v11 }
  0xde   : > { %v1165_v42 = vadd.f32 %v2672_v35, %v1164_v29  ;;  %908 = vmatmul.f32.gmra.mxu3 %v386_v26  ;;  %v1264_v54 = vmul.f32 %v1263_v44, %v3175_v61  ;;  %v1275_v55 = vmul.f32 %v1274_v45, %v3175_v61  ;;  %v1212_v63 = vand.u32 2147483648, %v3188_v11 }
  0xdf   : > { %569 = vmatmul.f32.gmra.mxu0 %v383_v34  ;;  %682 = vmatmul.f32.gmra.mxu1 %v384_v37  ;;  %v1228_v0 = vmul.f32 %v1227_v40, %v3141_v22  ;;  %v1239_v3 = vmul.f32 %v1238_v48, %v3141_v22  ;;  %v1298_v7 = vmul.f32 %v3220_v49, %v3220_v49  ;;  %v388_v22 = vld [vmem:[%s2993_s22 + $0x2e8] sm:$0xff]  ;;  %vm3245_vm6 = vcmp.eq.f32.partialorder %v1210_v33, 8.507059e+37  ;;  %v393_v48 = vld [vmem:[%s2993_s22 + $0x310] sm:$0xff] }
  0xe0   : > { %v2674_v39 = vpop.eup %2673  ;;  %v1169_v53 = vsel %vm3214_vm3, %v2672_v35, %v1165_v42  ;;  %v1265_v4 = vadd.f32 0.05243302, %v1264_v54  ;;  %v1276_v35 = vadd.f32 0.112945676, %v1275_v55  ;;  %v859_v8 = vadd.f32 %v858_v52, %v746_v50  ;;  %v748_v19 = vpop.f32.mrf.mxu2  ;;  %v394_v55 = vld [vmem:[%s2993_s22 + $0x318] sm:$0xff] }
  0xe1   : > { %v1174_v60 = vsel %vm3203_vm2, %v1173_v38, %v1169_v53  ;;  %v1202_v18 = vmul.f32 %v2674_v39, %v3188_v11  ;;  %v636_v20 = vadd.f32 %v635_v59, %v522_v56  ;;  %v3239_v12 = vadd.f32 1.0, %v1239_v3  ;;  %v861_v44 = vpop.f32.mrf.mxu3 }
  0xe2   : > { %v1175_v1 = vmul.f32 %v1174_v60, %v3178_v62  ;;  %v1266_v13 = vmul.f32 %v1265_v4, %v3175_v61  ;;  %v1277_v62 = vmul.f32 %v1276_v35, %v3175_v61  ;;  %vm1207_vm5 = vweird.f32 %v2674_v39 }
  0xe3   : > { %v1203_v6 = vsub.f32 1.0, %v1202_v18  ;;  %v3249_v17 = vmin.f32 %v1298_v7, 16.0  ;;  %v1213_v23 = vor.u32 1.1754944e-38, %v1212_v63  ;;  %v1229_v24 = vadd.f32 1.1283791, %v1228_v0  ;;  %vm1208_vm7 = vmor %vm1206_vm4, %vm1207_vm5  ;;  %v391_v18 = vld [vmem:[%s2993_s22 + $0x300] sm:$0xff] }
  0xe4   : > { %v2611_v51 = vclamps-f32 %v1175_v1, 1.0  ;;  %2675 = vrcp.f32 %v3239_v12  ;;  %v1267_v26 = vadd.f32 0.18741608, %v1266_v13  ;;  %v1278_v29 = vadd.f32 0.4994258, %v1277_v62  ;;  %v525_v33 = vpop.f32.mrf.mxu0  ;;  %v638_v54 = vpop.f32.mrf.mxu1 }
  0xe5   : > { %v1204_v15 = vmul.f32 %v2674_v39, %v1203_v6  ;;  %798 = vmatmul.f32.gmra.mxu2 %v389_v5  ;;  %v3258_v30 = vadd.f32 %v3084_v10, %v859_v8  ;;  %v1300_v34 = vmul.f32 2.1237322e-06, %v3249_v17  ;;  %v1311_v37 = vmul.f32 3.8918573e-05, %v3249_v17 }
  0xe6   : > { %v2418_v21 = vadd.f32 1.0, %v2611_v51  ;;  %911 = vmatmul.f32.gmra.mxu3 %v390_v9  ;;  %v749_v27 = vadd.f32 %v748_v19, %v636_v20  ;;  %v1250_v40 = vand.u32 2147483647, %v3239_v12  ;;  %v1252_v41 = vand.u32 2147483648, %v3239_v12 }
  0xe7   : > { %v1205_v25 = vadd.f32 %v2674_v39, %v1204_v15  ;;  %572 = vmatmul.f32.gmra.mxu0 %v387_v14  ;;  %685 = vmatmul.f32.gmra.mxu1 %v388_v22  ;;  %v1279_v42 = vmul.f32 %v1278_v29, %v3175_v61  ;;  %v1268_v11 = vmul.f32 %v1267_v26, %v3175_v61  ;;  %v1301_v45 = vadd.f32 0.00028619796, %v1300_v34  ;;  %v398_v26 = vld [vmem:[%s2993_s22 + $0x338] sm:$0xff] }
  0xe8   : > { %v2450_v31 = vmul.f32 %v2418_v21, %v3164_v47  ;;  %v1312_v46 = vadd.f32 0.001143296, %v1311_v37  ;;  %v3276_v52 = vmul.f32 0.5, %v3125_v58  ;;  %v3287_v60 = vmul.f32 0.70710677, %v3258_v30  ;;  %v392_v58 = vld [vmem:[%s2993_s22 + $0x308] sm:$0xff]  ;;  %v751_v22 = vpop.f32.mrf.mxu2 }
  0xe9   : > { %v1209_v38 = vsel %vm1208_vm7, %v2674_v39, %v1205_v25  ;;  %v3279_v39 = vmul.f32 %v1229_v24, %v3130_v2  ;;  %v3281_v53 = vadd.f32 1.0, %v1279_v42  ;;  %v1302_v61 = vmul.f32 %v1301_v45, %v3249_v17 }
  0xea   : > { %2482 = vst [vmem:[%s3255_s17] sm:$0xff] %v2450_v31  ;;  %v1214_v47 = vsel %vm3245_vm6, %v1213_v23, %v1209_v38  ;;  %v2676_v56 = vpop.eup %2675  ;;  %v1313_v59 = vmul.f32 %v1312_v46, %v3249_v17  ;;  %vm1246_vm8 = vweird.f32 %v3239_v12  ;;  %vm3293_vm9 = vcmp.eq.f32.partialorder %v1250_v40, 8.507059e+37  ;;  %v397_v23 = vld [vmem:[%s2993_s22 + $0x330] sm:$0xff]  ;;  %v396_v38 = vld [vmem:[%s2993_s22 + $0x328] sm:$0xff] }
  0xeb   : > { %v1215_v50 = vmul.f32 %v1214_v47, %v3209_v43  ;;  %v862_v43 = vadd.f32 %v861_v44, %v749_v27  ;;  %v1242_v2 = vmul.f32 %v2676_v56, %v3239_v12  ;;  %v1253_v1 = vor.u32 1.1754944e-38, %v1252_v41  ;;  %v395_v27 = vld [vmem:[%s2993_s22 + $0x320] sm:$0xff]  ;;  %v864_v47 = vpop.f32.mrf.mxu3 }
  0xec   : > { %v1269_v3 = vadd.f32 1.1283791, %v1268_v11  ;;  %2677 = vrcp.f32 %v3281_v53  ;;  %v639_v4 = vadd.f32 %v638_v54, %v525_v33  ;;  %v1303_v6 = vadd.f32 0.0036580483, %v1302_v61 }
  0xed   : > { %v2612_v63 = vclamps-f32 %v1215_v50, 1.0  ;;  %801 = vmatmul.f32.gmra.mxu2 %v393_v48  ;;  %v1243_v5 = vsub.f32 1.0, %v1242_v2  ;;  %v1314_v7 = vadd.f32 0.014752088, %v1313_v59  ;;  %vm1247_vm10 = vweird.f32 %v2676_v56 }
  0xee   : > { %914 = vmatmul.f32.gmra.mxu3 %v394_v55  ;;  %v1292_v8 = vand.u32 2147483648, %v3281_v53  ;;  %v1338_v20 = vmul.f32 %v3287_v60, %v3287_v60  ;;  %v3302_v9 = vadd.f32 %v3084_v10, %v862_v43  ;;  %v1304_v62 = vmul.f32 %v1303_v6, %v3249_v17  ;;  %vm1248_vm12 = vmor %vm1246_vm8, %vm1247_vm10  ;;  %v528_v43 = vpop.f32.mrf.mxu0 }
  0xef   : > { %v2419_v35 = vadd.f32 1.0, %v2612_v63  ;;  %575 = vmatmul.f32.gmra.mxu0 %v391_v18  ;;  %688 = vmatmul.f32.gmra.mxu1 %v392_v58  ;;  %v1244_v13 = vmul.f32 %v2676_v56, %v1243_v5  ;;  %v1315_v14 = vmul.f32 %v1314_v7, %v3249_v17  ;;  %v3308_v15 = vmul.f32 %v1269_v3, %v3156_v36  ;;  %v641_v18 = vpop.f32.mrf.mxu1  ;;  %v401_v7 = vld [vmem:[%s2993_s22 + $0x350] sm:$0xff] }
  0xf0   : > { %v1290_v16 = vand.u32 2147483647, %v3281_v53  ;;  %v3311_v19 = vmin.f32 %v1338_v20, 16.0  ;;  %v3314_v21 = vmul.f32 0.70710677, %v3302_v9  ;;  %vm1286_vm11 = vweird.f32 %v3281_v53 }
  0xf1   : > { %v2451_v51 = vmul.f32 %v2419_v35, %v3172_v57  ;;  %v1245_v57 = vadd.f32 %v2676_v56, %v1244_v13  ;;  %v1305_v24 = vadd.f32 0.05243302, %v1304_v62  ;;  %v1316_v25 = vadd.f32 0.112945676, %v1315_v14  ;;  %v402_v62 = vld [vmem:[%s2993_s22 + $0x358] sm:$0xff] }
  0xf2   : > { %v2678_v29 = vpop.eup %2677  ;;  %v1340_v36 = vmul.f32 2.1237322e-06, %v3311_v19  ;;  %v1351_v31 = vmul.f32 3.8918573e-05, %v3311_v19  ;;  %v1378_v34 = vmul.f32 %v3314_v21, %v3314_v21  ;;  %v752_v37 = vadd.f32 %v751_v22, %v639_v4 }
  0xf3   : > { %2483 = vst [vmem:[%s3255_s17 + $0x8] sm:$0xff] %v2451_v51  ;;  %v1249_v40 = vsel %vm1248_vm12, %v2676_v56, %v1245_v57  ;;  %v1282_v41 = vmul.f32 %v2678_v29, %v3281_v53  ;;  %v1293_v42 = vor.u32 1.1754944e-38, %v1292_v8  ;;  %v1306_v44 = vmul.f32 %v1305_v24, %v3249_v17 }
  0xf4   : > { %v1254_v12 = vsel %vm3293_vm9, %v1253_v1, %v1249_v40  ;;  %v1317_v11 = vmul.f32 %v1316_v25, %v3249_v17  ;;  %v1341_v45 = vadd.f32 0.00028619796, %v1340_v36  ;;  %v1352_v46 = vadd.f32 0.001143296, %v1351_v31  ;;  %v400_v36 = vld [vmem:[%s2993_s22 + $0x348] sm:$0xff] }
  0xf5   : > { %804 = vmatmul.f32.gmra.mxu2 %v397_v23  ;;  %v1255_v48 = vmul.f32 %v1254_v12, %v3279_v39  ;;  %v1283_v50 = vsub.f32 1.0, %v1282_v41  ;;  %v1307_v33 = vadd.f32 0.18741608, %v1306_v44  ;;  %v3335_v54 = vmin.f32 %v1378_v34, 16.0  ;;  %v754_v23 = vpop.f32.mrf.mxu2 }
  0xf6   : > { %917 = vmatmul.f32.gmra.mxu3 %v398_v26  ;;  %v1318_v55 = vadd.f32 0.4994258, %v1317_v11  ;;  %v1342_v56 = vmul.f32 %v1341_v45, %v3311_v19  ;;  %v1353_v61 = vmul.f32 %v1352_v46, %v3311_v19  ;;  %v865_v59 = vadd.f32 %v864_v47, %v752_v37  ;;  %v399_v26 = vld [vmem:[%s2993_s22 + $0x340] sm:$0xff]  ;;  %v531_v12 = vpop.f32.mrf.mxu0 }
  0xf7   : > { %578 = vmatmul.f32.gmra.mxu0 %v395_v27  ;;  %691 = vmatmul.f32.gmra.mxu1 %v396_v38  ;;  %v2613_v58 = vclamps-f32 %v1255_v48, 1.0  ;;  %v1284_v63 = vmul.f32 %v2678_v29, %v1283_v50  ;;  %vm1287_vm13 = vweird.f32 %v2678_v29  ;;  %v1380_v39 = vmul.f32 2.1237322e-06, %v3335_v54  ;;  %v644_v11 = vpop.f32.mrf.mxu1 }
  0xf8   : > { %v1319_v2 = vmul.f32 %v1318_v55, %v3249_v17  ;;  %v1343_v0 = vadd.f32 0.0036580483, %v1342_v56  ;;  %v1354_v1 = vadd.f32 0.014752088, %v1353_v61  ;;  %v1391_v3 = vmul.f32 3.8918573e-05, %v3335_v54  ;;  %vm1288_vm14 = vmor %vm1286_vm11, %vm1287_vm13 }
  0xf9   : > { %v2420_v4 = vadd.f32 1.0, %v2613_v58  ;;  %v1285_v35 = vadd.f32 %v2678_v29, %v1284_v63  ;;  %v1308_v5 = vmul.f32 %v1307_v33, %v3249_v17  ;;  %v1381_v6 = vadd.f32 0.00028619796, %v1380_v39 }
  0xfa   : > { %v3346_v8 = vadd.f32 1.0, %v1319_v2  ;;  %v1344_v20 = vmul.f32 %v1343_v0, %v3311_v19  ;;  %v1355_v51 = vmul.f32 %v1354_v1, %v3311_v19  ;;  %v1392_v13 = vadd.f32 0.001143296, %v1391_v3  ;;  %v405_v1 = vld [vmem:[%s2993_s22 + $0x370] sm:$0xff] }
  0xfb   : > { %v2452_v14 = vmul.f32 %v2420_v4, %v3276_v52  ;;  %v1289_v22 = vsel %vm1288_vm14, %v2678_v29, %v1285_v35  ;;  %vm1291_vm15 = vcmp.eq.f32.partialorder %v1290_v16, 8.507059e+37  ;;  %v1382_v17 = vmul.f32 %v1381_v6, %v3335_v54 }
  0xfc   : > { %v1294_v57 = vsel %vm1291_vm15, %v1293_v42, %v1289_v22  ;;  %2679 = vrcp.f32 %v3346_v8  ;;  %v3357_v24 = vadd.f32 %v3084_v10, %v865_v59  ;;  %v642_v25 = vadd.f32 %v641_v18, %v528_v43  ;;  %v867_v42 = vpop.f32.mrf.mxu3 }
  0xfd   : > { %807 = vmatmul.f32.gmra.mxu2 %v401_v7  ;;  %2484 = vst [vmem:[%s3255_s17 + $0x10] sm:$0xff] %v2452_v14  ;;  %v1077_v52 = vmul.f32 0.5, %v3146_v28  ;;  %v1295_v53 = vmul.f32 %v1294_v57, %v3308_v15  ;;  %v1345_v16 = vadd.f32 0.05243302, %v1344_v20  ;;  %v1356_v29 = vadd.f32 0.112945676, %v1355_v51 }
  0xfe   : > { %920 = vmatmul.f32.gmra.mxu3 %v402_v62  ;;  %v3365_v31 = vmul.f32 0.5, %v3199_v32  ;;  %v1309_v34 = vadd.f32 1.1283791, %v1308_v5  ;;  %v1383_v37 = vadd.f32 0.0036580483, %v1382_v17  ;;  %v1393_v27 = vmul.f32 %v1392_v13, %v3335_v54  ;;  %v757_v5 = vpop.f32.mrf.mxu2  ;;  %v406_v51 = vld [vmem:[%s2993_s22 + $0x378] sm:$0xff] }
  0xff   : > { %581 = vmatmul.f32.gmra.mxu0 %v399_v26  ;;  %694 = vmatmul.f32.gmra.mxu1 %v400_v36  ;;  %v2614_v38 = vclamps-f32 %v1295_v53, 1.0  ;;  %v1330_v40 = vand.u32 2147483647, %v3346_v8  ;;  %v1346_v41 = vmul.f32 %v1345_v16, %v3311_v19  ;;  %v1357_v28 = vmul.f32 %v1356_v29, %v3311_v19  ;;  %v404_v57 = vld [vmem:[%s2993_s22 + $0x368] sm:$0xff] }
 0x100   : > { %v1384_v15 = vmul.f32 %v1383_v37, %v3335_v54  ;;  %v1394_v44 = vadd.f32 0.014752088, %v1393_v27  ;;  %v3373_v47 = vmul.f32 0.70710677, %v3357_v24  ;;  %v755_v32 = vadd.f32 %v754_v23, %v642_v25  ;;  %v403_v23 = vld [vmem:[%s2993_s22 + $0x360] sm:$0xff] }
 0x101   : > { %v2421_v45 = vadd.f32 1.0, %v2614_v38  ;;  %v3376_v46 = vmul.f32 0.5, %v3258_v30  ;;  %v1347_v48 = vadd.f32 0.18741608, %v1346_v41  ;;  %v1358_v50 = vadd.f32 0.4994258, %v1357_v28 }
 0x102   : > { %v2680_v33 = vpop.eup %2679  ;;  %v1385_v55 = vadd.f32 0.05243302, %v1384_v15  ;;  %v1395_v56 = vmul.f32 %v1394_v44, %v3335_v54  ;;  %v1418_v61 = vmul.f32 %v3373_v47, %v3373_v47  ;;  %v868_v59 = vadd.f32 %v867_v42, %v755_v32 }
 0x103   : > { %v2453_v43 = vmul.f32 %v2421_v45, %v1077_v52  ;;  %v1322_v18 = vmul.f32 %v2680_v33, %v3346_v8  ;;  %v1348_v58 = vmul.f32 %v1347_v48, %v3311_v19  ;;  %v645_v63 = vadd.f32 %v644_v11, %v531_v12  ;;  %v647_v45 = vpop.f32.mrf.mxu1 }
 0x104   : > { %v1359_v30 = vmul.f32 %v1358_v50, %v3311_v19  ;;  %v1386_v39 = vmul.f32 %v1385_v55, %v3335_v54  ;;  %v1396_v2 = vadd.f32 0.112945676, %v1395_v56  ;;  %v3385_v0 = vmin.f32 %v1418_v61, 16.0  ;;  %v870_v53 = vpop.f32.mrf.mxu3 }
 0x105   : > { %2485 = vst [vmem:[%s3255_s17 + $0x18] sm:$0xff] %v2453_v43  ;;  %v1310_v3 = vmul.f32 %v1309_v34, %v3220_v49  ;;  %v1323_v4 = vsub.f32 1.0, %v1322_v18  ;;  %vm1326_vm0 = vweird.f32 %v3346_v8  ;;  %v1332_v35 = vand.u32 2147483648, %v3346_v8  ;;  %810 = vmatmul.f32.gmra.mxu2 %v405_v1 }
 0x106   : > { %v3392_v19 = vadd.f32 1.0, %v1359_v30  ;;  %v1397_v6 = vmul.f32 %v1396_v2, %v3335_v54  ;;  %v1420_v7 = vmul.f32 2.1237322e-06, %v3385_v0  ;;  %v3397_v20 = vadd.f32 %v3084_v10, %v868_v59  ;;  %923 = vmatmul.f32.gmra.mxu3 %v406_v51  ;;  %v410_v51 = vld [vmem:[%s2993_s22 + $0x398] sm:$0xff] }
 0x107   : > { %v1324_v49 = vmul.f32 %v2680_v33, %v1323_v4  ;;  %vm1327_vm1 = vweird.f32 %v2680_v33  ;;  %v1387_v13 = vadd.f32 0.18741608, %v1386_v39  ;;  %v1431_v62 = vmul.f32 3.8918573e-05, %v3385_v0  ;;  %584 = vmatmul.f32.gmra.mxu0 %v403_v23  ;;  %697 = vmatmul.f32.gmra.mxu1 %v404_v57 }
 0x108   : > { %vm3401_vm2 = vcmp.eq.f32.partialorder %v1330_v40, 8.507059e+37  ;;  %v1349_v22 = vadd.f32 1.1283791, %v1348_v58  ;;  %2681 = vrcp.f32 %v3392_v19  ;;  %v758_v17 = vadd.f32 %v757_v5, %v645_v63  ;;  %vm1328_vm3 = vmor %vm1326_vm0, %vm1327_vm1  ;;  %v409_v58 = vld [vmem:[%s2993_s22 + $0x390] sm:$0xff] }
 0x109   : > { %v1325_v25 = vadd.f32 %v2680_v33, %v1324_v49  ;;  %v1370_v26 = vand.u32 2147483647, %v3392_v19  ;;  %v1398_v36 = vadd.f32 0.4994258, %v1397_v6  ;;  %v1421_v52 = vadd.f32 0.00028619796, %v1420_v7 }
 0x10a   : > { %v1333_v16 = vor.u32 1.1754944e-38, %v1332_v35  ;;  %v1372_v29 = vand.u32 2147483648, %v3392_v19  ;;  %v1432_v34 = vadd.f32 0.001143296, %v1431_v62  ;;  %v3414_v37 = vmul.f32 0.70710677, %v3397_v20  ;;  %v760_v35 = vpop.f32.mrf.mxu2 }
 0x10b   : > { %v1329_v27 = vsel %vm1328_vm3, %v2680_v33, %v1325_v25  ;;  %v1388_v38 = vmul.f32 %v1387_v13, %v3335_v54  ;;  %v1399_v40 = vmul.f32 %v1398_v36, %v3335_v54  ;;  %v1422_v41 = vmul.f32 %v1421_v52, %v3385_v0  ;;  %v534_v54 = vpop.f32.mrf.mxu0 }
 0x10c   : > { %v1334_v28 = vsel %vm3401_vm2, %v1333_v16, %v1329_v27  ;;  %v1433_v8 = vmul.f32 %v1432_v34, %v3385_v0  ;;  %v1458_v42 = vmul.f32 %v3414_v37, %v3414_v37  ;;  %v871_v15 = vadd.f32 %v870_v53, %v758_v17  ;;  %v873_v25 = vpop.f32.mrf.mxu3 }
 0x10d   : > { %v1335_v44 = vmul.f32 %v1334_v28, %v1310_v3  ;;  %v3425_v32 = vmul.f32 0.5, %v3302_v9  ;;  %v3427_v12 = vadd.f32 1.0, %v1399_v40  ;;  %v1423_v11 = vadd.f32 0.0036580483, %v1422_v41  ;;  %813 = vmatmul.f32.gmra.mxu2 %v409_v58 }
 0x10e   : > { %v2682_v48 = vpop.eup %2681  ;;  %v1350_v50 = vmul.f32 %v1349_v22, %v3287_v60  ;;  %vm1366_vm4 = vweird.f32 %v3392_v19  ;;  %v1434_v33 = vadd.f32 0.014752088, %v1433_v8  ;;  %v3431_v55 = vmin.f32 %v1458_v42, 16.0  ;;  %926 = vmatmul.f32.gmra.mxu3 %v410_v51  ;;  %v407_v22 = vld [vmem:[%s2993_s22 + $0x380] sm:$0xff]  ;;  %v413_v42 = vld [vmem:[%s2993_s22 + $0x3b0] sm:$0xff] }
 0x10f   : > { %v2615_v56 = vclamps-f32 %v1335_v44, 1.0  ;;  %v1362_v61 = vmul.f32 %v2682_v48, %v3392_v19  ;;  %vm3434_vm5 = vcmp.eq.f32.partialorder %v1370_v26, 8.507059e+37  ;;  %2683 = vrcp.f32 %v3427_v12  ;;  %587 = vmatmul.f32.gmra.mxu0 %v407_v22  ;;  %v650_v19 = vpop.f32.mrf.mxu1 }
 0x110   : > { %v1373_v59 = vor.u32 1.1754944e-38, %v1372_v29  ;;  %v1389_v43 = vadd.f32 1.1283791, %v1388_v38  ;;  %v1424_v18 = vmul.f32 %v1423_v11, %v3385_v0  ;;  %v3441_v60 = vadd.f32 %v3084_v10, %v871_v15 }
 0x111   : > { %v2422_v63 = vadd.f32 1.0, %v2615_v56  ;;  %v1363_v30 = vsub.f32 1.0, %v1362_v61  ;;  %v1435_v39 = vmul.f32 %v1434_v33, %v3385_v0  ;;  %v1460_v2 = vmul.f32 2.1237322e-06, %v3431_v55  ;;  %v414_v56 = vld [vmem:[%s2993_s22 + $0x3b8] sm:$0xff] }
 0x112   : > { %vm1367_vm6 = vweird.f32 %v2682_v48  ;;  %v1425_v1 = vadd.f32 0.05243302, %v1424_v18  ;;  %v1471_v3 = vmul.f32 3.8918573e-05, %v3431_v55  ;;  %v648_v4 = vadd.f32 %v647_v45, %v534_v54 }
 0x113   : > { %v2454_v10 = vmul.f32 %v2422_v63, %v3365_v31  ;;  %v1364_v5 = vmul.f32 %v2682_v48, %v1363_v30  ;;  %v1436_v6 = vadd.f32 0.112945676, %v1435_v39  ;;  %v1461_v7 = vadd.f32 0.00028619796, %v1460_v2  ;;  %vm1368_vm8 = vmor %vm1366_vm4, %vm1367_vm6  ;;  %v537_v38 = vpop.f32.mrf.mxu0  ;;  %v763_v30 = vpop.f32.mrf.mxu2  ;;  %v411_v39 = vld [vmem:[%s2993_s22 + $0x3a0] sm:$0xff]  ;;  %v412_v2 = vld [vmem:[%s2993_s22 + $0x3a8] sm:$0xff] }
 0x114   : > { %v3450_v49 = vmul.f32 %v1389_v43, %v3314_v21  ;;  %v1426_v13 = vmul.f32 %v1425_v1, %v3385_v0  ;;  %v1472_v62 = vadd.f32 0.001143296, %v1471_v3  ;;  %v3454_v14 = vmul.f32 0.70710677, %v3441_v60  ;;  %v408_v21 = vld [vmem:[%s2993_s22 + $0x388] sm:$0xff]  ;;  %v876_v51 = vpop.f32.mrf.mxu3 }
 0x115   : > { %v2684_v17 = vpop.eup %2683  ;;  %2486 = vst [vmem:[%s3255_s17 + $0x20] sm:$0xff] %v2454_v10  ;;  %v1365_v23 = vadd.f32 %v2682_v48, %v1364_v5  ;;  %vm1406_vm7 = vweird.f32 %v3427_v12  ;;  %v1437_v31 = vmul.f32 %v1436_v6, %v3385_v0  ;;  %v1462_v57 = vmul.f32 %v1461_v7, %v3431_v55  ;;  %700 = vmatmul.f32.gmra.mxu1 %v408_v21 }
 0x116   : > { %v1402_v26 = vmul.f32 %v2684_v17, %v3427_v12  ;;  %v1412_v36 = vand.u32 2147483648, %v3427_v12  ;;  %v1473_v52 = vmul.f32 %v1472_v62, %v3431_v55  ;;  %v761_v53 = vadd.f32 %v760_v35, %v648_v4  ;;  %816 = vmatmul.f32.gmra.mxu2 %v413_v42  ;;  %929 = vmatmul.f32.gmra.mxu3 %v414_v56 }
 0x117   : > { %v1369_v16 = vsel %vm1368_vm8, %v2682_v48, %v1365_v23  ;;  %v1438_v29 = vadd.f32 0.4994258, %v1437_v31  ;;  %v1463_v34 = vadd.f32 0.0036580483, %v1462_v57  ;;  %v1498_v27 = vmul.f32 %v3454_v14, %v3454_v14  ;;  %590 = vmatmul.f32.gmra.mxu0 %v411_v39 }
 0x118   : > { %v1374_v40 = vsel %vm3434_vm5, %v1373_v59, %v1369_v16  ;;  %v1403_v41 = vsub.f32 1.0, %v1402_v26  ;;  %v1427_v28 = vadd.f32 0.18741608, %v1426_v13  ;;  %v1474_v8 = vadd.f32 0.014752088, %v1473_v52 }
 0x119   : > { %v1375_v15 = vmul.f32 %v1374_v40, %v1350_v50  ;;  %v1439_v44 = vmul.f32 %v1438_v29, %v3385_v0  ;;  %v1464_v11 = vmul.f32 %v1463_v34, %v3431_v55  ;;  %v3475_v54 = vmin.f32 %v1498_v27, 16.0 }
 0x11a   : > { %v1404_v45 = vmul.f32 %v2684_v17, %v1403_v41  ;;  %vm1407_vm9 = vweird.f32 %v2684_v17  ;;  %v1410_v48 = vand.u32 2147483647, %v3427_v12  ;;  %v1475_v33 = vmul.f32 %v1474_v8, %v3431_v55 }
 0x11b   : > { %v2616_v61 = vclamps-f32 %v1375_v15, 1.0  ;;  %v3480_v9 = vadd.f32 1.0, %v1439_v44  ;;  %v1465_v50 = vadd.f32 0.05243302, %v1464_v11  ;;  %v1500_v59 = vmul.f32 2.1237322e-06, %v3475_v54  ;;  %vm1408_vm10 = vmor %vm1406_vm7, %vm1407_vm9  ;;  %v766_v11 = vpop.f32.mrf.mxu2 }
 0x11c   : > { %v1405_v43 = vadd.f32 %v2684_v17, %v1404_v45  ;;  %v1413_v18 = vor.u32 1.1754944e-38, %v1412_v36  ;;  %v1428_v58 = vmul.f32 %v1427_v28, %v3385_v0  ;;  %v1476_v63 = vadd.f32 0.112945676, %v1475_v33  ;;  %v417_v45 = vld [vmem:[%s2993_s22 + $0x3d0] sm:$0xff] }
 0x11d   : > { %v2423_v1 = vadd.f32 1.0, %v2616_v61  ;;  %2685 = vrcp.f32 %v3480_v9  ;;  %v1511_v3 = vmul.f32 3.8918573e-05, %v3475_v54  ;;  %v874_v4 = vadd.f32 %v873_v25, %v761_v53  ;;  %703 = vmatmul.f32.gmra.mxu1 %v412_v2 }
 0x11e   : > { %v1409_v35 = vsel %vm1408_vm10, %v2684_v17, %v1405_v43  ;;  %vm1411_vm11 = vcmp.eq.f32.partialorder %v1410_v48, 8.507059e+37  ;;  %v1466_v0 = vmul.f32 %v1465_v50, %v3431_v55  ;;  %v1477_v10 = vmul.f32 %v1476_v63, %v3431_v55  ;;  %819 = vmatmul.f32.gmra.mxu2 %v417_v45 }
 0x11f   : > { %v2455_v5 = vmul.f32 %v2423_v1, %v3376_v46  ;;  %v1414_v6 = vsel %vm1411_vm11, %v1413_v18, %v1409_v35  ;;  %v3495_v12 = vmul.f32 0.5, %v3357_v24  ;;  %v1501_v7 = vadd.f32 0.00028619796, %v1500_v59  ;;  %v3509_v24 = vld [vmem:[%s4362_s2] ss:$0 sm:$0xff] }
 0x120   : > { %v1415_v13 = vmul.f32 %v1414_v6, %v3450_v49  ;;  %v3499_v62 = vmul.f32 0.5, %v3397_v20  ;;  %v1467_v22 = vadd.f32 0.18741608, %v1466_v0  ;;  %v1478_v17 = vadd.f32 0.4994258, %v1477_v10  ;;  %v540_v49 = vpop.f32.mrf.mxu0  ;;  %v653_v20 = vpop.f32.mrf.mxu1  ;;  %v415_v1 = vld [vmem:[%s2993_s22 + $0x3c0] sm:$0xff] }
 0x121   : > { %2487 = vst [vmem:[%s3255_s17 + $0x28] sm:$0xff] %v2455_v5  ;;  %v3503_v23 = vmul.f32 0.5, %v3441_v60  ;;  %v1502_v31 = vmul.f32 %v1501_v7, %v3475_v54  ;;  %v1512_v46 = vadd.f32 0.001143296, %v1511_v3  ;;  %v3512_v57 = vadd.f32 %v3509_v24, %v874_v4  ;;  %v416_v3 = vld [vmem:[%s2993_s22 + $0x3c8] sm:$0xff]  ;;  %593 = vmatmul.f32.gmra.mxu0 %v415_v1 }
 0x122   : > { %v2617_v25 = vclamps-f32 %v1415_v13, 1.0  ;;  %v1429_v21 = vadd.f32 1.1283791, %v1428_v58  ;;  %v1479_v26 = vmul.f32 %v1478_v17, %v3431_v55  ;;  %v651_v36 = vadd.f32 %v650_v19, %v537_v38  ;;  %v879_v58 = vpop.f32.mrf.mxu3 }
 0x123   : > { %v2686_v60 = vpop.eup %2685  ;;  %v1468_v52 = vmul.f32 %v1467_v22, %v3431_v55  ;;  %v1503_v53 = vadd.f32 0.0036580483, %v1502_v31  ;;  %v1513_v16 = vmul.f32 %v1512_v46, %v3475_v54  ;;  %v3518_v29 = vmul.f32 0.70710677, %v3512_v57 }
 0x124   : > { %v2424_v34 = vadd.f32 1.0, %v2617_v25  ;;  %v1442_v27 = vmul.f32 %v2686_v60, %v3480_v9  ;;  %v1450_v40 = vand.u32 2147483647, %v3480_v9  ;;  %v654_v41 = vadd.f32 %v653_v20, %v540_v49 }
 0x125   : > { %v3522_v28 = vadd.f32 1.0, %v1479_v26  ;;  %v1504_v38 = vmul.f32 %v1503_v53, %v3475_v54  ;;  %v1514_v19 = vadd.f32 0.014752088, %v1513_v16  ;;  %v1538_v55 = vmul.f32 %v3518_v29, %v3518_v29  ;;  %706 = vmatmul.f32.gmra.mxu1 %v416_v3 }
 0x126   : > { %v2456_v8 = vmul.f32 %v2424_v34, %v3425_v32  ;;  %v1430_v42 = vmul.f32 %v1429_v21, %v3373_v47  ;;  %v1443_v15 = vsub.f32 1.0, %v1442_v27  ;;  %v764_v44 = vadd.f32 %v763_v30, %v651_v36  ;;  %v418_v47 = vld [vmem:[%s2993_s22 + $0x3d8] sm:$0xff] }
 0x127   : > { %vm1447_vm12 = vweird.f32 %v2686_v60  ;;  %v1452_v48 = vand.u32 2147483648, %v3480_v9  ;;  %v1469_v33 = vadd.f32 1.1283791, %v1468_v52  ;;  %2687 = vrcp.f32 %v3522_v28  ;;  %932 = vmatmul.f32.gmra.mxu3 %v418_v47 }
 0x128   : > { %2488 = vst [vmem:[%s3255_s17 + $0x30] sm:$0xff] %v2456_v8  ;;  %v1444_v56 = vmul.f32 %v2686_v60, %v1443_v15  ;;  %v1505_v61 = vadd.f32 0.05243302, %v1504_v38  ;;  %v1515_v32 = vmul.f32 %v1514_v19, %v3475_v54  ;;  %v3534_v50 = vmin.f32 %v1538_v55, 16.0  ;;  %v656_v38 = vpop.f32.mrf.mxu1  ;;  %v421_v19 = vld [vmem:[%s2993_s22 + $0x3f0] sm:$0xff] }
 0x129   : > { %vm1446_vm13 = vweird.f32 %v3480_v9  ;;  %vm3538_vm14 = vcmp.eq.f32.partialorder %v1450_v40, 8.507059e+37  ;;  %v877_v43 = vadd.f32 %v876_v51, %v764_v44  ;;  %v767_v18 = vadd.f32 %v766_v11, %v654_v41  ;;  %v543_v41 = vpop.f32.mrf.mxu0  ;;  %822 = vmatmul.f32.gmra.mxu2 %v421_v19 }
 0x12a   : > { %v1445_v63 = vadd.f32 %v2686_v60, %v1444_v56  ;;  %v1506_v30 = vmul.f32 %v1505_v61, %v3475_v54  ;;  %v1516_v39 = vadd.f32 0.112945676, %v1515_v32  ;;  %v1540_v2 = vmul.f32 2.1237322e-06, %v3534_v50  ;;  %vm1448_vm15 = vmor %vm1446_vm13, %vm1447_vm12 }
 0x12b   : > { %v1453_v4 = vor.u32 1.1754944e-38, %v1452_v48  ;;  %v3548_v9 = vmul.f32 %v1469_v33, %v3414_v37  ;;  %v1551_v35 = vmul.f32 3.8918573e-05, %v3534_v50  ;;  %v3552_v0 = vadd.f32 %v3509_v24, %v877_v43  ;;  %v422_v48 = vld [vmem:[%s2993_s22 + $0x3f8] sm:$0xff]  ;;  %v419_v43 = vld [vmem:[%s2993_s22 + $0x3e0] sm:$0xff] }
 0x12c   : > { %v1449_v10 = vsel %vm1448_vm15, %v2686_v60, %v1445_v63  ;;  %v1517_v5 = vmul.f32 %v1516_v39, %v3475_v54  ;;  %v1541_v6 = vadd.f32 0.00028619796, %v1540_v2  ;;  %v880_v7 = vadd.f32 %v879_v58, %v767_v18  ;;  %596 = vmatmul.f32.gmra.mxu0 %v419_v43 }
 0x12d   : > { %v2688_v51 = vpop.eup %2687  ;;  %v1454_v13 = vsel %vm3538_vm14, %v1453_v4, %v1449_v10  ;;  %vm1486_vm0 = vweird.f32 %v3522_v28  ;;  %v1552_v37 = vadd.f32 0.001143296, %v1551_v35  ;;  %v3559_v22 = vmul.f32 0.70710677, %v3552_v0 }
 0x12e   : > { %v1455_v17 = vmul.f32 %v1454_v13, %v1430_v42  ;;  %v1482_v31 = vmul.f32 %v2688_v51, %v3522_v28  ;;  %v1490_v46 = vand.u32 2147483647, %v3522_v28  ;;  %v1507_v49 = vadd.f32 0.18741608, %v1506_v30  ;;  %v769_v30 = vpop.f32.mrf.mxu2 }
 0x12f   : > { %v1518_v20 = vadd.f32 0.4994258, %v1517_v5  ;;  %v1542_v25 = vmul.f32 %v1541_v6, %v3534_v50  ;;  %v1553_v21 = vmul.f32 %v1552_v37, %v3534_v50  ;;  %v1578_v26 = vmul.f32 %v3559_v22, %v3559_v22  ;;  %935 = vmatmul.f32.gmra.mxu3 %v422_v48  ;;  %v882_v37 = vpop.f32.mrf.mxu3 }
 0x130   : > { %v2618_v36 = vclamps-f32 %v1455_v17, 1.0  ;;  %v1483_v60 = vsub.f32 1.0, %v1482_v31  ;;  %v1492_v52 = vand.u32 2147483648, %v3522_v28  ;;  %v3569_v53 = vadd.f32 %v3509_v24, %v880_v7 }
 0x131   : > { %v1519_v16 = vmul.f32 %v1518_v20, %v3475_v54  ;;  %v1543_v34 = vadd.f32 0.0036580483, %v1542_v25  ;;  %v1554_v27 = vadd.f32 0.014752088, %v1553_v21  ;;  %v3572_v40 = vmin.f32 %v1578_v26, 16.0  ;;  %v546_v26 = vpop.f32.mrf.mxu0 }
 0x132   : > { %v2425_v55 = vadd.f32 1.0, %v2618_v36  ;;  %v1484_v8 = vmul.f32 %v2688_v51, %v1483_v60  ;;  %vm1487_vm1 = vweird.f32 %v2688_v51  ;;  %v1508_v42 = vmul.f32 %v1507_v49, %v3475_v54  ;;  %v659_v36 = vpop.f32.mrf.mxu1 }
 0x133   : > { %v3576_v15 = vadd.f32 1.0, %v1519_v16  ;;  %v1544_v44 = vmul.f32 %v1543_v34, %v3534_v50  ;;  %v1555_v11 = vmul.f32 %v1554_v27, %v3534_v50  ;;  %v1580_v45 = vmul.f32 2.1237322e-06, %v3572_v40  ;;  %vm3589_vm2 = vmor %vm1486_vm0, %vm1487_vm1 }
 0x134   : > { %v2457_v33 = vmul.f32 %v2425_v55, %v3495_v12  ;;  %v1485_v56 = vadd.f32 %v2688_v51, %v1484_v8  ;;  %v1591_v61 = vmul.f32 3.8918573e-05, %v3572_v40  ;;  %v3585_v54 = vmul.f32 0.70710677, %v3569_v53  ;;  %v420_v12 = vld [vmem:[%s2993_s22 + $0x3e8] sm:$0xff] }
 0x135   : > { %vm1491_vm3 = vcmp.eq.f32.partialorder %v1490_v46, 8.507059e+37  ;;  %v1493_v47 = vor.u32 1.1754944e-38, %v1492_v52  ;;  %2689 = vrcp.f32 %v3576_v15  ;;  %v657_v59 = vadd.f32 %v656_v38, %v543_v41  ;;  %709 = vmatmul.f32.gmra.mxu1 %v420_v12 }
 0x136   : > { %2489 = vst [vmem:[%s3255_s17 + $0x38] sm:$0xff] %v2457_v33  ;;  %v1489_v18 = vsel %vm3589_vm2, %v2688_v51, %v1485_v56  ;;  %v1545_v58 = vadd.f32 0.05243302, %v1544_v44  ;;  %v1556_v63 = vadd.f32 0.112945676, %v1555_v11  ;;  %v1618_v28 = vmul.f32 %v3585_v54, %v3585_v54  ;;  %v772_v32 = vpop.f32.mrf.mxu2 }
 0x137   : > { %v1494_v39 = vsel %vm1491_vm3, %v1493_v47, %v1489_v18  ;;  %v1509_v2 = vadd.f32 1.1283791, %v1508_v42  ;;  %v1530_v1 = vand.u32 2147483647, %v3576_v15  ;;  %v1581_v3 = vadd.f32 0.00028619796, %v1580_v45 }
 0x138   : > { %v1495_v4 = vmul.f32 %v1494_v39, %v3548_v9  ;;  %v1546_v35 = vmul.f32 %v1545_v58, %v3534_v50  ;;  %v1557_v10 = vmul.f32 %v1556_v63, %v3534_v50  ;;  %v1592_v5 = vadd.f32 0.001143296, %v1591_v61 }
 0x139   : > { %v1532_v6 = vand.u32 2147483648, %v3576_v15  ;;  %v1582_v7 = vmul.f32 %v1581_v3, %v3572_v40  ;;  %v3607_v51 = vmin.f32 %v1618_v28, 16.0  ;;  %v770_v13 = vadd.f32 %v769_v30, %v657_v59 }
 0x13a   : > { %v2619_v17 = vclamps-f32 %v1495_v4, 1.0  ;;  %v1547_v31 = vadd.f32 0.18741608, %v1546_v35  ;;  %v1558_v46 = vadd.f32 0.4994258, %v1557_v10  ;;  %v1593_v49 = vmul.f32 %v1592_v5, %v3572_v40  ;;  %v662_v5 = vpop.f32.mrf.mxu1 }
 0x13b   : > { %v2690_v20 = vpop.eup %2689  ;;  %v1583_v9 = vadd.f32 0.0036580483, %v1582_v7  ;;  %v1620_v25 = vmul.f32 2.1237322e-06, %v3607_v51  ;;  %v1631_v21 = vmul.f32 3.8918573e-05, %v3607_v51  ;;  %v883_v34 = vadd.f32 %v882_v37, %v770_v13 }
 0x13c   : > { %v2426_v60 = vadd.f32 1.0, %v2619_v17  ;;  %v1522_v52 = vmul.f32 %v2690_v20, %v3576_v15  ;;  %v1548_v16 = vmul.f32 %v1547_v31, %v3534_v50  ;;  %v1559_v27 = vmul.f32 %v1558_v46, %v3534_v50 }
 0x13d   : > { %v1584_v41 = vmul.f32 %v1583_v9, %v3572_v40  ;;  %v1594_v38 = vadd.f32 0.014752088, %v1593_v49  ;;  %v1621_v19 = vadd.f32 0.00028619796, %v1620_v25  ;;  %v1632_v44 = vadd.f32 0.001143296, %v1631_v21 }
 0x13e   : > { %v2458_v55 = vmul.f32 %v2426_v60, %v3499_v62  ;;  %v1523_v8 = vsub.f32 1.0, %v1522_v52  ;;  %v1549_v42 = vadd.f32 1.1283791, %v1548_v16  ;;  %v3617_v11 = vadd.f32 1.0, %v1559_v27 }
 0x13f   : > { %v1585_v45 = vadd.f32 0.05243302, %v1584_v41  ;;  %v1595_v48 = vmul.f32 %v1594_v38, %v3572_v40  ;;  %v1622_v33 = vmul.f32 %v1621_v19, %v3607_v51  ;;  %v1510_v56 = vmul.f32 %v1509_v2, %v3454_v14  ;;  %v885_v2 = vpop.f32.mrf.mxu3  ;;  %v775_v41 = vpop.f32.mrf.mxu2 }
 0x140   : > { %2490 = vst [vmem:[%s3255_s17 + $0x40] sm:$0xff] %v2458_v55  ;;  %v1524_v50 = vmul.f32 %v2690_v20, %v1523_v8  ;;  %vm1527_vm4 = vweird.f32 %v2690_v20  ;;  %v1633_v61 = vmul.f32 %v1632_v44, %v3607_v51  ;;  %vm1526_vm5 = vweird.f32 %v3576_v15 }
 0x141   : > { %2691 = vrcp.f32 %v3617_v11  ;;  %v3627_v62 = vadd.f32 %v3509_v24, %v883_v34  ;;  %v660_v47 = vadd.f32 %v659_v36, %v546_v26  ;;  %v1586_v43 = vmul.f32 %v1585_v45, %v3572_v40  ;;  %vm1528_vm6 = vmor %vm1526_vm5, %vm1527_vm4 }
 0x142   : > { %v1525_v59 = vadd.f32 %v2690_v20, %v1524_v50  ;;  %v1596_v12 = vadd.f32 0.112945676, %v1595_v48  ;;  %v1623_v18 = vadd.f32 0.0036580483, %v1622_v33  ;;  %vm1531_vm7 = vcmp.eq.f32.partialorder %v1530_v1, 8.507059e+37  ;;  %v549_v1 = vpop.f32.mrf.mxu0 }
 0x143   : > { %v1533_v14 = vor.u32 1.1754944e-38, %v1532_v6  ;;  %v3631_v58 = vmul.f32 %v1549_v42, %v3518_v29  ;;  %v1634_v63 = vadd.f32 0.014752088, %v1633_v61  ;;  %v1587_v15 = vadd.f32 0.18741608, %v1586_v43 }
 0x144   : > { %v1529_v28 = vsel %vm1528_vm6, %v2690_v20, %v1525_v59  ;;  %v1597_v30 = vmul.f32 %v1596_v12, %v3572_v40  ;;  %v1624_v39 = vmul.f32 %v1623_v18, %v3607_v51  ;;  %v3637_v35 = vmul.f32 0.70710677, %v3627_v62 }
 0x145   : > { %v1534_v3 = vsel %vm1531_vm7, %v1533_v14, %v1529_v28  ;;  %v1635_v4 = vmul.f32 %v1634_v63, %v3607_v51  ;;  %v773_v10 = vadd.f32 %v772_v32, %v660_v47  ;;  %v1570_v29 = vand.u32 2147483647, %v3617_v11  ;;  %v665_v14 = vpop.f32.mrf.mxu1 }
 0x146   : > { %v1535_v6 = vmul.f32 %v1534_v3, %v1510_v56  ;;  %v1598_v7 = vadd.f32 0.4994258, %v1597_v30  ;;  %v1625_v13 = vadd.f32 0.05243302, %v1624_v39  ;;  %vm1566_vm8 = vweird.f32 %v3617_v11 }
 0x147   : > { %v2692_v37 = vpop.eup %2691  ;;  %v1588_v17 = vmul.f32 %v1587_v15, %v3572_v40  ;;  %v1636_v31 = vadd.f32 0.112945676, %v1635_v4  ;;  %v1658_v46 = vmul.f32 %v3637_v35, %v3637_v35  ;;  %v886_v9 = vadd.f32 %v885_v2, %v773_v10 }
 0x148   : > { %v2620_v49 = vclamps-f32 %v1535_v6, 1.0  ;;  %v1562_v20 = vmul.f32 %v2692_v37, %v3617_v11  ;;  %v663_v25 = vadd.f32 %v662_v5, %v549_v1  ;;  %v1599_v21 = vmul.f32 %v1598_v7, %v3572_v40 }
 0x149   : > { %v1626_v26 = vmul.f32 %v1625_v13, %v3607_v51  ;;  %v1637_v36 = vmul.f32 %v1636_v31, %v3607_v51  ;;  %v3648_v60 = vmin.f32 %v1658_v46, 16.0  ;;  %vm3650_vm9 = vcmp.eq.f32.partialorder %v1570_v29, 8.507059e+37 }
 0x14a   : > { %v2427_v52 = vadd.f32 1.0, %v2620_v49  ;;  %v1563_v16 = vsub.f32 1.0, %v1562_v20  ;;  %v1572_v27 = vand.u32 2147483648, %v3617_v11  ;;  %vm1567_vm10 = vweird.f32 %v2692_v37  ;;  %v552_v18 = vpop.f32.mrf.mxu0 }
 0x14b   : > { %v3655_v38 = vadd.f32 1.0, %v1599_v21  ;;  %v1627_v40 = vadd.f32 0.18741608, %v1626_v26  ;;  %v1638_v19 = vadd.f32 0.4994258, %v1637_v36  ;;  %v3662_v48 = vadd.f32 %v3509_v24, %v886_v9  ;;  %vm1568_vm11 = vmor %vm1566_vm8, %vm1567_vm10 }
 0x14c   : > { %v2459_v55 = vmul.f32 %v2427_v52, %v3503_v23  ;;  %v1564_v8 = vmul.f32 %v2692_v37, %v1563_v16  ;;  %v1660_v42 = vmul.f32 2.1237322e-06, %v3648_v60  ;;  %v1671_v44 = vmul.f32 3.8918573e-05, %v3648_v60  ;;  %v888_v23 = vpop.f32.mrf.mxu3 }
 0x14d   : > { %v1589_v45 = vadd.f32 1.1283791, %v1588_v17  ;;  %2693 = vrcp.f32 %v3655_v38  ;;  %v776_v33 = vadd.f32 %v775_v41, %v663_v25  ;;  %v1628_v50 = vmul.f32 %v1627_v40, %v3607_v51 }
 0x14e   : > { %2491 = vst [vmem:[%s3255_s17 + $0x48] sm:$0xff] %v2459_v55  ;;  %v1565_v56 = vadd.f32 %v2692_v37, %v1564_v8  ;;  %v1639_v61 = vmul.f32 %v1638_v19, %v3607_v51  ;;  %v1661_v32 = vadd.f32 0.00028619796, %v1660_v42  ;;  %v1573_v47 = vor.u32 1.1754944e-38, %v1572_v27 }
 0x14f   : > { %v1610_v59 = vand.u32 2147483647, %v3655_v38  ;;  %v1612_v43 = vand.u32 2147483648, %v3655_v38  ;;  %v1672_v12 = vadd.f32 0.001143296, %v1671_v44  ;;  %v1084_v30 = vmul.f32 0.5, %v3512_v57  ;;  %v668_v44 = vpop.f32.mrf.mxu1 }
 0x150   : > { %v1569_v63 = vsel %vm1568_vm11, %v2692_v37, %v1565_v56  ;;  %v1629_v28 = vadd.f32 1.1283791, %v1628_v50  ;;  %v3672_v15 = vadd.f32 1.0, %v1639_v61  ;;  %v1662_v51 = vmul.f32 %v1661_v32, %v3648_v60  ;;  %v778_v37 = vpop.f32.mrf.mxu2 }
 0x151   : > { %v1574_v11 = vsel %vm3650_vm9, %v1573_v47, %v1569_v63  ;;  %v1673_v39 = vmul.f32 %v1672_v12, %v3648_v60  ;;  %v3680_v2 = vmul.f32 0.70710677, %v3662_v48  ;;  %v1590_v4 = vmul.f32 %v1589_v45, %v3559_v22 }
 0x152   : > { %v1575_v3 = vmul.f32 %v1574_v11, %v3631_v58  ;;  %2695 = vrcp.f32 %v3672_v15  ;;  %v889_v10 = vadd.f32 %v888_v23, %v776_v33  ;;  %vm1606_vm12 = vweird.f32 %v3655_v38  ;;  %v3714_v42 = vpop.f32.mrf.mxu0 }
 0x153   : > { %v2694_v1 = vpop.eup %2693  ;;  %v1613_v5 = vor.u32 1.1754944e-38, %v1612_v43  ;;  %v1663_v57 = vadd.f32 0.0036580483, %v1662_v51  ;;  %v1698_v6 = vmul.f32 %v3680_v2, %v3680_v2  ;;  %vm3689_vm13 = vcmp.eq.f32.partialorder %v1610_v59, 8.507059e+37 }
 0x154   : > { %v2621_v29 = vclamps-f32 %v1575_v3, 1.0  ;;  %v1602_v7 = vmul.f32 %v2694_v1, %v3655_v38  ;;  %v3694_v22 = vmul.f32 %v1629_v28, %v3585_v54  ;;  %v1674_v58 = vadd.f32 0.014752088, %v1673_v39  ;;  %v891_v41 = vpop.f32.mrf.mxu3 }
 0x155   : > { %v1650_v17 = vand.u32 2147483647, %v3672_v15  ;;  %v1652_v31 = vand.u32 2147483648, %v3672_v15  ;;  %v1664_v46 = vmul.f32 %v1663_v57, %v3648_v60  ;;  %v3699_v49 = vmin.f32 %v1698_v6, 16.0 }
 0x156   : > { %v2428_v20 = vadd.f32 1.0, %v2621_v29  ;;  %v1603_v9 = vsub.f32 1.0, %v1602_v7  ;;  %v1675_v25 = vmul.f32 %v1674_v58, %v3648_v60  ;;  %v3703_v21 = vadd.f32 %v3509_v24, %v889_v10 }
 0x157   : > { %vm1646_vm14 = vweird.f32 %v3672_v15  ;;  %v1665_v54 = vadd.f32 0.05243302, %v1664_v46  ;;  %v1700_v26 = vmul.f32 2.1237322e-06, %v3699_v49  ;;  %v1711_v36 = vmul.f32 3.8918573e-05, %v3699_v49 }
 0x158   : > { %v2696_v52 = vpop.eup %2695  ;;  %v2460_v16 = vmul.f32 %v2428_v20, %v1084_v30  ;;  %v1604_v34 = vmul.f32 %v2694_v1, %v1603_v9  ;;  %vm1607_vm15 = vweird.f32 %v2694_v1  ;;  %v1676_v27 = vadd.f32 0.112945676, %v1675_v25 }
 0x159   : > { %v1642_v40 = vmul.f32 %v2696_v52, %v3672_v15  ;;  %vm3709_vm0 = vcmp.eq.f32.partialorder %v1650_v17, 8.507059e+37  ;;  %v1666_v55 = vmul.f32 %v1665_v54, %v3648_v60  ;;  %v1701_v8 = vadd.f32 0.00028619796, %v1700_v26  ;;  %vm1608_vm1 = vmor %vm1606_vm12, %vm1607_vm15 }
 0x15a   : > { %2492 = vst [vmem:[%s3255_s17 + $0x50] sm:$0xff] %v2460_v16  ;;  %v1605_v45 = vadd.f32 %v2694_v1, %v1604_v34  ;;  %v1677_v33 = vmul.f32 %v1676_v27, %v3648_v60  ;;  %v1712_v56 = vadd.f32 0.001143296, %v1711_v36  ;;  %v3719_v50 = vmul.f32 0.70710677, %v3703_v21  ;;  %v558_v54 = vpop.f32.mrf.mxu0 }
 0x15b   : > { %v1643_v61 = vsub.f32 1.0, %v1642_v40  ;;  %vm1647_vm2 = vweird.f32 %v2696_v52  ;;  %v1702_v32 = vmul.f32 %v1701_v8, %v3699_v49  ;;  %v666_v23 = vadd.f32 %v665_v14, %v552_v18  ;;  %v781_v18 = vpop.f32.mrf.mxu2 }
 0x15c   : > { %v1609_v47 = vsel %vm1608_vm1, %v2694_v1, %v1605_v45  ;;  %v1678_v59 = vadd.f32 0.4994258, %v1677_v33  ;;  %v1713_v43 = vmul.f32 %v1712_v56, %v3699_v49  ;;  %v1738_v12 = vmul.f32 %v3719_v50, %v3719_v50  ;;  %vm1648_vm3 = vmor %vm1646_vm14, %vm1647_vm2  ;;  %v894_v46 = vpop.f32.mrf.mxu3 }
 0x15d   : > { %v1614_v63 = vsel %vm3689_vm13, %v1613_v5, %v1609_v47  ;;  %v1644_v28 = vmul.f32 %v2696_v52, %v1643_v61  ;;  %v1667_v51 = vadd.f32 0.18741608, %v1666_v55  ;;  %v1703_v30 = vadd.f32 0.0036580483, %v1702_v32 }
 0x15e   : > { %v1615_v38 = vmul.f32 %v1614_v63, %v1590_v4  ;;  %v1679_v11 = vmul.f32 %v1678_v59, %v3648_v60  ;;  %v1714_v39 = vadd.f32 0.014752088, %v1713_v43  ;;  %v3730_v3 = vmin.f32 %v1738_v12, 16.0 }
 0x15f   : > { %v1645_v14 = vadd.f32 %v2696_v52, %v1644_v28  ;;  %v1653_v10 = vor.u32 1.1754944e-38, %v1652_v31  ;;  %v1704_v1 = vmul.f32 %v1703_v30, %v3699_v49  ;;  %v779_v57 = vadd.f32 %v778_v37, %v666_v23 }
 0x160   : > { %v2622_v6 = vclamps-f32 %v1615_v38, 1.0  ;;  %v3736_v5 = vadd.f32 1.0, %v1679_v11  ;;  %v1715_v4 = vmul.f32 %v1714_v39, %v3699_v49  ;;  %v1740_v29 = vmul.f32 2.1237322e-06, %v3730_v3 }
 0x161   : > { %v1649_v7 = vsel %vm1648_vm3, %v2696_v52, %v1645_v14  ;;  %v1668_v13 = vmul.f32 %v1667_v51, %v3648_v60  ;;  %v1705_v58 = vadd.f32 0.05243302, %v1704_v1  ;;  %v1751_v17 = vmul.f32 3.8918573e-05, %v3730_v3  ;;  %v671_v60 = vpop.f32.mrf.mxu1 }
 0x162   : > { %v1085_v31 = vmul.f32 0.5, %v3552_v0  ;;  %v2429_v37 = vadd.f32 1.0, %v2622_v6  ;;  %v1654_v15 = vsel %vm3709_vm0, %v1653_v10, %v1649_v7  ;;  %2697 = vrcp.f32 %v3736_v5 }
 0x163   : > { %v1655_v20 = vmul.f32 %v1654_v15, %v3694_v22  ;;  %v1706_v9 = vmul.f32 %v1705_v58, %v3699_v49  ;;  %v892_v25 = vadd.f32 %v891_v41, %v779_v57  ;;  %v1716_v36 = vadd.f32 0.112945676, %v1715_v4  ;;  %v561_v4 = vpop.f32.mrf.mxu0 }
 0x164   : > { %v2461_v26 = vmul.f32 %v2429_v37, %v1085_v31  ;;  %v1741_v52 = vadd.f32 0.00028619796, %v1740_v29  ;;  %v1752_v16 = vadd.f32 0.001143296, %v1751_v17  ;;  %v1086_v0 = vmul.f32 0.5, %v3569_v53  ;;  %v897_v10 = vpop.f32.mrf.mxu3 }
 0x165   : > { %v2623_v34 = vclamps-f32 %v1655_v20, 1.0  ;;  %v1669_v27 = vadd.f32 1.1283791, %v1668_v13  ;;  %v3751_v40 = vmul.f32 0.5, %v3627_v62  ;;  %v1717_v19 = vmul.f32 %v1716_v36, %v3699_v49  ;;  %v784_v62 = vpop.f32.mrf.mxu2 }
 0x166   : > { %2493 = vst [vmem:[%s3255_s17 + $0x58] sm:$0xff] %v2461_v26  ;;  %v1742_v22 = vmul.f32 %v1741_v52, %v3730_v3  ;;  %v1753_v41 = vmul.f32 %v1752_v16, %v3730_v3  ;;  %v1707_v8 = vadd.f32 0.18741608, %v1706_v9  ;;  %v3757_v45 = vadd.f32 %v3509_v24, %v892_v25 }
 0x167   : > { %v2430_v55 = vadd.f32 1.0, %v2623_v34  ;;  %v669_v53 = vadd.f32 %v668_v44, %v3714_v42  ;;  %v1718_v56 = vadd.f32 0.4994258, %v1717_v19  ;;  %v1670_v47 = vmul.f32 %v1669_v27, %v3637_v35 }
 0x168   : > { %v2698_v33 = vpop.eup %2697  ;;  %v1743_v61 = vadd.f32 0.0036580483, %v1742_v22  ;;  %v1754_v32 = vadd.f32 0.014752088, %v1753_v41  ;;  %v1690_v43 = vand.u32 2147483647, %v3736_v5  ;;  %v672_v51 = vadd.f32 %v671_v60, %v558_v54 }
 0x169   : > { %v2462_v23 = vmul.f32 %v2430_v55, %v1086_v0  ;;  %v1682_v59 = vmul.f32 %v2698_v33, %v3736_v5  ;;  %v1719_v12 = vmul.f32 %v1718_v56, %v3699_v49  ;;  %v1692_v44 = vand.u32 2147483648, %v3736_v5  ;;  %v674_v29 = vpop.f32.mrf.mxu1 }
 0x16a   : > { %v1744_v63 = vmul.f32 %v1743_v61, %v3730_v3  ;;  %v1755_v28 = vmul.f32 %v1754_v32, %v3730_v3  ;;  %v3769_v30 = vmul.f32 0.70710677, %v3757_v45  ;;  %v782_v38 = vadd.f32 %v781_v18, %v669_v53 }
 0x16b   : > { %2494 = vst [vmem:[%s3255_s17 + $0x60] sm:$0xff] %v2462_v23  ;;  %v1683_v42 = vsub.f32 1.0, %v1682_v59  ;;  %v1708_v35 = vmul.f32 %v1707_v8, %v3699_v49  ;;  %v3772_v11 = vadd.f32 1.0, %v1719_v12  ;;  %vm1687_vm4 = vweird.f32 %v2698_v33 }
 0x16c   : > { %v1745_v39 = vadd.f32 0.05243302, %v1744_v63  ;;  %v1756_v14 = vadd.f32 0.112945676, %v1755_v28  ;;  %v1778_v57 = vmul.f32 %v3769_v30, %v3769_v30  ;;  %v895_v6 = vadd.f32 %v894_v46, %v782_v38  ;;  %v900_v59 = vpop.f32.mrf.mxu3 }
 0x16d   : > { %v1684_v1 = vmul.f32 %v2698_v33, %v1683_v42  ;;  %vm1686_vm5 = vweird.f32 %v3736_v5  ;;  %vm3777_vm6 = vcmp.eq.f32.partialorder %v1690_v43, 8.507059e+37  ;;  %2699 = vrcp.f32 %v3772_v11  ;;  %v787_v52 = vpop.f32.mrf.mxu2 }
 0x16e   : > { %v785_v49 = vadd.f32 %v784_v62, %v672_v51  ;;  %v1746_v13 = vmul.f32 %v1745_v39, %v3730_v3  ;;  %v1757_v58 = vmul.f32 %v1756_v14, %v3730_v3  ;;  %v3784_v17 = vmin.f32 %v1778_v57, 16.0  ;;  %vm1688_vm7 = vmor %vm1686_vm5, %vm1687_vm4 }
 0x16f   : > { %v1685_v18 = vadd.f32 %v2698_v33, %v1684_v1  ;;  %v1693_v31 = vor.u32 1.1754944e-38, %v1692_v44  ;;  %v1709_v37 = vadd.f32 1.1283791, %v1708_v35  ;;  %v3787_v15 = vadd.f32 %v3509_v24, %v895_v6 }
 0x170   : > { %v675_v5 = vadd.f32 %v674_v29, %v561_v4  ;;  %v1747_v20 = vadd.f32 0.18741608, %v1746_v13  ;;  %v1758_v9 = vadd.f32 0.4994258, %v1757_v58  ;;  %v1780_v25 = vmul.f32 2.1237322e-06, %v3784_v17 }
 0x171   : > { %v1689_v46 = vsel %vm1688_vm7, %v2698_v33, %v1685_v18  ;;  %v3793_v60 = vmul.f32 0.5, %v3662_v48  ;;  %v1791_v26 = vmul.f32 3.8918573e-05, %v3784_v17  ;;  %v3797_v36 = vmul.f32 0.70710677, %v3787_v15 }
 0x172   : > { %v1694_v54 = vsel %vm3777_vm6, %v1693_v31, %v1689_v46  ;;  %v1759_v0 = vmul.f32 %v1758_v9, %v3730_v3  ;;  %v1781_v34 = vadd.f32 0.00028619796, %v1780_v25  ;;  %v898_v27 = vadd.f32 %v897_v10, %v785_v49 }
 0x173   : > { %v1695_v16 = vmul.f32 %v1694_v54, %v1670_v47  ;;  %v2700_v19 = vpop.eup %2699  ;;  %v1710_v22 = vmul.f32 %v1709_v37, %v3680_v2  ;;  %v1748_v41 = vmul.f32 %v1747_v20, %v3730_v3  ;;  %v1792_v55 = vadd.f32 0.001143296, %v1791_v26 }
 0x174   : > { %v1818_v48 = vmul.f32 %v3797_v36, %v3797_v36  ;;  %v1722_v53 = vmul.f32 %v2700_v19, %v3772_v11  ;;  %v1730_v33 = vand.u32 2147483647, %v3772_v11  ;;  %v788_v56 = vadd.f32 %v787_v52, %v675_v5 }
 0x175   : > { %v2624_v8 = vclamps-f32 %v1695_v16, 1.0  ;;  %v3806_v61 = vadd.f32 1.0, %v1759_v0  ;;  %v1782_v32 = vmul.f32 %v1781_v34, %v3784_v17  ;;  %v1793_v62 = vmul.f32 %v1792_v55, %v3784_v17 }
 0x176   : > { %v3810_v23 = vmin.f32 %v1818_v48, 16.0  ;;  %v1723_v3 = vsub.f32 1.0, %v1722_v53  ;;  %vm1726_vm8 = vweird.f32 %v3772_v11  ;;  %v3814_v47 = vadd.f32 %v3509_v24, %v898_v27  ;;  %v564_v53 = vpop.f32.mrf.mxu0 }
 0x177   : > { %v2431_v2 = vadd.f32 1.0, %v2624_v8  ;;  %vm1727_vm9 = vweird.f32 %v2700_v19  ;;  %v1732_v43 = vand.u32 2147483648, %v3772_v11  ;;  %v1749_v12 = vadd.f32 1.1283791, %v1748_v41 }
 0x178   : > { %2701 = vrcp.f32 %v3806_v61  ;;  %v1724_v28 = vmul.f32 %v2700_v19, %v1723_v3  ;;  %v1783_v51 = vadd.f32 0.0036580483, %v1782_v32  ;;  %v1794_v42 = vadd.f32 0.014752088, %v1793_v62  ;;  %vm1728_vm11 = vmor %vm1726_vm8, %vm1727_vm9 }
 0x179   : > { %v2463_v63 = vmul.f32 %v2431_v2, %v3751_v40  ;;  %vm3819_vm10 = vcmp.eq.f32.partialorder %v1730_v33, 8.507059e+37  ;;  %v1820_v38 = vmul.f32 2.1237322e-06, %v3810_v23  ;;  %v1831_v35 = vmul.f32 3.8918573e-05, %v3810_v23  ;;  %v677_v33 = vpop.f32.mrf.mxu1 }
 0x17a   : > { %v901_v39 = vadd.f32 %v900_v59, %v788_v56  ;;  %v1725_v14 = vadd.f32 %v2700_v19, %v1724_v28  ;;  %v1784_v10 = vmul.f32 %v1783_v51, %v3784_v17  ;;  %v1795_v1 = vmul.f32 %v1794_v42, %v3784_v17 }
 0x17b   : > { %2495 = vst [vmem:[%s3255_s17 + $0x68] sm:$0xff] %v2463_v63  ;;  %v3829_v40 = vmul.f32 0.70710677, %v3814_v47  ;;  %v1733_v57 = vor.u32 1.1754944e-38, %v1732_v43  ;;  %v1750_v6 = vmul.f32 %v1749_v12, %v3719_v50  ;;  %v1821_v4 = vadd.f32 0.00028619796, %v1820_v38 }
 0x17c   : > { %v1832_v29 = vadd.f32 0.001143296, %v1831_v35  ;;  %v1729_v7 = vsel %vm1728_vm11, %v2700_v19, %v1725_v14  ;;  %vm1766_vm12 = vweird.f32 %v3806_v61  ;;  %v1785_v49 = vadd.f32 0.05243302, %v1784_v10  ;;  %v790_v35 = vpop.f32.mrf.mxu2 }
 0x17d   : > { %v1796_v18 = vadd.f32 0.112945676, %v1795_v1  ;;  %v1858_v13 = vmul.f32 %v3829_v40, %v3829_v40  ;;  %v1734_v31 = vsel %vm3819_vm10, %v1733_v57, %v1729_v7  ;;  %v1770_v11 = vand.u32 2147483647, %v3806_v61 }
 0x17e   : > { %v2702_v58 = vpop.eup %2701  ;;  %v1822_v37 = vmul.f32 %v1821_v4, %v3810_v23  ;;  %v1833_v50 = vmul.f32 %v1832_v29, %v3810_v23  ;;  %v1735_v5 = vmul.f32 %v1734_v31, %v1710_v22  ;;  %v1772_v20 = vand.u32 2147483648, %v3806_v61 }
 0x17f   : > { %v1762_v46 = vmul.f32 %v2702_v58, %v3806_v61  ;;  %v3846_v9 = vadd.f32 %v3509_v24, %v901_v39  ;;  %v1797_v25 = vmul.f32 %v1796_v18, %v3784_v17  ;;  %v3849_v52 = vmin.f32 %v1858_v13, 16.0  ;;  %v903_v18 = vpop.f32.mrf.mxu3 }
 0x180   : > { %v1823_v54 = vadd.f32 0.0036580483, %v1822_v37  ;;  %v1834_v26 = vadd.f32 0.014752088, %v1833_v50  ;;  %v2625_v16 = vclamps-f32 %v1735_v5, 1.0  ;;  %vm1767_vm13 = vweird.f32 %v2702_v58 }
 0x181   : > { %v1763_v0 = vsub.f32 1.0, %v1762_v46  ;;  %v1786_v34 = vmul.f32 %v1785_v49, %v3784_v17  ;;  %v1798_v27 = vadd.f32 0.4994258, %v1797_v25  ;;  %v1860_v41 = vmul.f32 2.1237322e-06, %v3849_v52  ;;  %vm1768_vm15 = vmor %vm1766_vm12, %vm1767_vm13  ;;  %v680_v25 = vpop.f32.mrf.mxu1 }
 0x182   : > { %v1824_v19 = vmul.f32 %v1823_v54, %v3810_v23  ;;  %v1835_v22 = vmul.f32 %v1834_v26, %v3810_v23  ;;  %v2432_v24 = vadd.f32 1.0, %v2625_v16  ;;  %v1871_v48 = vmul.f32 3.8918573e-05, %v3849_v52 }
 0x183   : > { %v1764_v55 = vmul.f32 %v2702_v58, %v1763_v0  ;;  %v3857_v8 = vmul.f32 0.70710677, %v3846_v9  ;;  %v1799_v56 = vmul.f32 %v1798_v27, %v3784_v17  ;;  %v1861_v2 = vadd.f32 0.00028619796, %v1860_v41 }
 0x184   : > { %v1825_v32 = vadd.f32 0.05243302, %v1824_v19  ;;  %v1836_v62 = vadd.f32 0.112945676, %v1835_v22  ;;  %v2464_v3 = vmul.f32 %v2432_v24, %v3793_v60  ;;  %vm1771_vm14 = vcmp.eq.f32.partialorder %v1770_v11, 8.507059e+37 }
 0x185   : > { %v1765_v59 = vadd.f32 %v2702_v58, %v1764_v55  ;;  %v1872_v43 = vadd.f32 0.001143296, %v1871_v48  ;;  %v1773_v12 = vor.u32 1.1754944e-38, %v1772_v20  ;;  %v3864_v63 = vadd.f32 1.0, %v1799_v56 }
 0x186   : > { %v1837_v28 = vmul.f32 %v1836_v62, %v3810_v23  ;;  %v1862_v51 = vmul.f32 %v1861_v2, %v3849_v52  ;;  %2496 = vst [vmem:[%s3255_s17 + $0x70] sm:$0xff] %v2464_v3  ;;  %v1787_v44 = vadd.f32 0.18741608, %v1786_v34  ;;  %v1898_v60 = vmul.f32 %v3857_v8, %v3857_v8 }
 0x187   : > { %v1769_v42 = vsel %vm1768_vm15, %v2702_v58, %v1765_v59  ;;  %v1873_v38 = vmul.f32 %v1872_v43, %v3849_v52  ;;  %2703 = vrcp.f32 %v3864_v63  ;;  %v1826_v61 = vmul.f32 %v1825_v32, %v3810_v23  ;;  %v793_v32 = vpop.f32.mrf.mxu2 }
 0x188   : > { %v1774_v39 = vsel %vm1771_vm14, %v1773_v12, %v1769_v42  ;;  %v1089_v14 = vmul.f32 0.5, %v3703_v21  ;;  %v3876_v1 = vmul.f32 0.5, %v3757_v45  ;;  %v1838_v57 = vadd.f32 0.4994258, %v1837_v28 }
 0x189   : > { %v1775_v10 = vmul.f32 %v1774_v39, %v1750_v6  ;;  %v1863_v4 = vadd.f32 0.0036580483, %v1862_v51  ;;  %v1874_v29 = vadd.f32 0.014752088, %v1873_v38  ;;  %v3878_v7 = vmin.f32 %v1898_v60, 16.0  ;;  %v906_v38 = vpop.f32.mrf.mxu3 }
 0x18a   : > { %v678_v49 = vadd.f32 %v677_v33, %v564_v53  ;;  %v1788_v58 = vmul.f32 %v1787_v44, %v3784_v17  ;;  %v1810_v31 = vand.u32 2147483647, %v3864_v63  ;;  %v1839_v11 = vmul.f32 %v1838_v57, %v3810_v23  ;;  %v567_v17 = vpop.f32.mrf.mxu0  ;;  %v3909_v51 = vld [vmem:[%s4362_s2] ss:$0 sm:$0xff] }
 0x18b   : > { %v2626_v13 = vclamps-f32 %v1775_v10, 1.0  ;;  %v1827_v37 = vadd.f32 0.18741608, %v1826_v61  ;;  %v1864_v21 = vmul.f32 %v1863_v4, %v3849_v52  ;;  %v1875_v45 = vmul.f32 %v1874_v29, %v3849_v52 }
 0x18c   : > { %v1900_v6 = vmul.f32 2.1237322e-06, %v3878_v7  ;;  %v1812_v5 = vand.u32 2147483648, %v3864_v63  ;;  %v3887_v46 = vadd.f32 1.0, %v1839_v11  ;;  %v1911_v20 = vmul.f32 3.8918573e-05, %v3878_v7  ;;  %v683_v11 = vpop.f32.mrf.mxu1 }
 0x18d   : > { %v2433_v50 = vadd.f32 1.0, %v2626_v13  ;;  %v2704_v54 = vpop.eup %2703  ;;  %v1865_v26 = vadd.f32 0.05243302, %v1864_v21  ;;  %v1876_v16 = vadd.f32 0.112945676, %v1875_v45  ;;  %v791_v34 = vadd.f32 %v790_v35, %v678_v49 }
 0x18e   : > { %v1901_v0 = vadd.f32 0.00028619796, %v1900_v6  ;;  %v1789_v19 = vadd.f32 1.1283791, %v1788_v58  ;;  %v1802_v22 = vmul.f32 %v2704_v54, %v3864_v63  ;;  %v3892_v41 = vmul.f32 0.5, %v3787_v15 }
 0x18f   : > { %v2465_v27 = vmul.f32 %v2433_v50, %v1089_v14  ;;  %vm1806_vm0 = vweird.f32 %v3864_v63  ;;  %v1828_v24 = vmul.f32 %v1827_v37, %v3810_v23  ;;  %2705 = vrcp.f32 %v3887_v46 }
 0x190   : > { %v681_v55 = vadd.f32 %v680_v25, %v567_v17  ;;  %v1803_v48 = vsub.f32 1.0, %v1802_v22  ;;  %v1866_v53 = vmul.f32 %v1865_v26, %v3849_v52  ;;  %v1877_v33 = vmul.f32 %v1876_v16, %v3849_v52 }
 0x191   : > { %2497 = vst [vmem:[%s3255_s17 + $0x78] sm:$0xff] %v2465_v27  ;;  %v1902_v56 = vmul.f32 %v1901_v0, %v3878_v7  ;;  %vm3901_vm1 = vcmp.eq.f32.partialorder %v1810_v31, 8.507059e+37  ;;  %v1813_v15 = vor.u32 1.1754944e-38, %v1812_v5  ;;  %v1912_v2 = vadd.f32 0.001143296, %v1911_v20  ;;  %v796_v27 = vpop.f32.mrf.mxu2 }
 0x192   : > { %v904_v3 = vadd.f32 %v903_v18, %v791_v34  ;;  %v1804_v23 = vmul.f32 %v2704_v54, %v1803_v48  ;;  %vm1807_vm2 = vweird.f32 %v2704_v54  ;;  %v1878_v59 = vadd.f32 0.4994258, %v1877_v33  ;;  %v570_v31 = vpop.f32.mrf.mxu0 }
 0x193   : > { %v1903_v43 = vadd.f32 0.0036580483, %v1902_v56  ;;  %v1829_v12 = vadd.f32 1.1283791, %v1828_v24  ;;  %v1913_v28 = vmul.f32 %v1912_v2, %v3878_v7  ;;  %v794_v44 = vadd.f32 %v793_v32, %v681_v55  ;;  %vm1808_vm3 = vmor %vm1806_vm0, %vm1807_vm2 }
 0x194   : > { %v3912_v42 = vadd.f32 %v3909_v51, %v904_v3  ;;  %v1805_v60 = vadd.f32 %v2704_v54, %v1804_v23  ;;  %v1867_v35 = vadd.f32 0.18741608, %v1866_v53  ;;  %v1879_v39 = vmul.f32 %v1878_v59, %v3849_v52 }
 0x195   : > { %v1904_v61 = vmul.f32 %v1903_v43, %v3878_v7  ;;  %v2706_v14 = vpop.eup %2705  ;;  %v1790_v10 = vmul.f32 %v1789_v19, %v3769_v30  ;;  %v1850_v57 = vand.u32 2147483647, %v3887_v46  ;;  %v1914_v4 = vadd.f32 0.014752088, %v1913_v28 }
 0x196   : > { %v3922_v29 = vmul.f32 0.70710677, %v3912_v42  ;;  %v1809_v49 = vsel %vm1808_vm3, %v2704_v54, %v1805_v60  ;;  %v1842_v18 = vmul.f32 %v2706_v14, %v3887_v46  ;;  %v1852_v13 = vand.u32 2147483648, %v3887_v46 }
 0x197   : > { %v907_v58 = vadd.f32 %v906_v38, %v794_v44  ;;  %v1814_v30 = vsel %vm3901_vm1, %v1813_v15, %v1809_v49  ;;  %v3928_v37 = vadd.f32 1.0, %v1879_v39  ;;  %v1905_v63 = vadd.f32 0.05243302, %v1904_v61 }
 0x198   : > { %v1915_v21 = vmul.f32 %v1914_v4, %v3878_v7  ;;  %v1815_v45 = vmul.f32 %v1814_v30, %v1790_v10  ;;  %v1843_v6 = vsub.f32 1.0, %v1842_v18  ;;  %v1868_v50 = vmul.f32 %v1867_v35, %v3849_v52 }
 0x199   : > { %v1938_v5 = vmul.f32 %v3922_v29, %v3922_v29  ;;  %vm1846_vm4 = vweird.f32 %v3887_v46  ;;  %vm1847_vm5 = vweird.f32 %v2706_v14  ;;  %2707 = vrcp.f32 %v3928_v37  ;;  %v909_v46 = vpop.f32.mrf.mxu3 }
 0x19a   : > { %v684_v20 = vadd.f32 %v683_v11, %v570_v31  ;;  %v2627_v17 = vclamps-f32 %v1815_v45, 1.0  ;;  %v1844_v25 = vmul.f32 %v2706_v14, %v1843_v6  ;;  %v1906_v54 = vmul.f32 %v1905_v63, %v3878_v7  ;;  %vm1848_vm7 = vmor %vm1846_vm4, %vm1847_vm5  ;;  %v573_v61 = vpop.f32.mrf.mxu0 }
 0x19b   : > { %v1916_v26 = vadd.f32 0.112945676, %v1915_v21  ;;  %vm3937_vm6 = vcmp.eq.f32.partialorder %v1850_v57, 8.507059e+37  ;;  %v1853_v0 = vor.u32 1.1754944e-38, %v1852_v13  ;;  %v3941_v52 = vmin.f32 %v1938_v5, 16.0  ;;  %v799_v5 = vpop.f32.mrf.mxu2 }
 0x19c   : > { %v3944_v34 = vadd.f32 %v3909_v51, %v907_v58  ;;  %v2434_v19 = vadd.f32 1.0, %v2627_v17  ;;  %v1845_v22 = vadd.f32 %v2706_v14, %v1844_v25  ;;  %v1869_v24 = vadd.f32 1.1283791, %v1868_v50 }
 0x19d   : > { %v1917_v55 = vmul.f32 %v1916_v26, %v3878_v7  ;;  %v1830_v48 = vmul.f32 %v1829_v12, %v3797_v36  ;;  %v1907_v53 = vadd.f32 0.18741608, %v1906_v54  ;;  %v1940_v33 = vmul.f32 2.1237322e-06, %v3941_v52 }
 0x19e   : > { %v1951_v56 = vmul.f32 3.8918573e-05, %v3941_v52  ;;  %v2466_v32 = vmul.f32 %v2434_v19, %v3876_v1  ;;  %v1849_v62 = vsel %vm1848_vm7, %v2706_v14, %v1845_v22  ;;  %v797_v2 = vadd.f32 %v796_v27, %v684_v20  ;;  %v686_v14 = vpop.f32.mrf.mxu1 }
 0x19f   : > { %v1918_v15 = vadd.f32 0.4994258, %v1917_v55  ;;  %v2708_v3 = vpop.eup %2707  ;;  %v1854_v23 = vsel %vm3937_vm6, %v1853_v0, %v1849_v62  ;;  %v1941_v59 = vadd.f32 0.00028619796, %v1940_v33  ;;  %v3957_v43 = vmul.f32 0.70710677, %v3944_v34 }
 0x1a0   : > { %v1952_v36 = vadd.f32 0.001143296, %v1951_v56  ;;  %2498 = vst [vmem:[%s3255_s17 + $0x80] sm:$0xff] %v2466_v32  ;;  %v1855_v12 = vmul.f32 %v1854_v23, %v1830_v48  ;;  %v1870_v28 = vmul.f32 %v1869_v24, %v3829_v40  ;;  %v1882_v44 = vmul.f32 %v2708_v3, %v3928_v37 }
 0x1a1   : > { %v1892_v1 = vand.u32 2147483648, %v3928_v37  ;;  %v1919_v38 = vmul.f32 %v1918_v15, %v3878_v7  ;;  %v1942_v60 = vmul.f32 %v1941_v59, %v3941_v52  ;;  %v1978_v39 = vmul.f32 %v3957_v43, %v3957_v43 }
 0x1a2   : > { %v1953_v35 = vmul.f32 %v1952_v36, %v3941_v52  ;;  %v2628_v10 = vclamps-f32 %v1855_v12, 1.0  ;;  %v1883_v57 = vsub.f32 1.0, %v1882_v44  ;;  %v1908_v4 = vmul.f32 %v1907_v53, %v3878_v7  ;;  %v912_v53 = vpop.f32.mrf.mxu3 }
 0x1a3   : > { %v910_v40 = vadd.f32 %v909_v46, %v797_v2  ;;  %v3969_v49 = vadd.f32 1.0, %v1919_v38  ;;  %v1943_v18 = vadd.f32 0.0036580483, %v1942_v60  ;;  %v3971_v58 = vmin.f32 %v1978_v39, 16.0  ;;  %v576_v2 = vpop.f32.mrf.mxu0 }
 0x1a4   : > { %v1954_v13 = vadd.f32 0.014752088, %v1953_v35  ;;  %v2435_v31 = vadd.f32 1.0, %v2628_v10  ;;  %v1884_v11 = vmul.f32 %v2708_v3, %v1883_v57  ;;  %vm1887_vm8 = vweird.f32 %v2708_v3 }
 0x1a5   : > { %v1890_v30 = vand.u32 2147483647, %v3928_v37  ;;  %vm1886_vm9 = vweird.f32 %v3928_v37  ;;  %v1893_v63 = vor.u32 1.1754944e-38, %v1892_v1  ;;  %2709 = vrcp.f32 %v3969_v49 }
 0x1a6   : > { %v3977_v7 = vadd.f32 %v3909_v51, %v910_v40  ;;  %v2467_v21 = vmul.f32 %v2435_v31, %v3892_v41  ;;  %v1885_v45 = vadd.f32 %v2708_v3, %v1884_v11  ;;  %v1944_v6 = vmul.f32 %v1943_v18, %v3941_v52  ;;  %vm1888_vm10 = vmor %vm1886_vm9, %vm1887_vm8  ;;  %v802_v40 = vpop.f32.mrf.mxu2 }
 0x1a7   : > { %v1955_v50 = vmul.f32 %v1954_v13, %v3941_v52  ;;  %v1909_v20 = vadd.f32 1.1283791, %v1908_v4  ;;  %v1980_v17 = vmul.f32 2.1237322e-06, %v3971_v58  ;;  %v1991_v37 = vmul.f32 3.8918573e-05, %v3971_v58 }
 0x1a8   : > { %v687_v25 = vadd.f32 %v686_v14, %v573_v61  ;;  %2499 = vst [vmem:[%s3255_s17 + $0x88] sm:$0xff] %v2467_v21  ;;  %v1889_v54 = vsel %vm1888_vm10, %v2708_v3, %v1885_v45  ;;  %vm1891_vm11 = vcmp.eq.f32.partialorder %v1890_v30, 8.507059e+37  ;;  %v1945_v26 = vadd.f32 0.05243302, %v1944_v6  ;;  %v689_v3 = vpop.f32.mrf.mxu1 }
 0x1a9   : > { %v1956_v16 = vadd.f32 0.112945676, %v1955_v50  ;;  %v1894_v0 = vsel %vm1891_vm11, %v1893_v63, %v1889_v54  ;;  %v1981_v41 = vadd.f32 0.00028619796, %v1980_v17  ;;  %v1992_v27 = vadd.f32 0.001143296, %v1991_v37 }
 0x1aa   : > { %v3986_v19 = vmul.f32 0.70710677, %v3977_v7  ;;  %v1092_v22 = vmul.f32 0.5, %v3814_v47  ;;  %v1895_v24 = vmul.f32 %v1894_v0, %v1870_v28  ;;  %v1930_v55 = vand.u32 2147483647, %v3969_v49  ;;  %v915_v17 = vpop.f32.mrf.mxu3 }
 0x1ab   : > { %v1957_v48 = vmul.f32 %v1956_v16, %v3941_v52  ;;  %v2710_v33 = vpop.eup %2709  ;;  %v1982_v56 = vmul.f32 %v1981_v41, %v3971_v58  ;;  %v1993_v32 = vmul.f32 %v1992_v27, %v3971_v58  ;;  %v800_v15 = vadd.f32 %v799_v5, %v687_v25 }
 0x1ac   : > { %v2018_v62 = vmul.f32 %v3986_v19, %v3986_v19  ;;  %v2629_v23 = vclamps-f32 %v1895_v24, 1.0  ;;  %v1922_v47 = vmul.f32 %v2710_v33, %v3969_v49  ;;  %v1932_v59 = vand.u32 2147483648, %v3969_v49 }
 0x1ad   : > { %v1946_v36 = vmul.f32 %v1945_v26, %v3941_v52  ;;  %v1910_v46 = vmul.f32 %v1909_v20, %v3857_v8  ;;  %v1958_v12 = vadd.f32 0.4994258, %v1957_v48  ;;  %v1983_v28 = vadd.f32 0.0036580483, %v1982_v56  ;;  %v579_v26 = vpop.f32.mrf.mxu0 }
 0x1ae   : > { %v1994_v44 = vadd.f32 0.014752088, %v1993_v32  ;;  %v2436_v1 = vadd.f32 1.0, %v2629_v23  ;;  %v1923_v38 = vsub.f32 1.0, %v1922_v47  ;;  %vm1927_vm12 = vweird.f32 %v2710_v33 }
 0x1af   : > { %v3999_v60 = vmin.f32 %v2018_v62, 16.0  ;;  %v1959_v35 = vmul.f32 %v1958_v12, %v3941_v52  ;;  %v1984_v39 = vmul.f32 %v1983_v28, %v3971_v58  ;;  %v913_v14 = vadd.f32 %v912_v53, %v800_v15 }
 0x1b0   : > { %v1995_v61 = vmul.f32 %v1994_v44, %v3971_v58  ;;  %v2468_v10 = vmul.f32 %v2436_v1, %v1092_v22  ;;  %v1924_v57 = vmul.f32 %v2710_v33, %v1923_v38  ;;  %v1947_v4 = vadd.f32 0.18741608, %v1946_v36  ;;  %v692_v16 = vpop.f32.mrf.mxu1  ;;  %v805_v36 = vpop.f32.mrf.mxu2 }
 0x1b1   : > { %v2020_v8 = vmul.f32 2.1237322e-06, %v3999_v60  ;;  %vm1926_vm13 = vweird.f32 %v3969_v49  ;;  %v4006_v18 = vadd.f32 1.0, %v1959_v35  ;;  %v1985_v13 = vadd.f32 0.05243302, %v1984_v39 }
 0x1b2   : > { %v1996_v31 = vadd.f32 0.112945676, %v1995_v61  ;;  %2500 = vst [vmem:[%s3255_s17 + $0x90] sm:$0xff] %v2468_v10  ;;  %v1925_v11 = vadd.f32 %v2710_v33, %v1924_v57  ;;  %vm1931_vm14 = vcmp.eq.f32.partialorder %v1930_v55, 8.507059e+37  ;;  %v2031_v63 = vmul.f32 3.8918573e-05, %v3999_v60  ;;  %vm1928_vm15 = vmor %vm1926_vm13, %vm1927_vm12 }
 0x1b3   : > { %v2021_v30 = vadd.f32 0.00028619796, %v2020_v8  ;;  %v1933_v21 = vor.u32 1.1754944e-38, %v1932_v59  ;;  %2711 = vrcp.f32 %v4006_v18  ;;  %v4013_v45 = vadd.f32 %v3909_v51, %v913_v14  ;;  %v918_v8 = vpop.f32.mrf.mxu3 }
 0x1b4   : > { %v690_v6 = vadd.f32 %v689_v3, %v576_v2  ;;  %v1929_v49 = vsel %vm1928_vm15, %v2710_v33, %v1925_v11  ;;  %v1986_v50 = vmul.f32 %v1985_v13, %v3971_v58  ;;  %v1997_v5 = vmul.f32 %v1996_v31, %v3971_v58 }
 0x1b5   : > { %v2022_v20 = vmul.f32 %v2021_v30, %v3999_v60  ;;  %v1093_v37 = vmul.f32 0.5, %v3846_v9  ;;  %v1934_v25 = vsel %vm1931_vm14, %v1933_v21, %v1929_v49  ;;  %v2032_v54 = vadd.f32 0.001143296, %v2031_v63 }
 0x1b6   : > { %v1935_v0 = vmul.f32 %v1934_v25, %v1910_v46  ;;  %v1948_v41 = vmul.f32 %v1947_v4, %v3941_v52  ;;  %v1998_v27 = vadd.f32 0.4994258, %v1997_v5  ;;  %v4021_v24 = vmul.f32 0.5, %v3912_v42 }
 0x1b7   : > { %v2023_v22 = vadd.f32 0.0036580483, %v2022_v20  ;;  %v2033_v55 = vmul.f32 %v2032_v54, %v3999_v60  ;;  %v4025_v48 = vmul.f32 0.70710677, %v4013_v45  ;;  %v803_v53 = vadd.f32 %v802_v40, %v690_v6 }
 0x1b8   : > { %v2630_v33 = vclamps-f32 %v1935_v0, 1.0  ;;  %v1987_v9 = vadd.f32 0.18741608, %v1986_v50  ;;  %v1999_v56 = vmul.f32 %v1998_v27, %v3971_v58  ;;  %v693_v32 = vadd.f32 %v692_v16, %v579_v26 }
 0x1b9   : > { %v2712_v62 = vpop.eup %2711  ;;  %v2024_v15 = vmul.f32 %v2023_v22, %v3999_v60  ;;  %v2034_v52 = vadd.f32 0.014752088, %v2033_v55  ;;  %v2058_v2 = vmul.f32 %v4025_v48, %v4025_v48  ;;  %v916_v42 = vadd.f32 %v915_v17, %v803_v53 }
 0x1ba   : > { %v2437_v3 = vadd.f32 1.0, %v2630_v33  ;;  %v1949_v23 = vadd.f32 1.1283791, %v1948_v41  ;;  %v1962_v47 = vmul.f32 %v2712_v62, %v4006_v18  ;;  %v4033_v59 = vmul.f32 0.5, %v3944_v34 }
 0x1bb   : > { %v1970_v46 = vand.u32 2147483647, %v4006_v18  ;;  %v4036_v12 = vadd.f32 1.0, %v1999_v56  ;;  %v2035_v28 = vmul.f32 %v2034_v52, %v3999_v60  ;;  %v4039_v44 = vmin.f32 %v2058_v2, 16.0 }
 0x1bc   : > { %v2469_v1 = vmul.f32 %v2437_v3, %v1093_v37  ;;  %v1963_v38 = vsub.f32 1.0, %v1962_v47  ;;  %v1972_v35 = vand.u32 2147483648, %v4006_v18  ;;  %v1988_v39 = vmul.f32 %v1987_v9, %v3971_v58 }
 0x1bd   : > { %2713 = vrcp.f32 %v4036_v12  ;;  %v2025_v61 = vadd.f32 0.05243302, %v2024_v15  ;;  %v4045_v34 = vadd.f32 %v3909_v51, %v916_v42  ;;  %v806_v14 = vadd.f32 %v805_v36, %v693_v32  ;;  %v695_v15 = vpop.f32.mrf.mxu1 }
 0x1be   : > { %2501 = vst [vmem:[%s3255_s17 + $0x98] sm:$0xff] %v2469_v1  ;;  %v1964_v10 = vmul.f32 %v2712_v62, %v1963_v38  ;;  %vm1967_vm0 = vweird.f32 %v2712_v62  ;;  %v2036_v57 = vadd.f32 0.112945676, %v2035_v28  ;;  %v2060_v4 = vmul.f32 2.1237322e-06, %v4039_v44 }
 0x1bf   : > { %v1950_v40 = vmul.f32 %v1949_v23, %v3922_v29  ;;  %vm1966_vm1 = vweird.f32 %v4006_v18  ;;  %vm4051_vm2 = vcmp.eq.f32.partialorder %v1970_v46, 8.507059e+37  ;;  %v2071_v13 = vmul.f32 3.8918573e-05, %v4039_v44 }
 0x1c0   : > { %v1965_v31 = vadd.f32 %v2712_v62, %v1964_v10  ;;  %v1973_v11 = vor.u32 1.1754944e-38, %v1972_v35  ;;  %v2037_v30 = vmul.f32 %v2036_v57, %v3999_v60  ;;  %v2061_v63 = vadd.f32 0.00028619796, %v2060_v4  ;;  %vm1968_vm3 = vmor %vm1966_vm1, %vm1967_vm0 }
 0x1c1   : > { %v1989_v21 = vadd.f32 1.1283791, %v1988_v39  ;;  %v2072_v6 = vadd.f32 0.001143296, %v2071_v13  ;;  %v4058_v49 = vmul.f32 0.70710677, %v4045_v34  ;;  %v919_v29 = vadd.f32 %v918_v8, %v806_v14  ;;  %v808_v14 = vpop.f32.mrf.mxu2 }
 0x1c2   : > { %v1969_v50 = vsel %vm1968_vm3, %v2712_v62, %v1965_v31  ;;  %v2026_v18 = vmul.f32 %v2025_v61, %v3999_v60  ;;  %v2038_v5 = vadd.f32 0.4994258, %v2037_v30  ;;  %v2062_v20 = vmul.f32 %v2061_v63, %v4039_v44  ;;  %v582_v62 = vpop.f32.mrf.mxu0 }
 0x1c3   : > { %v2714_v17 = vpop.eup %2713  ;;  %v1974_v37 = vsel %vm4051_vm2, %v1973_v11, %v1969_v50  ;;  %v2010_v25 = vand.u32 2147483647, %v4036_v12  ;;  %v2073_v54 = vmul.f32 %v2072_v6, %v4039_v44  ;;  %v2098_v26 = vmul.f32 %v4058_v49, %v4058_v49  ;;  %v921_v11 = vpop.f32.mrf.mxu3 }
 0x1c4   : > { %v1975_v16 = vmul.f32 %v1974_v37, %v1950_v40  ;;  %v2002_v0 = vmul.f32 %v2714_v17, %v4036_v12  ;;  %v2012_v41 = vand.u32 2147483648, %v4036_v12  ;;  %v4071_v27 = vadd.f32 %v3909_v51, %v919_v29 }
 0x1c5   : > { %v2039_v22 = vmul.f32 %v2038_v5, %v3999_v60  ;;  %v2063_v55 = vadd.f32 0.0036580483, %v2062_v20  ;;  %v2074_v53 = vadd.f32 0.014752088, %v2073_v54  ;;  %v4074_v33 = vmin.f32 %v2098_v26, 16.0 }
 0x1c6   : > { %v2631_v9 = vclamps-f32 %v1975_v16, 1.0  ;;  %v2003_v56 = vsub.f32 1.0, %v2002_v0  ;;  %vm2007_vm4 = vweird.f32 %v2714_v17  ;;  %v2027_v32 = vadd.f32 0.18741608, %v2026_v18 }
 0x1c7   : > { %v4076_v52 = vadd.f32 1.0, %v2039_v22  ;;  %v2064_v2 = vmul.f32 %v2063_v55, %v4039_v44  ;;  %v2075_v42 = vmul.f32 %v2074_v53, %v4039_v44  ;;  %v2100_v3 = vmul.f32 2.1237322e-06, %v4074_v33 }
 0x1c8   : > { %v2438_v23 = vadd.f32 1.0, %v2631_v9  ;;  %v2004_v47 = vmul.f32 %v2714_v17, %v2003_v56  ;;  %v2111_v36 = vmul.f32 3.8918573e-05, %v4074_v33  ;;  %v4083_v46 = vmul.f32 0.70710677, %v4071_v27  ;;  %v698_v9 = vpop.f32.mrf.mxu1 }
 0x1c9   : > { %v1990_v28 = vmul.f32 %v1989_v21, %v3957_v43  ;;  %vm2006_vm5 = vweird.f32 %v4036_v12  ;;  %2715 = vrcp.f32 %v4076_v52  ;;  %v696_v1 = vadd.f32 %v695_v15, %v582_v62 }
 0x1ca   : > { %v2470_v38 = vmul.f32 %v2438_v23, %v4021_v24  ;;  %v2005_v35 = vadd.f32 %v2714_v17, %v2004_v47  ;;  %v2065_v39 = vadd.f32 0.05243302, %v2064_v2  ;;  %v2076_v61 = vadd.f32 0.112945676, %v2075_v42  ;;  %vm2008_vm6 = vmor %vm2006_vm5, %vm2007_vm4  ;;  %v585_v53 = vpop.f32.mrf.mxu0 }
 0x1cb   : > { %v2013_v10 = vor.u32 1.1754944e-38, %v2012_v41  ;;  %v2028_v57 = vmul.f32 %v2027_v32, %v3999_v60  ;;  %v2101_v4 = vadd.f32 0.00028619796, %v2100_v3  ;;  %v2112_v8 = vadd.f32 0.001143296, %v2111_v36 }
 0x1cc   : > { %2502 = vst [vmem:[%s3255_s17 + $0xa0] sm:$0xff] %v2470_v38  ;;  %v2009_v43 = vsel %vm2008_vm6, %v2714_v17, %v2005_v35  ;;  %vm2011_vm7 = vcmp.eq.f32.partialorder %v2010_v25, 8.507059e+37  ;;  %v2077_v12 = vmul.f32 %v2076_v61, %v4039_v44  ;;  %v2138_v40 = vmul.f32 %v4083_v46, %v4083_v46 }
 0x1cd   : > { %v2014_v24 = vsel %vm2011_vm7, %v2013_v10, %v2009_v43  ;;  %v2102_v58 = vmul.f32 %v2101_v4, %v4074_v33  ;;  %v2113_v13 = vmul.f32 %v2112_v8, %v4074_v33  ;;  %v809_v31 = vadd.f32 %v808_v14, %v696_v1  ;;  %v924_v4 = vpop.f32.mrf.mxu3 }
 0x1ce   : > { %v2015_v30 = vmul.f32 %v2014_v24, %v1990_v28  ;;  %v2066_v60 = vmul.f32 %v2065_v39, %v4039_v44  ;;  %v2078_v63 = vadd.f32 0.4994258, %v2077_v12  ;;  %v4098_v21 = vmin.f32 %v2138_v40, 16.0 }
 0x1cf   : > { %v2716_v6 = vpop.eup %2715  ;;  %v2029_v29 = vadd.f32 1.1283791, %v2028_v57  ;;  %v2103_v50 = vadd.f32 0.0036580483, %v2102_v58  ;;  %v2114_v18 = vadd.f32 0.014752088, %v2113_v13  ;;  %v922_v37 = vadd.f32 %v921_v11, %v809_v31 }
 0x1d0   : > { %v2632_v5 = vclamps-f32 %v2015_v30, 1.0  ;;  %v2042_v20 = vmul.f32 %v2716_v6, %v4076_v52  ;;  %v2050_v17 = vand.u32 2147483647, %v4076_v52  ;;  %v2079_v25 = vmul.f32 %v2078_v63, %v4039_v44 }
 0x1d1   : > { %v2104_v54 = vmul.f32 %v2103_v50, %v4074_v33  ;;  %v2115_v26 = vmul.f32 %v2114_v18, %v4074_v33  ;;  %v2140_v16 = vmul.f32 2.1237322e-06, %v4098_v21  ;;  %v2067_v22 = vadd.f32 0.18741608, %v2066_v60  ;;  %v701_v18 = vpop.f32.mrf.mxu1 }
 0x1d2   : > { %v2439_v0 = vadd.f32 1.0, %v2632_v5  ;;  %v2043_v41 = vsub.f32 1.0, %v2042_v20  ;;  %v2151_v55 = vmul.f32 3.8918573e-05, %v4098_v21  ;;  %v2052_v56 = vand.u32 2147483648, %v4076_v52 }
 0x1d3   : > { %v4108_v32 = vadd.f32 1.0, %v2079_v25  ;;  %v2105_v62 = vadd.f32 0.05243302, %v2104_v54  ;;  %v2116_v15 = vadd.f32 0.112945676, %v2115_v26  ;;  %vm2047_vm8 = vweird.f32 %v2716_v6 }
 0x1d4   : > { %v2471_v2 = vmul.f32 %v2439_v0, %v4033_v59  ;;  %v2044_v42 = vmul.f32 %v2716_v6, %v2043_v41  ;;  %v2141_v3 = vadd.f32 0.00028619796, %v2140_v16  ;;  %vm2046_vm9 = vweird.f32 %v4076_v52  ;;  %v811_v59 = vpop.f32.mrf.mxu2 }
 0x1d5   : > { %2717 = vrcp.f32 %v4108_v32  ;;  %v4114_v23 = vadd.f32 %v3909_v51, %v922_v37  ;;  %v699_v47 = vadd.f32 %v698_v9, %v585_v53  ;;  %v2106_v28 = vmul.f32 %v2105_v62, %v4074_v33  ;;  %vm2048_vm10 = vmor %vm2046_vm9, %vm2047_vm8 }
 0x1d6   : > { %2503 = vst [vmem:[%s3255_s17 + $0xa8] sm:$0xff] %v2471_v2  ;;  %v2045_v36 = vadd.f32 %v2716_v6, %v2044_v42  ;;  %v2117_v1 = vmul.f32 %v2116_v15, %v4074_v33  ;;  %v2142_v38 = vmul.f32 %v2141_v3, %v4098_v21  ;;  %v2030_v35 = vmul.f32 %v2029_v29, %v3986_v19 }
 0x1d7   : > { %vm2051_vm11 = vcmp.eq.f32.partialorder %v2050_v17, 8.507059e+37  ;;  %v2053_v52 = vor.u32 1.1754944e-38, %v2052_v56  ;;  %v2152_v39 = vadd.f32 0.001143296, %v2151_v55  ;;  %v2068_v14 = vmul.f32 %v2067_v22, %v4039_v44 }
 0x1d8   : > { %v2049_v61 = vsel %vm2048_vm10, %v2716_v6, %v2045_v36  ;;  %v2118_v10 = vadd.f32 0.4994258, %v2117_v1  ;;  %v2143_v57 = vadd.f32 0.0036580483, %v2142_v38  ;;  %v4124_v12 = vmul.f32 0.70710677, %v4114_v23 }
 0x1d9   : > { %v2054_v8 = vsel %vm2051_vm11, %v2053_v52, %v2049_v61  ;;  %v2153_v43 = vmul.f32 %v2152_v39, %v4098_v21  ;;  %v812_v40 = vadd.f32 %v811_v59, %v699_v47  ;;  %v1096_v24 = vmul.f32 0.5, %v3977_v7  ;;  %v588_v7 = vpop.f32.mrf.mxu0 }
 0x1da   : > { %v2055_v19 = vmul.f32 %v2054_v8, %v2030_v35  ;;  %v2107_v58 = vadd.f32 0.18741608, %v2106_v28  ;;  %v2119_v13 = vmul.f32 %v2118_v10, %v4074_v33  ;;  %v4129_v11 = vmul.f32 0.5, %v4013_v45  ;;  %v927_v10 = vpop.f32.mrf.mxu3 }
 0x1db   : > { %v2718_v31 = vpop.eup %2717  ;;  %v2154_v44 = vadd.f32 0.014752088, %v2153_v43  ;;  %v2178_v30 = vmul.f32 %v4124_v12, %v4124_v12  ;;  %v925_v60 = vadd.f32 %v924_v4, %v812_v40  ;;  %v2069_v6 = vadd.f32 1.1283791, %v2068_v14 }
 0x1dc   : > { %v2633_v63 = vclamps-f32 %v2055_v19, 1.0  ;;  %v2082_v29 = vmul.f32 %v2718_v31, %v4108_v32  ;;  %v2144_v50 = vmul.f32 %v2143_v57, %v4098_v21  ;;  %v2090_v5 = vand.u32 2147483647, %v4108_v32  ;;  %v814_v62 = vpop.f32.mrf.mxu2 }
 0x1dd   : > { %v4136_v20 = vadd.f32 1.0, %v2119_v13  ;;  %v2155_v45 = vmul.f32 %v2154_v44, %v4098_v21  ;;  %v4139_v17 = vmin.f32 %v2178_v30, 16.0  ;;  %v2092_v54 = vand.u32 2147483648, %v4108_v32 }
 0x1de   : > { %v2440_v37 = vadd.f32 1.0, %v2633_v63  ;;  %v2083_v25 = vsub.f32 1.0, %v2082_v29  ;;  %v2108_v26 = vmul.f32 %v2107_v58, %v4074_v33  ;;  %vm2087_vm12 = vweird.f32 %v2718_v31  ;;  %v704_v63 = vpop.f32.mrf.mxu1 }
 0x1df   : > { %2719 = vrcp.f32 %v4136_v20  ;;  %v4145_v16 = vadd.f32 %v3909_v51, %v925_v60  ;;  %v702_v0 = vadd.f32 %v701_v18, %v588_v7  ;;  %v2145_v55 = vadd.f32 0.05243302, %v2144_v50 }
 0x1e0   : > { %v2472_v41 = vmul.f32 %v2440_v37, %v1096_v24  ;;  %v2084_v22 = vmul.f32 %v2718_v31, %v2083_v25  ;;  %v2156_v53 = vadd.f32 0.112945676, %v2155_v45  ;;  %vm2086_vm13 = vweird.f32 %v4108_v32 }
 0x1e1   : > { %vm4148_vm14 = vcmp.eq.f32.partialorder %v2090_v5, 8.507059e+37  ;;  %v2180_v56 = vmul.f32 2.1237322e-06, %v4139_v17  ;;  %v2191_v33 = vmul.f32 3.8918573e-05, %v4139_v17  ;;  %v2093_v2 = vor.u32 1.1754944e-38, %v2092_v54  ;;  %vm2088_vm15 = vmor %vm2086_vm13, %vm2087_vm12  ;;  %v591_v60 = vpop.f32.mrf.mxu0 }
 0x1e2   : > { %2504 = vst [vmem:[%s3255_s17 + $0xb0] sm:$0xff] %v2472_v41  ;;  %v2085_v15 = vadd.f32 %v2718_v31, %v2084_v22  ;;  %v2109_v42 = vadd.f32 1.1283791, %v2108_v26  ;;  %v2157_v3 = vmul.f32 %v2156_v53, %v4098_v21  ;;  %v2070_v47 = vmul.f32 %v2069_v6, %v4025_v48 }
 0x1e3   : > { %v2181_v32 = vadd.f32 0.00028619796, %v2180_v56  ;;  %v2192_v36 = vadd.f32 0.001143296, %v2191_v33  ;;  %v4159_v28 = vmul.f32 0.70710677, %v4145_v16  ;;  %v2146_v38 = vmul.f32 %v2145_v55, %v4098_v21 }
 0x1e4   : > { %v2089_v1 = vsel %vm2088_vm15, %v2718_v31, %v2085_v15  ;;  %v2158_v59 = vadd.f32 0.4994258, %v2157_v3  ;;  %v815_v35 = vadd.f32 %v814_v62, %v702_v0  ;;  %v2130_v8 = vand.u32 2147483647, %v4136_v20  ;;  %v817_v22 = vpop.f32.mrf.mxu2 }
 0x1e5   : > { %v2720_v52 = vpop.eup %2719  ;;  %v2094_v39 = vsel %vm4148_vm14, %v2093_v2, %v2089_v1  ;;  %v2182_v61 = vmul.f32 %v2181_v32, %v4139_v17  ;;  %v2193_v48 = vmul.f32 %v2192_v36, %v4139_v17  ;;  %v2218_v14 = vmul.f32 %v4159_v28, %v4159_v28  ;;  %v930_v36 = vpop.f32.mrf.mxu3 }
 0x1e6   : > { %v2095_v57 = vmul.f32 %v2094_v39, %v2070_v47  ;;  %v2122_v4 = vmul.f32 %v2720_v52, %v4136_v20  ;;  %v2132_v43 = vand.u32 2147483648, %v4136_v20  ;;  %v2159_v40 = vmul.f32 %v2158_v59, %v4098_v21 }
 0x1e7   : > { %v2183_v24 = vadd.f32 0.0036580483, %v2182_v61  ;;  %v2194_v19 = vadd.f32 0.014752088, %v2193_v48  ;;  %v4172_v58 = vmin.f32 %v2218_v14, 16.0  ;;  %v928_v30 = vadd.f32 %v927_v10, %v815_v35 }
 0x1e8   : > { %v2634_v13 = vclamps-f32 %v2095_v57, 1.0  ;;  %v2123_v31 = vsub.f32 1.0, %v2122_v4  ;;  %v2147_v44 = vadd.f32 0.18741608, %v2146_v38  ;;  %v4174_v6 = vadd.f32 1.0, %v2159_v40 }
 0x1e9   : > { %v2184_v29 = vmul.f32 %v2183_v24, %v4139_v17  ;;  %v2195_v50 = vmul.f32 %v2194_v19, %v4139_v17  ;;  %v2220_v7 = vmul.f32 2.1237322e-06, %v4172_v58  ;;  %vm2127_vm0 = vweird.f32 %v2720_v52  ;;  %v594_v14 = vpop.f32.mrf.mxu0 }
 0x1ea   : > { %v2441_v18 = vadd.f32 1.0, %v2634_v13  ;;  %v2124_v5 = vmul.f32 %v2720_v52, %v2123_v31  ;;  %v2231_v45 = vmul.f32 3.8918573e-05, %v4172_v58  ;;  %v2110_v37 = vmul.f32 %v2109_v42, %v4058_v49 }
 0x1eb   : > { %vm2126_vm1 = vweird.f32 %v4136_v20  ;;  %2721 = vrcp.f32 %v4174_v6  ;;  %v4184_v25 = vadd.f32 %v3909_v51, %v928_v30  ;;  %v2185_v0 = vadd.f32 0.05243302, %v2184_v29 }
 0x1ec   : > { %v2473_v54 = vmul.f32 %v2441_v18, %v4129_v11  ;;  %v2125_v26 = vadd.f32 %v2720_v52, %v2124_v5  ;;  %v2196_v41 = vadd.f32 0.112945676, %v2195_v50  ;;  %vm2128_vm2 = vmor %vm2126_vm1, %vm2127_vm0  ;;  %v2133_v55 = vor.u32 1.1754944e-38, %v2132_v43  ;;  %v820_v50 = vpop.f32.mrf.mxu2 }
 0x1ed   : > { %v2221_v53 = vadd.f32 0.00028619796, %v2220_v7  ;;  %v2232_v9 = vadd.f32 0.001143296, %v2231_v45  ;;  %v705_v56 = vadd.f32 %v704_v63, %v591_v60  ;;  %vm2131_vm3 = vcmp.eq.f32.partialorder %v2130_v8, 8.507059e+37 }
 0x1ee   : > { %2505 = vst [vmem:[%s3255_s17 + $0xb8] sm:$0xff] %v2473_v54  ;;  %v2129_v49 = vsel %vm2128_vm2, %v2720_v52, %v2125_v26  ;;  %v2148_v20 = vmul.f32 %v2147_v44, %v4098_v21  ;;  %v2197_v33 = vmul.f32 %v2196_v41, %v4139_v17  ;;  %v4193_v2 = vmul.f32 0.70710677, %v4184_v25 }
 0x1ef   : > { %v2134_v62 = vsel %vm2131_vm3, %v2133_v55, %v2129_v49  ;;  %v2222_v15 = vmul.f32 %v2221_v53, %v4172_v58  ;;  %v2233_v11 = vmul.f32 %v2232_v9, %v4172_v58  ;;  %v1098_v42 = vmul.f32 0.5, %v4045_v34  ;;  %v707_v34 = vpop.f32.mrf.mxu1  ;;  %v933_v9 = vpop.f32.mrf.mxu3 }
 0x1f0   : > { %v2135_v3 = vmul.f32 %v2134_v62, %v2110_v37  ;;  %v2186_v47 = vmul.f32 %v2185_v0, %v4139_v17  ;;  %v2198_v32 = vadd.f32 0.4994258, %v2197_v33  ;;  %v2258_v59 = vmul.f32 %v4193_v2, %v4193_v2 }
 0x1f1   : > { %v2722_v1 = vpop.eup %2721  ;;  %v2223_v38 = vadd.f32 0.0036580483, %v2222_v15  ;;  %v2234_v21 = vadd.f32 0.014752088, %v2233_v11  ;;  %v818_v35 = vadd.f32 %v817_v22, %v705_v56  ;;  %v2149_v39 = vadd.f32 1.1283791, %v2148_v20 }
 0x1f2   : > { %v2635_v52 = vclamps-f32 %v2135_v3, 1.0  ;;  %v2162_v61 = vmul.f32 %v2722_v1, %v4174_v6  ;;  %v2170_v48 = vand.u32 2147483647, %v4174_v6  ;;  %v2172_v10 = vand.u32 2147483648, %v4174_v6 }
 0x1f3   : > { %v2199_v57 = vmul.f32 %v2198_v32, %v4139_v17  ;;  %v2235_v4 = vmul.f32 %v2234_v21, %v4172_v58  ;;  %v4204_v8 = vmin.f32 %v2258_v59, 16.0  ;;  %v2187_v24 = vadd.f32 0.18741608, %v2186_v47  ;;  %v597_v21 = vpop.f32.mrf.mxu0 }
 0x1f4   : > { %v2442_v43 = vadd.f32 1.0, %v2635_v52  ;;  %v2163_v40 = vsub.f32 1.0, %v2162_v61  ;;  %v2224_v19 = vmul.f32 %v2223_v38, %v4172_v58  ;;  %v931_v44 = vadd.f32 %v930_v36, %v818_v35 }
 0x1f5   : > { %v4207_v13 = vadd.f32 1.0, %v2199_v57  ;;  %v2236_v31 = vadd.f32 0.112945676, %v2235_v4  ;;  %v708_v30 = vadd.f32 %v707_v34, %v594_v14  ;;  %vm2167_vm4 = vweird.f32 %v2722_v1 }
 0x1f6   : > { %v2474_v60 = vmul.f32 %v2442_v43, %v1098_v42  ;;  %v2164_v63 = vmul.f32 %v2722_v1, %v2163_v40  ;;  %v2260_v29 = vmul.f32 2.1237322e-06, %v4204_v8  ;;  %v2150_v7 = vmul.f32 %v2149_v39, %v4083_v46 }
 0x1f7   : > { %vm2166_vm5 = vweird.f32 %v4174_v6  ;;  %vm4212_vm6 = vcmp.eq.f32.partialorder %v2170_v48, 8.507059e+37  ;;  %2723 = vrcp.f32 %v4207_v13  ;;  %v2225_v45 = vadd.f32 0.05243302, %v2224_v19  ;;  %v710_v59 = vpop.f32.mrf.mxu1 }
 0x1f8   : > { %2506 = vst [vmem:[%s3255_s17 + $0xc0] sm:$0xff] %v2474_v60  ;;  %v2165_v5 = vadd.f32 %v2722_v1, %v2164_v63  ;;  %v2237_v37 = vmul.f32 %v2236_v31, %v4172_v58  ;;  %v2261_v54 = vadd.f32 0.00028619796, %v2260_v29  ;;  %vm2168_vm7 = vmor %vm2166_vm5, %vm2167_vm4  ;;  %v2173_v26 = vor.u32 1.1754944e-38, %v2172_v10 }
 0x1f9   : > { %v2271_v0 = vmul.f32 3.8918573e-05, %v4204_v8  ;;  %v4221_v46 = vadd.f32 %v3909_v51, %v931_v44  ;;  %v821_v6 = vadd.f32 %v820_v50, %v708_v30  ;;  %v2188_v22 = vmul.f32 %v2187_v24, %v4139_v17  ;;  %v823_v30 = vpop.f32.mrf.mxu2 }
 0x1fa   : > { %v2169_v41 = vsel %vm2168_vm7, %v2722_v1, %v2165_v5  ;;  %v2238_v55 = vadd.f32 0.4994258, %v2237_v37  ;;  %v2262_v53 = vmul.f32 %v2261_v54, %v4204_v8  ;;  %v1099_v33 = vmul.f32 0.5, %v4071_v27 }
 0x1fb   : > { %v2174_v56 = vsel %vm4212_vm6, %v2173_v26, %v2169_v41  ;;  %v2272_v49 = vadd.f32 0.001143296, %v2271_v0  ;;  %v4228_v20 = vmul.f32 0.70710677, %v4221_v46  ;;  %v2226_v15 = vmul.f32 %v2225_v45, %v4172_v58 }
 0x1fc   : > { %v2175_v62 = vmul.f32 %v2174_v56, %v2150_v7  ;;  %v2239_v11 = vmul.f32 %v2238_v55, %v4172_v58  ;;  %v4234_v17 = vmul.f32 0.5, %v4114_v23  ;;  %v934_v32 = vadd.f32 %v933_v9, %v821_v6  ;;  %v936_v9 = vpop.f32.mrf.mxu3 }
 0x1fd   : > { %v2724_v42 = vpop.eup %2723  ;;  %v2273_v3 = vmul.f32 %v2272_v49, %v4204_v8  ;;  %v2298_v47 = vmul.f32 %v4228_v20, %v4228_v20  ;;  %v2189_v1 = vadd.f32 1.1283791, %v2188_v22  ;;  %v2263_v27 = vadd.f32 0.0036580483, %v2262_v53 }
 0x1fe   : > { %v2636_v36 = vclamps-f32 %v2175_v62, 1.0  ;;  %v2202_v38 = vmul.f32 %v2724_v42, %v4207_v13  ;;  %v2210_v35 = vand.u32 2147483647, %v4207_v13  ;;  %v4241_v52 = vadd.f32 1.0, %v2239_v11 }
 0x1ff   : > { %v2274_v39 = vadd.f32 0.014752088, %v2273_v3  ;;  %v4243_v23 = vmin.f32 %v2298_v47, 16.0  ;;  %v2212_v14 = vand.u32 2147483648, %v4207_v13  ;;  %v2227_v34 = vadd.f32 0.18741608, %v2226_v15 }
 0x200   : > { %v2443_v61 = vadd.f32 1.0, %v2636_v36  ;;  %v2203_v48 = vsub.f32 1.0, %v2202_v38  ;;  %vm2207_vm8 = vweird.f32 %v2724_v42  ;;  %2725 = vrcp.f32 %v4241_v52 }
 0x201   : > { %v4248_v10 = vadd.f32 %v3909_v51, %v934_v32  ;;  %v711_v57 = vadd.f32 %v710_v59, %v597_v21  ;;  %v2264_v40 = vmul.f32 %v2263_v27, %v4204_v8  ;;  %v2275_v24 = vmul.f32 %v2274_v39, %v4204_v8 }
 0x202   : > { %v2475_v4 = vmul.f32 %v2443_v61, %v1099_v33  ;;  %v2204_v43 = vmul.f32 %v2724_v42, %v2203_v48  ;;  %vm2206_vm9 = vweird.f32 %v4207_v13  ;;  %vm4253_vm10 = vcmp.eq.f32.partialorder %v2210_v35, 8.507059e+37 }
 0x203   : > { %v2300_v31 = vmul.f32 2.1237322e-06, %v4243_v23  ;;  %v2311_v44 = vmul.f32 3.8918573e-05, %v4243_v23  ;;  %v2213_v60 = vor.u32 1.1754944e-38, %v2212_v14  ;;  %v2228_v63 = vmul.f32 %v2227_v34, %v4172_v58  ;;  %vm2208_vm11 = vmor %vm2206_vm9, %vm2207_vm8 }
 0x204   : > { %2507 = vst [vmem:[%s3255_s17 + $0xc8] sm:$0xff] %v2475_v4  ;;  %v2205_v51 = vadd.f32 %v2724_v42, %v2204_v43  ;;  %v2276_v29 = vadd.f32 0.112945676, %v2275_v24  ;;  %v2190_v50 = vmul.f32 %v2189_v1, %v4124_v12  ;;  %v4264_v18 = vmul.f32 0.70710677, %v4248_v10 }
 0x205   : > { %v2301_v13 = vadd.f32 0.00028619796, %v2300_v31  ;;  %v2312_v7 = vadd.f32 0.001143296, %v2311_v44  ;;  %v2265_v45 = vadd.f32 0.05243302, %v2264_v40  ;;  %v824_v54 = vadd.f32 %v823_v30, %v711_v57 }
 0x206   : > { %v2209_v5 = vsel %vm2208_vm11, %v2724_v42, %v2205_v51  ;;  %v2277_v37 = vmul.f32 %v2276_v29, %v4204_v8  ;;  %v2726_v26 = vpop.eup %2725  ;;  %v2338_v6 = vmul.f32 %v4264_v18, %v4264_v18  ;;  %v2229_v22 = vadd.f32 1.1283791, %v2228_v63 }
 0x207   : > { %v2214_v0 = vsel %vm4253_vm10, %v2213_v60, %v2209_v5  ;;  %v2302_v58 = vmul.f32 %v2301_v13, %v4243_v23  ;;  %v2313_v12 = vmul.f32 %v2312_v7, %v4243_v23  ;;  %v2242_v55 = vmul.f32 %v2726_v26, %v4241_v52 }
 0x208   : > { %v2215_v41 = vmul.f32 %v2214_v0, %v2190_v50  ;;  %v2250_v53 = vand.u32 2147483647, %v4241_v52  ;;  %v2278_v56 = vadd.f32 0.4994258, %v2277_v37  ;;  %v2252_v11 = vand.u32 2147483648, %v4241_v52 }
 0x209   : > { %v2303_v49 = vadd.f32 0.0036580483, %v2302_v58  ;;  %v2314_v33 = vadd.f32 0.014752088, %v2313_v12  ;;  %v2243_v15 = vsub.f32 1.0, %v2242_v55  ;;  %v4276_v42 = vmin.f32 %v2338_v6, 16.0 }
 0x20a   : > { %v2637_v62 = vclamps-f32 %v2215_v41, 1.0  ;;  %v2266_v3 = vmul.f32 %v2265_v45, %v4204_v8  ;;  %v2279_v47 = vmul.f32 %v2278_v56, %v4204_v8  ;;  %v937_v36 = vadd.f32 %v936_v9, %v824_v54 }
 0x20b   : > { %v2315_v32 = vmul.f32 %v2314_v33, %v4243_v23  ;;  %v2244_v38 = vmul.f32 %v2726_v26, %v2243_v15  ;;  %vm2247_vm12 = vweird.f32 %v2726_v26  ;;  %v2340_v27 = vmul.f32 2.1237322e-06, %v4276_v42 }
 0x20c   : > { %v2444_v1 = vadd.f32 1.0, %v2637_v62  ;;  %v2230_v21 = vmul.f32 %v2229_v22, %v4159_v28  ;;  %v4283_v59 = vadd.f32 1.0, %v2279_v47  ;;  %v2304_v35 = vmul.f32 %v2303_v49, %v4243_v23  ;;  %v2737_v28 = vld [vmem:[%s4362_s2] ss:$0 sm:$0xff] }
 0x20d   : > { %v2316_v39 = vadd.f32 0.112945676, %v2315_v32  ;;  %v2245_v48 = vadd.f32 %v2726_v26, %v2244_v38  ;;  %vm2246_vm13 = vweird.f32 %v4241_v52  ;;  %v2351_v14 = vmul.f32 3.8918573e-05, %v4276_v42 }
 0x20e   : > { %v2476_v61 = vmul.f32 %v2444_v1, %v4234_v17  ;;  %vm2248_vm14 = vmor %vm2246_vm13, %vm2247_vm12  ;;  %v2253_v34 = vor.u32 1.1754944e-38, %v2252_v11  ;;  %2727 = vrcp.f32 %v4283_v59  ;;  %v2341_v57 = vadd.f32 0.00028619796, %v2340_v27 }
 0x20f   : > { %v4293_v4 = vadd.f32 %v2737_v28, %v937_v36  ;;  %v2249_v43 = vsel %vm2248_vm14, %v2726_v26, %v2245_v48  ;;  %vm2251_vm15 = vcmp.eq.f32.partialorder %v2250_v53, 8.507059e+37  ;;  %v2267_v17 = vadd.f32 0.18741608, %v2266_v3 }
 0x210   : > { %2508 = vst [vmem:[%s3255_s17 + $0xd0] sm:$0xff] %v2476_v61  ;;  %v2317_v40 = vmul.f32 %v2316_v39, %v4243_v23  ;;  %v2254_v52 = vsel %vm2251_vm15, %v2253_v34, %v2249_v43  ;;  %v2305_v24 = vadd.f32 0.05243302, %v2304_v35  ;;  %v2352_v19 = vadd.f32 0.001143296, %v2351_v14 }
 0x211   : > { %v2255_v31 = vmul.f32 %v2254_v52, %v2230_v21  ;;  %v2342_v30 = vmul.f32 %v2341_v57, %v4276_v42  ;;  %v4300_v60 = vmul.f32 0.70710677, %v4293_v4  ;;  %v2268_v29 = vmul.f32 %v2267_v17, %v4204_v8 }
 0x212   : > { %v2318_v44 = vadd.f32 0.4994258, %v2317_v40  ;;  %v2353_v51 = vmul.f32 %v2352_v19, %v4276_v42  ;;  %v2306_v7 = vmul.f32 %v2305_v24, %v4243_v23  ;;  %v1101_v37 = vmul.f32 0.5, %v4145_v16 }
 0x213   : > { %v2638_v63 = vclamps-f32 %v2255_v31, 1.0  ;;  %v2378_v45 = vmul.f32 %v4300_v60, %v4300_v60  ;;  %v2343_v58 = vadd.f32 0.0036580483, %v2342_v30  ;;  %v2269_v41 = vadd.f32 1.1283791, %v2268_v29 }
 0x214   : > { %v2319_v50 = vmul.f32 %v2318_v44, %v4243_v23  ;;  %v2728_v13 = vpop.eup %2727  ;;  %v2354_v5 = vadd.f32 0.014752088, %v2353_v51  ;;  %v2290_v55 = vand.u32 2147483647, %v4283_v59  ;;  %v2292_v53 = vand.u32 2147483648, %v4283_v59 }
 0x215   : > { %v2445_v54 = vadd.f32 1.0, %v2638_v63  ;;  %v2282_v26 = vmul.f32 %v2728_v13, %v4283_v59  ;;  %v4312_v12 = vmin.f32 %v2378_v45, 16.0  ;;  %v2307_v9 = vadd.f32 0.18741608, %v2306_v7 }
 0x216   : > { %v4309_v0 = vadd.f32 1.0, %v2319_v50  ;;  %v2355_v8 = vmul.f32 %v2354_v5, %v4276_v42  ;;  %vm2287_vm0 = vweird.f32 %v2728_v13  ;;  %v2344_v33 = vmul.f32 %v2343_v58, %v4276_v42 }
 0x217   : > { %v2477_v6 = vmul.f32 %v2445_v54, %v1101_v37  ;;  %v2283_v22 = vsub.f32 1.0, %v2282_v26  ;;  %v2380_v49 = vmul.f32 2.1237322e-06, %v4312_v12  ;;  %v2391_v62 = vmul.f32 3.8918573e-05, %v4312_v12 }
 0x218   : > { %2729 = vrcp.f32 %v4309_v0  ;;  %v2356_v56 = vadd.f32 0.112945676, %v2355_v8  ;;  %vm2286_vm1 = vweird.f32 %v4283_v59  ;;  %v2270_v47 = vmul.f32 %v2269_v41, %v4193_v2 }
 0x219   : > { %2509 = vst [vmem:[%s3255_s17 + $0xd8] sm:$0xff] %v2477_v6  ;;  %v2284_v16 = vmul.f32 %v2728_v13, %v2283_v22  ;;  %v2381_v3 = vadd.f32 0.00028619796, %v2380_v49  ;;  %vm2288_vm2 = vmor %vm2286_vm1, %vm2287_vm0  ;;  %v2293_v32 = vor.u32 1.1754944e-38, %v2292_v53  ;;  %v2392_v36 = vadd.f32 0.001143296, %v2391_v62 }
 0x21a   : > { %v2357_v11 = vmul.f32 %v2356_v56, %v4276_v42  ;;  %vm2291_vm3 = vcmp.eq.f32.partialorder %v2290_v55, 8.507059e+37  ;;  %v2308_v38 = vmul.f32 %v2307_v9, %v4243_v23  ;;  %v2345_v39 = vadd.f32 0.05243302, %v2344_v33 }
 0x21b   : > { %v2285_v15 = vadd.f32 %v2728_v13, %v2284_v16  ;;  %v2382_v61 = vmul.f32 %v2381_v3, %v4312_v12  ;;  %v2393_v59 = vmul.f32 %v2392_v36, %v4312_v12  ;;  %v1102_v2 = vmul.f32 0.5, %v4184_v25 }
 0x21c   : > { %v2358_v27 = vadd.f32 0.4994258, %v2357_v11  ;;  %v2309_v43 = vadd.f32 1.1283791, %v2308_v38  ;;  %v2332_v23 = vand.u32 2147483648, %v4309_v0  ;;  %v2346_v40 = vmul.f32 %v2345_v39, %v4276_v42 }
 0x21d   : > { %v2289_v1 = vsel %vm2288_vm2, %v2728_v13, %v2285_v15  ;;  %v2394_v57 = vadd.f32 0.014752088, %v2393_v59  ;;  %v2383_v24 = vadd.f32 0.0036580483, %v2382_v61  ;;  %v2330_v25 = vand.u32 2147483647, %v4309_v0 }
 0x21e   : > { %v2730_v21 = vpop.eup %2729  ;;  %v2294_v35 = vsel %vm2291_vm3, %v2293_v32, %v2289_v1  ;;  %v2359_v34 = vmul.f32 %v2358_v27, %v4276_v42  ;;  %vm2326_vm5 = vweird.f32 %v4309_v0  ;;  %v2333_v29 = vor.u32 1.1754944e-38, %v2332_v23 }
 0x21f   : > { %v2295_v48 = vmul.f32 %v2294_v35, %v2270_v47  ;;  %v2322_v14 = vmul.f32 %v2730_v21, %v4309_v0  ;;  %v2395_v19 = vmul.f32 %v2394_v57, %v4312_v12  ;;  %vm2327_vm4 = vweird.f32 %v2730_v21 }
 0x220   : > { %v2360_v52 = vadd.f32 1.0, %v2359_v34  ;;  %vm2328_vm6 = vmor %vm2326_vm5, %vm2327_vm4  ;;  %v2347_v50 = vadd.f32 0.18741608, %v2346_v40  ;;  %v2384_v13 = vmul.f32 %v2383_v24, %v4312_v12  ;;  %v2310_v7 = vmul.f32 %v2309_v43, %v4228_v20 }
 0x221   : > { %v2639_v28 = vclamps-f32 %v2295_v48, 1.0  ;;  %v2323_v17 = vsub.f32 1.0, %v2322_v14  ;;  %v2396_v63 = vadd.f32 0.112945676, %v2395_v19  ;;  %vm2331_vm7 = vcmp.eq.f32.partialorder %v2330_v25, 8.507059e+37 }
 0x222   : > { %2731 = vrcp.f32 %v2360_v52  ;;  %v2348_v8 = vmul.f32 %v2347_v50, %v4276_v42  ;;  %v2385_v0 = vadd.f32 0.05243302, %v2384_v13  ;;  %v1103_v55 = vmul.f32 0.5, %v4221_v46 }
 0x223   : > { %v2446_v31 = vadd.f32 1.0, %v2639_v28  ;;  %v2324_v44 = vmul.f32 %v2730_v21, %v2323_v17  ;;  %v2397_v45 = vmul.f32 %v2396_v63, %v4312_v12  ;;  %v2372_v16 = vand.u32 2147483648, %v2360_v52 }
 0x224   : > { %v2349_v9 = vadd.f32 1.1283791, %v2348_v8  ;;  %v2386_v56 = vmul.f32 %v2385_v0, %v4312_v12  ;;  %v2370_v15 = vand.u32 2147483647, %v2360_v52  ;;  %vm2366_vm9 = vweird.f32 %v2360_v52 }
 0x225   : > { %v2478_v30 = vmul.f32 %v2446_v31, %v1102_v2  ;;  %v2325_v51 = vadd.f32 %v2730_v21, %v2324_v44  ;;  %v2398_v26 = vadd.f32 0.4994258, %v2397_v45  ;;  %v2373_v11 = vor.u32 1.1754944e-38, %v2372_v16 }
 0x226   : > { %v2387_v3 = vadd.f32 0.18741608, %v2386_v56  ;;  %v2350_v46 = vmul.f32 %v2349_v9, %v4264_v18  ;;  %vm2371_vm11 = vcmp.eq.f32.partialorder %v2370_v15, 8.507059e+37  ;;  %v1104_v35 = vmul.f32 0.5, %v4248_v10 }
 0x227   : > { %2510 = vst [vmem:[%s3255_s17 + $0xe0] sm:$0xff] %v2478_v30  ;;  %v2329_v5 = vsel %vm2328_vm6, %v2730_v21, %v2325_v51  ;;  %v2399_v22 = vmul.f32 %v2398_v26, %v4312_v12  ;;  %v1105_v23 = vmul.f32 0.5, %v4293_v4 }
 0x228   : > { %v2334_v37 = vsel %vm2331_vm7, %v2333_v29, %v2329_v5  ;;  %v2732_v58 = vpop.eup %2731  ;;  %v2388_v38 = vmul.f32 %v2387_v3, %v4312_v12 }
 0x229   : > { %v2335_v54 = vmul.f32 %v2334_v37, %v2310_v7  ;;  %v2362_v41 = vmul.f32 %v2732_v58, %v2360_v52  ;;  %v2400_v49 = vadd.f32 1.0, %v2399_v22  ;;  %vm2367_vm8 = vweird.f32 %v2732_v58 }
 0x22a   : > { %vm2368_vm10 = vmor %vm2366_vm9, %vm2367_vm8  ;;  %v2389_v59 = vadd.f32 1.1283791, %v2388_v38 }
 0x22b   : > { %v2640_v6 = vclamps-f32 %v2335_v54, 1.0  ;;  %v2363_v20 = vsub.f32 1.0, %v2362_v41  ;;  %2733 = vrcp.f32 %v2400_v49  ;;  %v2412_v48 = vand.u32 2147483648, %v2400_v49 }
 0x22c   : > { %v2410_v18 = vand.u32 2147483647, %v2400_v49  ;;  %vm2406_vm13 = vweird.f32 %v2400_v49  ;;  %v2390_v12 = vmul.f32 %v2389_v59, %v4300_v60 }
 0x22d   : > { %v2447_v53 = vadd.f32 1.0, %v2640_v6  ;;  %v2364_v62 = vmul.f32 %v2732_v58, %v2363_v20  ;;  %v2413_v57 = vor.u32 1.1754944e-38, %v2412_v48 }
 0x22e   : > { %vm2411_vm15 = vcmp.eq.f32.partialorder %v2410_v18, 8.507059e+37 }
 0x22f   : > { %v2479_v33 = vmul.f32 %v2447_v53, %v1103_v55  ;;  %v2365_v42 = vadd.f32 %v2732_v58, %v2364_v62 }
 0x231   : > { %2511 = vst [vmem:[%s3255_s17 + $0xe8] sm:$0xff] %v2479_v33  ;;  %v2369_v47 = vsel %vm2368_vm10, %v2732_v58, %v2365_v42  ;;  %v2734_v1 = vpop.eup %2733 }
 0x232   : > { %v2374_v32 = vsel %vm2371_vm11, %v2373_v11, %v2369_v47  ;;  %v2402_v21 = vmul.f32 %v2734_v1, %v2400_v49  ;;  %vm2407_vm12 = vweird.f32 %v2734_v1 }
 0x233   : > { %v2375_v36 = vmul.f32 %v2374_v32, %v2350_v46  ;;  %vm2408_vm14 = vmor %vm2406_vm13, %vm2407_vm12 }
 0x234   : > { %v2403_v61 = vsub.f32 1.0, %v2402_v21 }
 0x235   : > { %v2641_v27 = vclamps-f32 %v2375_v36, 1.0 }
 0x236   : > { %v2404_v2 = vmul.f32 %v2734_v1, %v2403_v61 }
 0x237   : > { %v2448_v39 = vadd.f32 1.0, %v2641_v27 }
 0x238   : > { %v2405_v34 = vadd.f32 %v2734_v1, %v2404_v2 }
 0x239   : > { %v2480_v14 = vmul.f32 %v2448_v39, %v1104_v35 }
 0x23a   : > { %v2409_v28 = vsel %vm2408_vm14, %v2734_v1, %v2405_v34 }
 0x23b   : > { %2512 = vst [vmem:[%s3255_s17 + $0xf0] sm:$0xff] %v2480_v14  ;;  %v2414_v43 = vsel %vm2411_vm15, %v2413_v57, %v2409_v28 }
 0x23c   : > { %v2415_v10 = vmul.f32 %v2414_v43, %v2390_v12 }
 0x23e   : > { %v2642_v17 = vclamps-f32 %v2415_v10, 1.0 }
 0x240   : > { %v2449_v40 = vadd.f32 1.0, %v2642_v17 }
 0x242   : > { %v2481_v52 = vmul.f32 %v2449_v40, %v1105_v23 }
 0x244   : > { %2513 = vst [vmem:[%s3255_s17 + $0xf8] sm:$0xff] %v2481_v52 }
 0x245 PF: > { %s13_s14 = sadd.s32 1, %s2760_s14   ;;  %s4403_s12 = smov %s2756_s13 }
 0x246   : > { %p10_p5 = scmp.ge.s32.totalorder %s13_s14, 4   ;;  %s4404_s13 = smov %s4406_s15 }
 0x248   :  { %12 = sbr.rel (!%p10_p5) target bundleno = 2 (0x2), region = 73 }

</bundles_post_ra>
